<compile_context>
chip_gen: v7x
topology: tpu7x:2x2x1
jax: 0.10.0
libtpu: 0.0.40
codegen_flags: <defaults>
</compile_context>

<pallas_src>
import math

import jax
import jax.numpy as jnp
from jax.experimental import pallas as pl
from jax.experimental.pallas import tpu as pltpu

# ---- model hyper-params (small, but structurally consistent with the module) ----
D_MODEL = 64
NHEAD = 4
NUM_LAYERS = 2
DIM_FF = 128          # module default is 512; scaled down for the small test
LATENT_DIM = 6
DIFF_DIM = 4          # config.diff_dim
NOTE_FEAT = 8         # raw per-note feature width consumed by NoteEncoder
NUM_TYPES = 4         # note-type vocabulary size
NUM_TRACKS = 8        # circular positional-encoding period
LN_EPS = 1e-5
HEAD_DIM = D_MODEL // NHEAD
OUT_W = 128                                   # lane-dense packed-output width
N_OUT = 1 + LATENT_DIM + DIFF_DIM + LATENT_DIM  # level | dim_weights | dim_scores | z


# -------------------- in-kernel helpers --------------------
def _gelu(x):
    # exact (erf-based) GELU == torch.nn.GELU(approximate='none')
    return 0.5 * x * (1.0 + jax.lax.erf(x * (1.0 / math.sqrt(2.0))))


def _layernorm(x, g, b):
    mu = jnp.mean(x, axis=-1, keepdims=True)
    var = jnp.mean((x - mu) ** 2, axis=-1, keepdims=True)
    return (x - mu) * jax.lax.rsqrt(var + LN_EPS) * g + b


def _softmax(x, approx):
    m = jnp.max(x, axis=-1, keepdims=True)
    e = jnp.exp(x - m)
    s = jnp.sum(e, axis=-1, keepdims=True)
    if approx:
        return e * pl.reciprocal(s, approx=True)   # divide rides the (idle) EUP slot
    return e / s


def _mm(x, w_bf16):
    # bf16 MXU operands, f32 accumulation
    return jnp.dot(x.astype(jnp.bfloat16), w_bf16, preferred_element_type=jnp.float32)


# -------------------- single fused forward kernel --------------------
def fused_forward_kernel(
        feat_ref, types_ref, tracks_ref, stat_ref, eps_ref,
        ne_w_ref, ne_b_ref, ne_type_ref, stat_w_ref, stat_b_ref,
        wqkv_ref, bqkv_ref, wo_ref, bo_ref,
        ln1g_ref, ln1b_ref, ln2g_ref, ln2b_ref,
        w1_ref, b1_ref, w2_ref, b2_ref,
        fp_w1_ref, fp_b1_ref, fp_w2_ref, fp_b2_ref,
        dh_w1_ref, dh_b1_ref, dh_w2_ref, dh_b2_ref,
        wg_w1_ref, wg_b1_ref, wg_w2_ref, wg_b2_ref,
        lh_w_ref, lh_b_ref,
        o_ref):
    BS = feat_ref.shape[0]
    D = ne_w_ref.shape[1]
    B = stat_ref.shape[0]
    S = BS // B
    H = NHEAD
    Dh = D // H
    scale = 1.0 / math.sqrt(Dh)

    # ---------------- stage 1: note / positional / stat embedding ----------------
    # TODO(synk): NoteEncoder is undefined in the reference file; implemented as
    # Linear(features) + note-type embedding (one-hot folded into a tiny GEMM).
    note = _mm(feat_ref[...], ne_w_ref[...]) + ne_b_ref[...]                      # (BS, D)
    type_iota = jax.lax.broadcasted_iota(jnp.int32, (BS, NUM_TYPES), 1)
    onehot = (types_ref[...] == type_iota).astype(jnp.bfloat16)
    note = note + jnp.dot(onehot, ne_type_ref[...], preferred_element_type=jnp.float32)

    # TODO(synk): CircularPositionalEncoding is undefined in the reference file;
    # implemented as a sinusoid of the circular track angle, computed in-kernel.
    half = D // 2
    idx = jax.lax.broadcasted_iota(jnp.int32, (1, half), 1).astype(jnp.float32)
    freq = jnp.exp(idx * (-2.0 * math.log(10000.0) / D))                          # (1, D/2)
    ang = tracks_ref[...].astype(jnp.float32) * (2.0 * math.pi / NUM_TRACKS)      # (BS, 1)
    phase = ang * freq                                                            # (BS, D/2)
    pos = jnp.concatenate([jnp.sin(phase), jnp.cos(phase)], axis=-1)              # (BS, D)

    stat_emb = _mm(stat_ref[...], stat_w_ref[...]) + stat_b_ref[...]              # (B, D)
    # x = pos_encoder(note_emb) + stat_fc(stat).unsqueeze(0)  (broadcast over seq)
    x = ((note + pos).reshape(B, S, D) + stat_emb[:, None, :]).reshape(BS, D)

    # ---------------- stage 2: post-LN transformer encoder layers ----------------
    for l in range(NUM_LAYERS):            # static unroll (NUM_LAYERS is small)
        qkv = _mm(x, wqkv_ref[l]) + bqkv_ref[l]                                   # (BS, 3D)
        head_outs = []
        for h in range(H):                 # per-head attention core (S=8, Dh=16: tiny)
            q_off = 0 * D + h * Dh
            k_off = 1 * D + h * Dh
            v_off = 2 * D + h * Dh
            qh = qkv[:, q_off:q_off + Dh].reshape(B, S, Dh).astype(jnp.bfloat16)
            kh = qkv[:, k_off:k_off + Dh].reshape(B, S, Dh).astype(jnp.bfloat16)
            vh = qkv[:, v_off:v_off + Dh].reshape(B, S, Dh).astype(jnp.bfloat16)
            s = jnp.einsum('bqd,bkd->bqk', qh, kh,
                           preferred_element_type=jnp.float32) * scale
            p = _softmax(s, approx=True)
            oh = jnp.einsum('bqk,bkd->bqd', p.astype(jnp.bfloat16), vh,
                            preferred_element_type=jnp.float32)
            head_outs.append(oh.reshape(BS, Dh))
        # concat(heads) @ Wo in one lane-wide GEMM (no per-head accumulator adds)
        attn = _mm(jnp.concatenate(head_outs, axis=-1), wo_ref[l]) + bo_ref[l]

        y1 = _layernorm(x + attn, ln1g_ref[l], ln1b_ref[l])
        ff = jnp.maximum(_mm(y1, w1_ref[l]) + b1_ref[l], 0.0)
        ff = _mm(ff, w2_ref[l]) + b2_ref[l]
        x = _layernorm(y1 + ff, ln2g_ref[l], ln2b_ref[l])

    # ---------------- stage 3: pooling + VAE heads + output heads ----------------
    pooled = jnp.mean(x.reshape(B, S, D), axis=1)          # == context.mean(dim=0) in torch

    # factor_proj: Linear(D,256)->GELU->Linear(256,2*latent), mu/logvar sliced in-kernel
    h1 = _gelu(_mm(pooled, fp_w1_ref[...]) + fp_b1_ref[...])
    mulv = _mm(h1, fp_w2_ref[...]) + fp_b2_ref[...]                               # (B, 2*latent)
    mu = mulv[:, :LATENT_DIM]
    logvar = mulv[:, LATENT_DIM:]
    z = mu + eps_ref[...] * jnp.exp(0.5 * logvar)                                 # reparameterize

    # dim_head (MultiHeadOutput): first linears fused into one GEMM; second linears
    # (Linear(64,1) per head) as broadcast-multiply + lane reduce on the VPU/XLU.
    dh_hidden = _gelu(_mm(pooled, dh_w1_ref[...]) + dh_b1_ref[...])               # (B, DIFF*64)
    w2_all = dh_w2_ref[...]                                                       # (DIFF, 64)
    score_cols = []
    for j in range(DIFF_DIM):
        hj = dh_hidden[:, j * 64:(j + 1) * 64]                                    # (B, 64)
        score_cols.append(jnp.sum(hj * w2_all[j:j + 1, :], axis=-1, keepdims=True))
    dim_scores = jnp.concatenate(score_cols, axis=-1) + dh_b2_ref[...]            # (B, DIFF)

    # weight_gen on cat([z, stat])
    combined = jnp.concatenate([z, stat_ref[...]], axis=-1)                       # (B, latent+4)
    g = jnp.maximum(_mm(combined, wg_w1_ref[...]) + wg_b1_ref[...], 0.0)
    logits = _mm(g, wg_w2_ref[...]) + wg_b2_ref[...]
    dim_weights = _softmax(logits, approx=False)        # exact: rows must sum to 1

    # level_head on cat([weighted_z, dim_scores]) as multiply + lane reduce (K=10, N=1)
    weighted_z = z * dim_weights
    final_feat = jnp.concatenate([weighted_z, dim_scores], axis=-1)               # (B, 10)
    level = jnp.sum(final_feat * lh_w_ref[...], axis=-1, keepdims=True) + lh_b_ref[...]

    # pack the four tiny outputs into one lane-dense (B, 128) slab (unmasked stores)
    pad = jnp.zeros((B, OUT_W - N_OUT), jnp.float32)
    o_ref[...] = jnp.concatenate([level, dim_weights, dim_scores, z, pad], axis=-1)


# -------------------- glue: parameter init + pallas_call wrapper --------------------
def init_params(key):
    keys = iter(jax.random.split(key, 40))

    def w(shape, scale=0.05, dtype=jnp.bfloat16):
        return (scale * jax.random.normal(next(keys), shape, jnp.float32)).astype(dtype)

    def zeros(shape):
        return jnp.zeros(shape, jnp.float32)

    def ones(shape):
        return jnp.ones(shape, jnp.float32)

    L = NUM_LAYERS
    return {
        # NoteEncoder stand-in + stat_fc
        'ne_w': w((NOTE_FEAT, D_MODEL)), 'ne_b': zeros((1, D_MODEL)),
        'ne_type': w((NUM_TYPES, D_MODEL)),
        'stat_w': w((4, D_MODEL)), 'stat_b': zeros((1, D_MODEL)),
        # transformer encoder layers, weights stacked on a leading layer axis
        'wqkv': w((L, D_MODEL, 3 * D_MODEL)), 'bqkv': zeros((L, 1, 3 * D_MODEL)),
        'wo': w((L, D_MODEL, D_MODEL)), 'bo': zeros((L, 1, D_MODEL)),
        'ln1g': ones((L, 1, D_MODEL)), 'ln1b': zeros((L, 1, D_MODEL)),
        'ln2g': ones((L, 1, D_MODEL)), 'ln2b': zeros((L, 1, D_MODEL)),
        'w1': w((L, D_MODEL, DIM_FF)), 'b1': zeros((L, 1, DIM_FF)),
        'w2': w((L, DIM_FF, D_MODEL)), 'b2': zeros((L, 1, D_MODEL)),
        # factor_proj (mu / logvar halves fused into one GEMM, sliced in-kernel)
        'fp_w1': w((D_MODEL, 256)), 'fp_b1': zeros((1, 256)),
        'fp_w2': w((256, 2 * LATENT_DIM)), 'fp_b2': zeros((1, 2 * LATENT_DIM)),
        # dim_head: DIFF_DIM x (Linear(D,64)->GELU->Linear(64,1))
        'dh_w1': w((D_MODEL, DIFF_DIM * 64)), 'dh_b1': zeros((1, DIFF_DIM * 64)),
        'dh_w2': w((DIFF_DIM, 64), dtype=jnp.float32), 'dh_b2': zeros((1, DIFF_DIM)),
        # weight_gen: Linear(latent+4,128)->ReLU->Linear(128,latent)
        'wg_w1': w((LATENT_DIM + 4, 128)), 'wg_b1': zeros((1, 128)),
        'wg_w2': w((128, LATENT_DIM)), 'wg_b2': zeros((1, LATENT_DIM)),
        # level_head: Linear(latent + diff_dim, 1) as a VPU multiply+reduce
        'lh_w': w((1, LATENT_DIM + DIFF_DIM), dtype=jnp.float32), 'lh_b': zeros((1, 1)),
    }


PARAM_ORDER = ('ne_w', 'ne_b', 'ne_type', 'stat_w', 'stat_b',
               'wqkv', 'bqkv', 'wo', 'bo',
               'ln1g', 'ln1b', 'ln2g', 'ln2b',
               'w1', 'b1', 'w2', 'b2',
               'fp_w1', 'fp_b1', 'fp_w2', 'fp_b2',
               'dh_w1', 'dh_b1', 'dh_w2', 'dh_b2',
               'wg_w1', 'wg_b1', 'wg_w2', 'wg_b2',
               'lh_w', 'lh_b')


def latent_difficulty_forward(params, features, note_types, track_ids, stat_features, eps):
    B, S, F = features.shape
    BS = B * S
    # present activations as row-major 2D slabs (avoids in-kernel reshape round-trips)
    feat2 = features.reshape(BS, F)
    types2 = note_types.reshape(BS, 1).astype(jnp.int32)
    tracks2 = track_ids.reshape(BS, 1).astype(jnp.int32)

    args = (feat2, types2, tracks2, stat_features, eps) + tuple(params[k] for k in PARAM_ORDER)
    out = pl.pallas_call(
        fused_forward_kernel,
        out_shape=jax.ShapeDtypeStruct((B, OUT_W), jnp.float32),
        in_specs=[pl.BlockSpec(memory_space=pltpu.MemorySpace.VMEM)] * len(args),
        out_specs=pl.BlockSpec(memory_space=pltpu.MemorySpace.VMEM),
    )(*args)

    level_pred = out[:, 0:1]
    dim_weights = out[:, 1:1 + LATENT_DIM]
    dim_scores = out[:, 1 + LATENT_DIM:1 + LATENT_DIM + DIFF_DIM]
    z = out[:, 1 + LATENT_DIM + DIFF_DIM:N_OUT]
    return level_pred, dim_weights, dim_scores, z


if __name__ == "__main__":
    key = jax.random.PRNGKey(0)
    kp, kf, kt, kr, ks, ke = jax.random.split(key, 6)
    B, S = 2, 8

    params = init_params(kp)
    features = jax.random.normal(kf, (B, S, NOTE_FEAT), jnp.float32)
    note_types = jax.random.randint(kt, (B, S), 0, NUM_TYPES)
    track_ids = jax.random.randint(kr, (B, S), 0, NUM_TRACKS)
    stat_features = jax.random.normal(ks, (B, 4), jnp.float32)
    eps = jax.random.normal(ke, (B, LATENT_DIM), jnp.float32)   # torch.randn_like(std)

    forward = jax.jit(latent_difficulty_forward)
    level_pred, dim_weights, dim_scores, z = forward(
        params, features, note_types, track_ids, stat_features, eps)
    jax.block_until_ready((level_pred, dim_weights, dim_scores, z))

    assert level_pred.shape == (B, 1)
    assert dim_weights.shape == (B, LATENT_DIM)
    assert dim_scores.shape == (B, DIFF_DIM)
    assert z.shape == (B, LATENT_DIM)
    assert bool(jnp.all(jnp.isfinite(level_pred)))
    # dim_weights rows are softmax outputs -> sum to 1
    assert bool(jnp.allclose(jnp.sum(dim_weights, axis=-1), 1.0, atol=1e-5))
    print("KERNEL_OK")
</pallas_src>

<mosaic_0001>
module attributes {stable_mosaic.version = 11 : i64} {
  func.func @fused_forward_kernel(%arg0: memref<16x8xf32, #tpu.memory_space<vmem>>, %arg1: memref<16x1xi32, #tpu.memory_space<vmem>>, %arg2: memref<16x1xi32, #tpu.memory_space<vmem>>, %arg3: memref<2x4xf32, #tpu.memory_space<vmem>>, %arg4: memref<2x6xf32, #tpu.memory_space<vmem>>, %arg5: memref<8x64xbf16, #tpu.memory_space<vmem>>, %arg6: memref<1x64xf32, #tpu.memory_space<vmem>>, %arg7: memref<4x64xbf16, #tpu.memory_space<vmem>>, %arg8: memref<4x64xbf16, #tpu.memory_space<vmem>>, %arg9: memref<1x64xf32, #tpu.memory_space<vmem>>, %arg10: memref<2x64x192xbf16, #tpu.memory_space<vmem>>, %arg11: memref<2x1x192xf32, #tpu.memory_space<vmem>>, %arg12: memref<2x64x64xbf16, #tpu.memory_space<vmem>>, %arg13: memref<2x1x64xf32, #tpu.memory_space<vmem>>, %arg14: memref<2x1x64xf32, #tpu.memory_space<vmem>>, %arg15: memref<2x1x64xf32, #tpu.memory_space<vmem>>, %arg16: memref<2x1x64xf32, #tpu.memory_space<vmem>>, %arg17: memref<2x1x64xf32, #tpu.memory_space<vmem>>, %arg18: memref<2x64x128xbf16, #tpu.memory_space<vmem>>, %arg19: memref<2x1x128xf32, #tpu.memory_space<vmem>>, %arg20: memref<2x128x64xbf16, #tpu.memory_space<vmem>>, %arg21: memref<2x1x64xf32, #tpu.memory_space<vmem>>, %arg22: memref<64x256xbf16, #tpu.memory_space<vmem>>, %arg23: memref<1x256xf32, #tpu.memory_space<vmem>>, %arg24: memref<256x12xbf16, #tpu.memory_space<vmem>>, %arg25: memref<1x12xf32, #tpu.memory_space<vmem>>, %arg26: memref<64x256xbf16, #tpu.memory_space<vmem>>, %arg27: memref<1x256xf32, #tpu.memory_space<vmem>>, %arg28: memref<4x64xf32, #tpu.memory_space<vmem>>, %arg29: memref<1x4xf32, #tpu.memory_space<vmem>>, %arg30: memref<10x128xbf16, #tpu.memory_space<vmem>>, %arg31: memref<1x128xf32, #tpu.memory_space<vmem>>, %arg32: memref<128x6xbf16, #tpu.memory_space<vmem>>, %arg33: memref<1x6xf32, #tpu.memory_space<vmem>>, %arg34: memref<1x10xf32, #tpu.memory_space<vmem>>, %arg35: memref<1x1xf32, #tpu.memory_space<vmem>>, %arg36: memref<2x128xf32, #tpu.memory_space<vmem>>) attributes {dimension_semantics = [], scalar_prefetch = 0 : i64, scratch_operands = 0 : i64, tpu.core_type = #tpu.core_type<tc>} {
    %c0 = arith.constant 0 : index
    %c0_0 = arith.constant 0 : index
    %0 = vector.load %arg0[%c0, %c0_0] : memref<16x8xf32, #tpu.memory_space<vmem>>, vector<16x8xf32>
    %c0_1 = arith.constant 0 : index
    %c0_2 = arith.constant 0 : index
    %1 = vector.load %arg5[%c0_1, %c0_2] : memref<8x64xbf16, #tpu.memory_space<vmem>>, vector<8x64xbf16>
    %2 = arith.truncf %0 : vector<16x8xf32> to vector<16x8xbf16>
    %cst = arith.constant dense<0.000000e+00> : vector<16x64xf32>
    %3 = tpu.matmul %2, %1, %cst {dimension_numbers = #tpu.dot_dimension_numbers<[1], [0], [0], [1], [0, 0, 1, 1], [], []>} : vector<16x8xbf16>, vector<8x64xbf16>, vector<16x64xf32> -> vector<16x64xf32>
    %c0_3 = arith.constant 0 : index
    %c0_4 = arith.constant 0 : index
    %4 = vector.load %arg6[%c0_3, %c0_4] : memref<1x64xf32, #tpu.memory_space<vmem>>, vector<1x64xf32>
    %5 = vector.broadcast %4 : vector<1x64xf32> to vector<16x64xf32>
    %6 = arith.addf %3, %5 : vector<16x64xf32>
    %7 = tpu.iota {dimensions = array<i32: 1>} : vector<16x4xi32>
    %c0_5 = arith.constant 0 : index
    %c0_6 = arith.constant 0 : index
    %8 = vector.load %arg1[%c0_5, %c0_6] : memref<16x1xi32, #tpu.memory_space<vmem>>, vector<16x1xi32>
    %9 = vector.broadcast %8 : vector<16x1xi32> to vector<16x4xi32>
    %10 = arith.cmpi eq, %9, %7 : vector<16x4xi32>
    %11 = arith.extui %10 : vector<16x4xi1> to vector<16x4xi32>
    %12 = arith.sitofp %11 : vector<16x4xi32> to vector<16x4xf32>
    %13 = arith.truncf %12 : vector<16x4xf32> to vector<16x4xbf16>
    %c0_7 = arith.constant 0 : index
    %c0_8 = arith.constant 0 : index
    %14 = vector.load %arg7[%c0_7, %c0_8] : memref<4x64xbf16, #tpu.memory_space<vmem>>, vector<4x64xbf16>
    %cst_9 = arith.constant dense<0.000000e+00> : vector<16x64xf32>
    %15 = tpu.matmul %13, %14, %cst_9 {dimension_numbers = #tpu.dot_dimension_numbers<[1], [0], [0], [1], [0, 0, 1, 1], [], []>} : vector<16x4xbf16>, vector<4x64xbf16>, vector<16x64xf32> -> vector<16x64xf32>
    %16 = arith.addf %6, %15 : vector<16x64xf32>
    %17 = tpu.iota {dimensions = array<i32: 1>} : vector<1x32xi32>
    %18 = arith.sitofp %17 : vector<1x32xi32> to vector<1x32xf32>
    %cst_10 = arith.constant -0.287823141 : f32
    %19 = vector.broadcast %cst_10 : f32 to vector<1x32xf32>
    %20 = arith.mulf %18, %19 : vector<1x32xf32>
    %21 = math.exp %20 : vector<1x32xf32>
    %c0_11 = arith.constant 0 : index
    %c0_12 = arith.constant 0 : index
    %22 = vector.load %arg2[%c0_11, %c0_12] : memref<16x1xi32, #tpu.memory_space<vmem>>, vector<16x1xi32>
    %23 = arith.sitofp %22 : vector<16x1xi32> to vector<16x1xf32>
    %cst_13 = arith.constant 0.785398185 : f32
    %24 = vector.broadcast %cst_13 : f32 to vector<16x1xf32>
    %25 = arith.mulf %23, %24 : vector<16x1xf32>
    %26 = vector.broadcast %25 : vector<16x1xf32> to vector<16x32xf32>
    %27 = vector.broadcast %21 : vector<1x32xf32> to vector<16x32xf32>
    %28 = arith.mulf %26, %27 : vector<16x32xf32>
    %29 = math.sin %28 : vector<16x32xf32>
    %30 = math.cos %28 : vector<16x32xf32>
    %31 = tpu.concatenate %29, %30 in 1 : vector<16x32xf32>, vector<16x32xf32> -> vector<16x64xf32>
    %c0_14 = arith.constant 0 : index
    %c0_15 = arith.constant 0 : index
    %32 = vector.load %arg3[%c0_14, %c0_15] : memref<2x4xf32, #tpu.memory_space<vmem>>, vector<2x4xf32>
    %c0_16 = arith.constant 0 : index
    %c0_17 = arith.constant 0 : index
    %33 = vector.load %arg8[%c0_16, %c0_17] : memref<4x64xbf16, #tpu.memory_space<vmem>>, vector<4x64xbf16>
    %34 = arith.truncf %32 : vector<2x4xf32> to vector<2x4xbf16>
    %cst_18 = arith.constant dense<0.000000e+00> : vector<2x64xf32>
    %35 = tpu.matmul %34, %33, %cst_18 {dimension_numbers = #tpu.dot_dimension_numbers<[1], [0], [0], [1], [0, 0, 1, 1], [], []>} : vector<2x4xbf16>, vector<4x64xbf16>, vector<2x64xf32> -> vector<2x64xf32>
    %c0_19 = arith.constant 0 : index
    %c0_20 = arith.constant 0 : index
    %36 = vector.load %arg9[%c0_19, %c0_20] : memref<1x64xf32, #tpu.memory_space<vmem>>, vector<1x64xf32>
    %37 = vector.broadcast %36 : vector<1x64xf32> to vector<2x64xf32>
    %38 = arith.addf %35, %37 : vector<2x64xf32>
    %39 = arith.addf %16, %31 : vector<16x64xf32>
    %40 = vector.shape_cast %39 : vector<16x64xf32> to vector<2x8x64xf32>
    %41 = vector.shape_cast %38 : vector<2x64xf32> to vector<2x1x64xf32>
    %42 = vector.broadcast %41 : vector<2x1x64xf32> to vector<2x8x64xf32>
    %43 = arith.addf %40, %42 : vector<2x8x64xf32>
    %44 = vector.shape_cast %43 : vector<2x8x64xf32> to vector<16x64xf32>
    %c0_21 = arith.constant 0 : index
    %c0_22 = arith.constant 0 : index
    %c0_23 = arith.constant 0 : index
    %45 = vector.load %arg10[%c0_21, %c0_22, %c0_23] : memref<2x64x192xbf16, #tpu.memory_space<vmem>>, vector<1x64x192xbf16>
    %46 = vector.shape_cast %45 : vector<1x64x192xbf16> to vector<64x192xbf16>
    %47 = arith.truncf %44 : vector<16x64xf32> to vector<16x64xbf16>
    %cst_24 = arith.constant dense<0.000000e+00> : vector<16x192xf32>
    %48 = tpu.matmul %47, %46, %cst_24 {dimension_numbers = #tpu.dot_dimension_numbers<[1], [0], [0], [1], [0, 0, 1, 1], [], []>} : vector<16x64xbf16>, vector<64x192xbf16>, vector<16x192xf32> -> vector<16x192xf32>
    %c0_25 = arith.constant 0 : index
    %c0_26 = arith.constant 0 : index
    %c0_27 = arith.constant 0 : index
    %49 = vector.load %arg11[%c0_25, %c0_26, %c0_27] : memref<2x1x192xf32, #tpu.memory_space<vmem>>, vector<1x1x192xf32>
    %50 = vector.shape_cast %49 : vector<1x1x192xf32> to vector<1x192xf32>
    %51 = vector.broadcast %50 : vector<1x192xf32> to vector<16x192xf32>
    %52 = arith.addf %48, %51 : vector<16x192xf32>
    %53 = vector.extract_strided_slice %52 {offsets = [0, 0], sizes = [16, 16], strides = [1, 1]} : vector<16x192xf32> to vector<16x16xf32>
    %54 = vector.shape_cast %53 : vector<16x16xf32> to vector<2x8x16xf32>
    %55 = arith.truncf %54 : vector<2x8x16xf32> to vector<2x8x16xbf16>
    %56 = vector.extract_strided_slice %52 {offsets = [0, 64], sizes = [16, 16], strides = [1, 1]} : vector<16x192xf32> to vector<16x16xf32>
    %57 = vector.shape_cast %56 : vector<16x16xf32> to vector<2x8x16xf32>
    %58 = arith.truncf %57 : vector<2x8x16xf32> to vector<2x8x16xbf16>
    %59 = vector.extract_strided_slice %52 {offsets = [0, 128], sizes = [16, 16], strides = [1, 1]} : vector<16x192xf32> to vector<16x16xf32>
    %60 = vector.shape_cast %59 : vector<16x16xf32> to vector<2x8x16xf32>
    %61 = arith.truncf %60 : vector<2x8x16xf32> to vector<2x8x16xbf16>
    "tpu.trace_start"() <{level = 10 : i32, message = "bqd,bkd->bqk"}> : () -> ()
    %cst_28 = arith.constant dense<0.000000e+00> : vector<2x8x8xf32>
    %62 = tpu.matmul %55, %58, %cst_28 {dimension_numbers = #tpu.dot_dimension_numbers<[2], [2], [1], [1], [0, 0, 0, 1, 1, 1], [0], [0]>} : vector<2x8x16xbf16>, vector<2x8x16xbf16>, vector<2x8x8xf32> -> vector<2x8x8xf32>
    "tpu.trace_stop"() : () -> ()
    %cst_29 = arith.constant 2.500000e-01 : f32
    %63 = vector.broadcast %cst_29 : f32 to vector<2x8x8xf32>
    %64 = arith.mulf %62, %63 : vector<2x8x8xf32>
    %cst_30 = arith.constant dense<0xFF800000> : vector<2x8xf32>
    %65 = vector.multi_reduction <maximumf>, %64, %cst_30 [2] : vector<2x8x8xf32> to vector<2x8xf32>
    %66 = vector.shape_cast %65 : vector<2x8xf32> to vector<2x8x1xf32>
    %67 = vector.broadcast %66 : vector<2x8x1xf32> to vector<2x8x8xf32>
    %68 = arith.subf %64, %67 : vector<2x8x8xf32>
    %69 = math.exp %68 : vector<2x8x8xf32>
    %cst_31 = arith.constant dense<0.000000e+00> : vector<2x8xf32>
    %70 = vector.multi_reduction <add>, %69, %cst_31 [2] : vector<2x8x8xf32> to vector<2x8xf32>
    %71 = vector.shape_cast %70 : vector<2x8xf32> to vector<2x8x1xf32>
    %72 = tpu.reciprocal %71 {approx = true} : vector<2x8x1xf32> -> vector<2x8x1xf32>
    %73 = vector.broadcast %72 : vector<2x8x1xf32> to vector<2x8x8xf32>
    %74 = arith.mulf %69, %73 : vector<2x8x8xf32>
    %75 = arith.truncf %74 : vector<2x8x8xf32> to vector<2x8x8xbf16>
    "tpu.trace_start"() <{level = 10 : i32, message = "bqk,bkd->bqd"}> : () -> ()
    %cst_32 = arith.constant dense<0.000000e+00> : vector<2x8x16xf32>
    %76 = tpu.matmul %75, %61, %cst_32 {dimension_numbers = #tpu.dot_dimension_numbers<[2], [1], [1], [2], [0, 0, 0, 1, 1, 2], [0], [0]>} : vector<2x8x8xbf16>, vector<2x8x16xbf16>, vector<2x8x16xf32> -> vector<2x8x16xf32>
    "tpu.trace_stop"() : () -> ()
    %77 = vector.shape_cast %76 : vector<2x8x16xf32> to vector<16x16xf32>
    %78 = vector.extract_strided_slice %52 {offsets = [0, 16], sizes = [16, 16], strides = [1, 1]} : vector<16x192xf32> to vector<16x16xf32>
    %79 = vector.shape_cast %78 : vector<16x16xf32> to vector<2x8x16xf32>
    %80 = arith.truncf %79 : vector<2x8x16xf32> to vector<2x8x16xbf16>
    %81 = vector.extract_strided_slice %52 {offsets = [0, 80], sizes = [16, 16], strides = [1, 1]} : vector<16x192xf32> to vector<16x16xf32>
    %82 = vector.shape_cast %81 : vector<16x16xf32> to vector<2x8x16xf32>
    %83 = arith.truncf %82 : vector<2x8x16xf32> to vector<2x8x16xbf16>
    %84 = vector.extract_strided_slice %52 {offsets = [0, 144], sizes = [16, 16], strides = [1, 1]} : vector<16x192xf32> to vector<16x16xf32>
    %85 = vector.shape_cast %84 : vector<16x16xf32> to vector<2x8x16xf32>
    %86 = arith.truncf %85 : vector<2x8x16xf32> to vector<2x8x16xbf16>
    "tpu.trace_start"() <{level = 10 : i32, message = "bqd,bkd->bqk"}> : () -> ()
    %cst_33 = arith.constant dense<0.000000e+00> : vector<2x8x8xf32>
    %87 = tpu.matmul %80, %83, %cst_33 {dimension_numbers = #tpu.dot_dimension_numbers<[2], [2], [1], [1], [0, 0, 0, 1, 1, 1], [0], [0]>} : vector<2x8x16xbf16>, vector<2x8x16xbf16>, vector<2x8x8xf32> -> vector<2x8x8xf32>
    "tpu.trace_stop"() : () -> ()
    %cst_34 = arith.constant 2.500000e-01 : f32
    %88 = vector.broadcast %cst_34 : f32 to vector<2x8x8xf32>
    %89 = arith.mulf %87, %88 : vector<2x8x8xf32>
    %cst_35 = arith.constant dense<0xFF800000> : vector<2x8xf32>
    %90 = vector.multi_reduction <maximumf>, %89, %cst_35 [2] : vector<2x8x8xf32> to vector<2x8xf32>
    %91 = vector.shape_cast %90 : vector<2x8xf32> to vector<2x8x1xf32>
    %92 = vector.broadcast %91 : vector<2x8x1xf32> to vector<2x8x8xf32>
    %93 = arith.subf %89, %92 : vector<2x8x8xf32>
    %94 = math.exp %93 : vector<2x8x8xf32>
    %cst_36 = arith.constant dense<0.000000e+00> : vector<2x8xf32>
    %95 = vector.multi_reduction <add>, %94, %cst_36 [2] : vector<2x8x8xf32> to vector<2x8xf32>
    %96 = vector.shape_cast %95 : vector<2x8xf32> to vector<2x8x1xf32>
    %97 = tpu.reciprocal %96 {approx = true} : vector<2x8x1xf32> -> vector<2x8x1xf32>
    %98 = vector.broadcast %97 : vector<2x8x1xf32> to vector<2x8x8xf32>
    %99 = arith.mulf %94, %98 : vector<2x8x8xf32>
    %100 = arith.truncf %99 : vector<2x8x8xf32> to vector<2x8x8xbf16>
    "tpu.trace_start"() <{level = 10 : i32, message = "bqk,bkd->bqd"}> : () -> ()
    %cst_37 = arith.constant dense<0.000000e+00> : vector<2x8x16xf32>
    %101 = tpu.matmul %100, %86, %cst_37 {dimension_numbers = #tpu.dot_dimension_numbers<[2], [1], [1], [2], [0, 0, 0, 1, 1, 2], [0], [0]>} : vector<2x8x8xbf16>, vector<2x8x16xbf16>, vector<2x8x16xf32> -> vector<2x8x16xf32>
    "tpu.trace_stop"() : () -> ()
    %102 = vector.shape_cast %101 : vector<2x8x16xf32> to vector<16x16xf32>
    %103 = vector.extract_strided_slice %52 {offsets = [0, 32], sizes = [16, 16], strides = [1, 1]} : vector<16x192xf32> to vector<16x16xf32>
    %104 = vector.shape_cast %103 : vector<16x16xf32> to vector<2x8x16xf32>
    %105 = arith.truncf %104 : vector<2x8x16xf32> to vector<2x8x16xbf16>
    %106 = vector.extract_strided_slice %52 {offsets = [0, 96], sizes = [16, 16], strides = [1, 1]} : vector<16x192xf32> to vector<16x16xf32>
    %107 = vector.shape_cast %106 : vector<16x16xf32> to vector<2x8x16xf32>
    %108 = arith.truncf %107 : vector<2x8x16xf32> to vector<2x8x16xbf16>
    %109 = vector.extract_strided_slice %52 {offsets = [0, 160], sizes = [16, 16], strides = [1, 1]} : vector<16x192xf32> to vector<16x16xf32>
    %110 = vector.shape_cast %109 : vector<16x16xf32> to vector<2x8x16xf32>
    %111 = arith.truncf %110 : vector<2x8x16xf32> to vector<2x8x16xbf16>
    "tpu.trace_start"() <{level = 10 : i32, message = "bqd,bkd->bqk"}> : () -> ()
    %cst_38 = arith.constant dense<0.000000e+00> : vector<2x8x8xf32>
    %112 = tpu.matmul %105, %108, %cst_38 {dimension_numbers = #tpu.dot_dimension_numbers<[2], [2], [1], [1], [0, 0, 0, 1, 1, 1], [0], [0]>} : vector<2x8x16xbf16>, vector<2x8x16xbf16>, vector<2x8x8xf32> -> vector<2x8x8xf32>
    "tpu.trace_stop"() : () -> ()
    %cst_39 = arith.constant 2.500000e-01 : f32
    %113 = vector.broadcast %cst_39 : f32 to vector<2x8x8xf32>
    %114 = arith.mulf %112, %113 : vector<2x8x8xf32>
    %cst_40 = arith.constant dense<0xFF800000> : vector<2x8xf32>
    %115 = vector.multi_reduction <maximumf>, %114, %cst_40 [2] : vector<2x8x8xf32> to vector<2x8xf32>
    %116 = vector.shape_cast %115 : vector<2x8xf32> to vector<2x8x1xf32>
    %117 = vector.broadcast %116 : vector<2x8x1xf32> to vector<2x8x8xf32>
    %118 = arith.subf %114, %117 : vector<2x8x8xf32>
    %119 = math.exp %118 : vector<2x8x8xf32>
    %cst_41 = arith.constant dense<0.000000e+00> : vector<2x8xf32>
    %120 = vector.multi_reduction <add>, %119, %cst_41 [2] : vector<2x8x8xf32> to vector<2x8xf32>
    %121 = vector.shape_cast %120 : vector<2x8xf32> to vector<2x8x1xf32>
    %122 = tpu.reciprocal %121 {approx = true} : vector<2x8x1xf32> -> vector<2x8x1xf32>
    %123 = vector.broadcast %122 : vector<2x8x1xf32> to vector<2x8x8xf32>
    %124 = arith.mulf %119, %123 : vector<2x8x8xf32>
    %125 = arith.truncf %124 : vector<2x8x8xf32> to vector<2x8x8xbf16>
    "tpu.trace_start"() <{level = 10 : i32, message = "bqk,bkd->bqd"}> : () -> ()
    %cst_42 = arith.constant dense<0.000000e+00> : vector<2x8x16xf32>
    %126 = tpu.matmul %125, %111, %cst_42 {dimension_numbers = #tpu.dot_dimension_numbers<[2], [1], [1], [2], [0, 0, 0, 1, 1, 2], [0], [0]>} : vector<2x8x8xbf16>, vector<2x8x16xbf16>, vector<2x8x16xf32> -> vector<2x8x16xf32>
    "tpu.trace_stop"() : () -> ()
    %127 = vector.shape_cast %126 : vector<2x8x16xf32> to vector<16x16xf32>
    %128 = vector.extract_strided_slice %52 {offsets = [0, 48], sizes = [16, 16], strides = [1, 1]} : vector<16x192xf32> to vector<16x16xf32>
    %129 = vector.shape_cast %128 : vector<16x16xf32> to vector<2x8x16xf32>
    %130 = arith.truncf %129 : vector<2x8x16xf32> to vector<2x8x16xbf16>
    %131 = vector.extract_strided_slice %52 {offsets = [0, 112], sizes = [16, 16], strides = [1, 1]} : vector<16x192xf32> to vector<16x16xf32>
    %132 = vector.shape_cast %131 : vector<16x16xf32> to vector<2x8x16xf32>
    %133 = arith.truncf %132 : vector<2x8x16xf32> to vector<2x8x16xbf16>
    %134 = vector.extract_strided_slice %52 {offsets = [0, 176], sizes = [16, 16], strides = [1, 1]} : vector<16x192xf32> to vector<16x16xf32>
    %135 = vector.shape_cast %134 : vector<16x16xf32> to vector<2x8x16xf32>
    %136 = arith.truncf %135 : vector<2x8x16xf32> to vector<2x8x16xbf16>
    "tpu.trace_start"() <{level = 10 : i32, message = "bqd,bkd->bqk"}> : () -> ()
    %cst_43 = arith.constant dense<0.000000e+00> : vector<2x8x8xf32>
    %137 = tpu.matmul %130, %133, %cst_43 {dimension_numbers = #tpu.dot_dimension_numbers<[2], [2], [1], [1], [0, 0, 0, 1, 1, 1], [0], [0]>} : vector<2x8x16xbf16>, vector<2x8x16xbf16>, vector<2x8x8xf32> -> vector<2x8x8xf32>
    "tpu.trace_stop"() : () -> ()
    %cst_44 = arith.constant 2.500000e-01 : f32
    %138 = vector.broadcast %cst_44 : f32 to vector<2x8x8xf32>
    %139 = arith.mulf %137, %138 : vector<2x8x8xf32>
    %cst_45 = arith.constant dense<0xFF800000> : vector<2x8xf32>
    %140 = vector.multi_reduction <maximumf>, %139, %cst_45 [2] : vector<2x8x8xf32> to vector<2x8xf32>
    %141 = vector.shape_cast %140 : vector<2x8xf32> to vector<2x8x1xf32>
    %142 = vector.broadcast %141 : vector<2x8x1xf32> to vector<2x8x8xf32>
    %143 = arith.subf %139, %142 : vector<2x8x8xf32>
    %144 = math.exp %143 : vector<2x8x8xf32>
    %cst_46 = arith.constant dense<0.000000e+00> : vector<2x8xf32>
    %145 = vector.multi_reduction <add>, %144, %cst_46 [2] : vector<2x8x8xf32> to vector<2x8xf32>
    %146 = vector.shape_cast %145 : vector<2x8xf32> to vector<2x8x1xf32>
    %147 = tpu.reciprocal %146 {approx = true} : vector<2x8x1xf32> -> vector<2x8x1xf32>
    %148 = vector.broadcast %147 : vector<2x8x1xf32> to vector<2x8x8xf32>
    %149 = arith.mulf %144, %148 : vector<2x8x8xf32>
    %150 = arith.truncf %149 : vector<2x8x8xf32> to vector<2x8x8xbf16>
    "tpu.trace_start"() <{level = 10 : i32, message = "bqk,bkd->bqd"}> : () -> ()
    %cst_47 = arith.constant dense<0.000000e+00> : vector<2x8x16xf32>
    %151 = tpu.matmul %150, %136, %cst_47 {dimension_numbers = #tpu.dot_dimension_numbers<[2], [1], [1], [2], [0, 0, 0, 1, 1, 2], [0], [0]>} : vector<2x8x8xbf16>, vector<2x8x16xbf16>, vector<2x8x16xf32> -> vector<2x8x16xf32>
    "tpu.trace_stop"() : () -> ()
    %152 = vector.shape_cast %151 : vector<2x8x16xf32> to vector<16x16xf32>
    %153 = tpu.concatenate %77, %102, %127, %152 in 1 : vector<16x16xf32>, vector<16x16xf32>, vector<16x16xf32>, vector<16x16xf32> -> vector<16x64xf32>
    %c0_48 = arith.constant 0 : index
    %c0_49 = arith.constant 0 : index
    %c0_50 = arith.constant 0 : index
    %154 = vector.load %arg12[%c0_48, %c0_49, %c0_50] : memref<2x64x64xbf16, #tpu.memory_space<vmem>>, vector<1x64x64xbf16>
    %155 = vector.shape_cast %154 : vector<1x64x64xbf16> to vector<64x64xbf16>
    %156 = arith.truncf %153 : vector<16x64xf32> to vector<16x64xbf16>
    %cst_51 = arith.constant dense<0.000000e+00> : vector<16x64xf32>
    %157 = tpu.matmul %156, %155, %cst_51 {dimension_numbers = #tpu.dot_dimension_numbers<[1], [0], [0], [1], [0, 0, 1, 1], [], []>} : vector<16x64xbf16>, vector<64x64xbf16>, vector<16x64xf32> -> vector<16x64xf32>
    %c0_52 = arith.constant 0 : index
    %c0_53 = arith.constant 0 : index
    %c0_54 = arith.constant 0 : index
    %158 = vector.load %arg13[%c0_52, %c0_53, %c0_54] : memref<2x1x64xf32, #tpu.memory_space<vmem>>, vector<1x1x64xf32>
    %159 = vector.shape_cast %158 : vector<1x1x64xf32> to vector<1x64xf32>
    %160 = vector.broadcast %159 : vector<1x64xf32> to vector<16x64xf32>
    %161 = arith.addf %157, %160 : vector<16x64xf32>
    %162 = arith.addf %44, %161 : vector<16x64xf32>
    %c0_55 = arith.constant 0 : index
    %c0_56 = arith.constant 0 : index
    %c0_57 = arith.constant 0 : index
    %163 = vector.load %arg14[%c0_55, %c0_56, %c0_57] : memref<2x1x64xf32, #tpu.memory_space<vmem>>, vector<1x1x64xf32>
    %164 = vector.shape_cast %163 : vector<1x1x64xf32> to vector<1x64xf32>
    %c0_58 = arith.constant 0 : index
    %c0_59 = arith.constant 0 : index
    %c0_60 = arith.constant 0 : index
    %165 = vector.load %arg15[%c0_58, %c0_59, %c0_60] : memref<2x1x64xf32, #tpu.memory_space<vmem>>, vector<1x1x64xf32>
    %166 = vector.shape_cast %165 : vector<1x1x64xf32> to vector<1x64xf32>
    %cst_61 = arith.constant dense<0.000000e+00> : vector<16xf32>
    %167 = vector.multi_reduction <add>, %162, %cst_61 [1] : vector<16x64xf32> to vector<16xf32>
    %168 = vector.shape_cast %167 : vector<16xf32> to vector<16x1xf32>
    %cst_62 = arith.constant 6.400000e+01 : f32
    %169 = vector.broadcast %cst_62 : f32 to vector<16x1xf32>
    %170 = arith.divf %168, %169 : vector<16x1xf32>
    %171 = vector.broadcast %170 : vector<16x1xf32> to vector<16x64xf32>
    %172 = arith.subf %162, %171 : vector<16x64xf32>
    %173 = arith.mulf %172, %172 : vector<16x64xf32>
    %cst_63 = arith.constant dense<0.000000e+00> : vector<16xf32>
    %174 = vector.multi_reduction <add>, %173, %cst_63 [1] : vector<16x64xf32> to vector<16xf32>
    %175 = vector.shape_cast %174 : vector<16xf32> to vector<16x1xf32>
    %cst_64 = arith.constant 6.400000e+01 : f32
    %176 = vector.broadcast %cst_64 : f32 to vector<16x1xf32>
    %177 = arith.divf %175, %176 : vector<16x1xf32>
    %178 = vector.broadcast %170 : vector<16x1xf32> to vector<16x64xf32>
    %179 = arith.subf %162, %178 : vector<16x64xf32>
    %cst_65 = arith.constant 9.99999974E-6 : f32
    %180 = vector.broadcast %cst_65 : f32 to vector<16x1xf32>
    %181 = arith.addf %177, %180 : vector<16x1xf32>
    %182 = math.rsqrt %181 : vector<16x1xf32>
    %183 = vector.broadcast %182 : vector<16x1xf32> to vector<16x64xf32>
    %184 = arith.mulf %179, %183 : vector<16x64xf32>
    %185 = vector.broadcast %164 : vector<1x64xf32> to vector<16x64xf32>
    %186 = arith.mulf %184, %185 : vector<16x64xf32>
    %187 = vector.broadcast %166 : vector<1x64xf32> to vector<16x64xf32>
    %188 = arith.addf %186, %187 : vector<16x64xf32>
    %c0_66 = arith.constant 0 : index
    %c0_67 = arith.constant 0 : index
    %c0_68 = arith.constant 0 : index
    %189 = vector.load %arg18[%c0_66, %c0_67, %c0_68] : memref<2x64x128xbf16, #tpu.memory_space<vmem>>, vector<1x64x128xbf16>
    %190 = vector.shape_cast %189 : vector<1x64x128xbf16> to vector<64x128xbf16>
    %191 = arith.truncf %188 : vector<16x64xf32> to vector<16x64xbf16>
    %cst_69 = arith.constant dense<0.000000e+00> : vector<16x128xf32>
    %192 = tpu.matmul %191, %190, %cst_69 {dimension_numbers = #tpu.dot_dimension_numbers<[1], [0], [0], [1], [0, 0, 1, 1], [], []>} : vector<16x64xbf16>, vector<64x128xbf16>, vector<16x128xf32> -> vector<16x128xf32>
    %c0_70 = arith.constant 0 : index
    %c0_71 = arith.constant 0 : index
    %c0_72 = arith.constant 0 : index
    %193 = vector.load %arg19[%c0_70, %c0_71, %c0_72] : memref<2x1x128xf32, #tpu.memory_space<vmem>>, vector<1x1x128xf32>
    %194 = vector.shape_cast %193 : vector<1x1x128xf32> to vector<1x128xf32>
    %195 = vector.broadcast %194 : vector<1x128xf32> to vector<16x128xf32>
    %196 = arith.addf %192, %195 : vector<16x128xf32>
    %cst_73 = arith.constant 0.000000e+00 : f32
    %197 = vector.broadcast %cst_73 : f32 to vector<16x128xf32>
    %198 = arith.maximumf %196, %197 : vector<16x128xf32>
    %c0_74 = arith.constant 0 : index
    %c0_75 = arith.constant 0 : index
    %c0_76 = arith.constant 0 : index
    %199 = vector.load %arg20[%c0_74, %c0_75, %c0_76] : memref<2x128x64xbf16, #tpu.memory_space<vmem>>, vector<1x128x64xbf16>
    %200 = vector.shape_cast %199 : vector<1x128x64xbf16> to vector<128x64xbf16>
    %201 = arith.truncf %198 : vector<16x128xf32> to vector<16x128xbf16>
    %cst_77 = arith.constant dense<0.000000e+00> : vector<16x64xf32>
    %202 = tpu.matmul %201, %200, %cst_77 {dimension_numbers = #tpu.dot_dimension_numbers<[1], [0], [0], [1], [0, 0, 1, 1], [], []>} : vector<16x128xbf16>, vector<128x64xbf16>, vector<16x64xf32> -> vector<16x64xf32>
    %c0_78 = arith.constant 0 : index
    %c0_79 = arith.constant 0 : index
    %c0_80 = arith.constant 0 : index
    %203 = vector.load %arg21[%c0_78, %c0_79, %c0_80] : memref<2x1x64xf32, #tpu.memory_space<vmem>>, vector<1x1x64xf32>
    %204 = vector.shape_cast %203 : vector<1x1x64xf32> to vector<1x64xf32>
    %205 = vector.broadcast %204 : vector<1x64xf32> to vector<16x64xf32>
    %206 = arith.addf %202, %205 : vector<16x64xf32>
    %207 = arith.addf %188, %206 : vector<16x64xf32>
    %c0_81 = arith.constant 0 : index
    %c0_82 = arith.constant 0 : index
    %c0_83 = arith.constant 0 : index
    %208 = vector.load %arg16[%c0_81, %c0_82, %c0_83] : memref<2x1x64xf32, #tpu.memory_space<vmem>>, vector<1x1x64xf32>
    %209 = vector.shape_cast %208 : vector<1x1x64xf32> to vector<1x64xf32>
    %c0_84 = arith.constant 0 : index
    %c0_85 = arith.constant 0 : index
    %c0_86 = arith.constant 0 : index
    %210 = vector.load %arg17[%c0_84, %c0_85, %c0_86] : memref<2x1x64xf32, #tpu.memory_space<vmem>>, vector<1x1x64xf32>
    %211 = vector.shape_cast %210 : vector<1x1x64xf32> to vector<1x64xf32>
    %cst_87 = arith.constant dense<0.000000e+00> : vector<16xf32>
    %212 = vector.multi_reduction <add>, %207, %cst_87 [1] : vector<16x64xf32> to vector<16xf32>
    %213 = vector.shape_cast %212 : vector<16xf32> to vector<16x1xf32>
    %cst_88 = arith.constant 6.400000e+01 : f32
    %214 = vector.broadcast %cst_88 : f32 to vector<16x1xf32>
    %215 = arith.divf %213, %214 : vector<16x1xf32>
    %216 = vector.broadcast %215 : vector<16x1xf32> to vector<16x64xf32>
    %217 = arith.subf %207, %216 : vector<16x64xf32>
    %218 = arith.mulf %217, %217 : vector<16x64xf32>
    %cst_89 = arith.constant dense<0.000000e+00> : vector<16xf32>
    %219 = vector.multi_reduction <add>, %218, %cst_89 [1] : vector<16x64xf32> to vector<16xf32>
    %220 = vector.shape_cast %219 : vector<16xf32> to vector<16x1xf32>
    %cst_90 = arith.constant 6.400000e+01 : f32
    %221 = vector.broadcast %cst_90 : f32 to vector<16x1xf32>
    %222 = arith.divf %220, %221 : vector<16x1xf32>
    %223 = vector.broadcast %215 : vector<16x1xf32> to vector<16x64xf32>
    %224 = arith.subf %207, %223 : vector<16x64xf32>
    %cst_91 = arith.constant 9.99999974E-6 : f32
    %225 = vector.broadcast %cst_91 : f32 to vector<16x1xf32>
    %226 = arith.addf %222, %225 : vector<16x1xf32>
    %227 = math.rsqrt %226 : vector<16x1xf32>
    %228 = vector.broadcast %227 : vector<16x1xf32> to vector<16x64xf32>
    %229 = arith.mulf %224, %228 : vector<16x64xf32>
    %230 = vector.broadcast %209 : vector<1x64xf32> to vector<16x64xf32>
    %231 = arith.mulf %229, %230 : vector<16x64xf32>
    %232 = vector.broadcast %211 : vector<1x64xf32> to vector<16x64xf32>
    %233 = arith.addf %231, %232 : vector<16x64xf32>
    %c1 = arith.constant 1 : index
    %c0_92 = arith.constant 0 : index
    %c0_93 = arith.constant 0 : index
    %234 = vector.load %arg10[%c1, %c0_92, %c0_93] : memref<2x64x192xbf16, #tpu.memory_space<vmem>>, vector<1x64x192xbf16>
    %235 = vector.shape_cast %234 : vector<1x64x192xbf16> to vector<64x192xbf16>
    %236 = arith.truncf %233 : vector<16x64xf32> to vector<16x64xbf16>
    %cst_94 = arith.constant dense<0.000000e+00> : vector<16x192xf32>
    %237 = tpu.matmul %236, %235, %cst_94 {dimension_numbers = #tpu.dot_dimension_numbers<[1], [0], [0], [1], [0, 0, 1, 1], [], []>} : vector<16x64xbf16>, vector<64x192xbf16>, vector<16x192xf32> -> vector<16x192xf32>
    %c1_95 = arith.constant 1 : index
    %c0_96 = arith.constant 0 : index
    %c0_97 = arith.constant 0 : index
    %238 = vector.load %arg11[%c1_95, %c0_96, %c0_97] : memref<2x1x192xf32, #tpu.memory_space<vmem>>, vector<1x1x192xf32>
    %239 = vector.shape_cast %238 : vector<1x1x192xf32> to vector<1x192xf32>
    %240 = vector.broadcast %239 : vector<1x192xf32> to vector<16x192xf32>
    %241 = arith.addf %237, %240 : vector<16x192xf32>
    %242 = vector.extract_strided_slice %241 {offsets = [0, 0], sizes = [16, 16], strides = [1, 1]} : vector<16x192xf32> to vector<16x16xf32>
    %243 = vector.shape_cast %242 : vector<16x16xf32> to vector<2x8x16xf32>
    %244 = arith.truncf %243 : vector<2x8x16xf32> to vector<2x8x16xbf16>
    %245 = vector.extract_strided_slice %241 {offsets = [0, 64], sizes = [16, 16], strides = [1, 1]} : vector<16x192xf32> to vector<16x16xf32>
    %246 = vector.shape_cast %245 : vector<16x16xf32> to vector<2x8x16xf32>
    %247 = arith.truncf %246 : vector<2x8x16xf32> to vector<2x8x16xbf16>
    %248 = vector.extract_strided_slice %241 {offsets = [0, 128], sizes = [16, 16], strides = [1, 1]} : vector<16x192xf32> to vector<16x16xf32>
    %249 = vector.shape_cast %248 : vector<16x16xf32> to vector<2x8x16xf32>
    %250 = arith.truncf %249 : vector<2x8x16xf32> to vector<2x8x16xbf16>
    "tpu.trace_start"() <{level = 10 : i32, message = "bqd,bkd->bqk"}> : () -> ()
    %cst_98 = arith.constant dense<0.000000e+00> : vector<2x8x8xf32>
    %251 = tpu.matmul %244, %247, %cst_98 {dimension_numbers = #tpu.dot_dimension_numbers<[2], [2], [1], [1], [0, 0, 0, 1, 1, 1], [0], [0]>} : vector<2x8x16xbf16>, vector<2x8x16xbf16>, vector<2x8x8xf32> -> vector<2x8x8xf32>
    "tpu.trace_stop"() : () -> ()
    %cst_99 = arith.constant 2.500000e-01 : f32
    %252 = vector.broadcast %cst_99 : f32 to vector<2x8x8xf32>
    %253 = arith.mulf %251, %252 : vector<2x8x8xf32>
    %cst_100 = arith.constant dense<0xFF800000> : vector<2x8xf32>
    %254 = vector.multi_reduction <maximumf>, %253, %cst_100 [2] : vector<2x8x8xf32> to vector<2x8xf32>
    %255 = vector.shape_cast %254 : vector<2x8xf32> to vector<2x8x1xf32>
    %256 = vector.broadcast %255 : vector<2x8x1xf32> to vector<2x8x8xf32>
    %257 = arith.subf %253, %256 : vector<2x8x8xf32>
    %258 = math.exp %257 : vector<2x8x8xf32>
    %cst_101 = arith.constant dense<0.000000e+00> : vector<2x8xf32>
    %259 = vector.multi_reduction <add>, %258, %cst_101 [2] : vector<2x8x8xf32> to vector<2x8xf32>
    %260 = vector.shape_cast %259 : vector<2x8xf32> to vector<2x8x1xf32>
    %261 = tpu.reciprocal %260 {approx = true} : vector<2x8x1xf32> -> vector<2x8x1xf32>
    %262 = vector.broadcast %261 : vector<2x8x1xf32> to vector<2x8x8xf32>
    %263 = arith.mulf %258, %262 : vector<2x8x8xf32>
    %264 = arith.truncf %263 : vector<2x8x8xf32> to vector<2x8x8xbf16>
    "tpu.trace_start"() <{level = 10 : i32, message = "bqk,bkd->bqd"}> : () -> ()
    %cst_102 = arith.constant dense<0.000000e+00> : vector<2x8x16xf32>
    %265 = tpu.matmul %264, %250, %cst_102 {dimension_numbers = #tpu.dot_dimension_numbers<[2], [1], [1], [2], [0, 0, 0, 1, 1, 2], [0], [0]>} : vector<2x8x8xbf16>, vector<2x8x16xbf16>, vector<2x8x16xf32> -> vector<2x8x16xf32>
    "tpu.trace_stop"() : () -> ()
    %266 = vector.shape_cast %265 : vector<2x8x16xf32> to vector<16x16xf32>
    %267 = vector.extract_strided_slice %241 {offsets = [0, 16], sizes = [16, 16], strides = [1, 1]} : vector<16x192xf32> to vector<16x16xf32>
    %268 = vector.shape_cast %267 : vector<16x16xf32> to vector<2x8x16xf32>
    %269 = arith.truncf %268 : vector<2x8x16xf32> to vector<2x8x16xbf16>
    %270 = vector.extract_strided_slice %241 {offsets = [0, 80], sizes = [16, 16], strides = [1, 1]} : vector<16x192xf32> to vector<16x16xf32>
    %271 = vector.shape_cast %270 : vector<16x16xf32> to vector<2x8x16xf32>
    %272 = arith.truncf %271 : vector<2x8x16xf32> to vector<2x8x16xbf16>
    %273 = vector.extract_strided_slice %241 {offsets = [0, 144], sizes = [16, 16], strides = [1, 1]} : vector<16x192xf32> to vector<16x16xf32>
    %274 = vector.shape_cast %273 : vector<16x16xf32> to vector<2x8x16xf32>
    %275 = arith.truncf %274 : vector<2x8x16xf32> to vector<2x8x16xbf16>
    "tpu.trace_start"() <{level = 10 : i32, message = "bqd,bkd->bqk"}> : () -> ()
    %cst_103 = arith.constant dense<0.000000e+00> : vector<2x8x8xf32>
    %276 = tpu.matmul %269, %272, %cst_103 {dimension_numbers = #tpu.dot_dimension_numbers<[2], [2], [1], [1], [0, 0, 0, 1, 1, 1], [0], [0]>} : vector<2x8x16xbf16>, vector<2x8x16xbf16>, vector<2x8x8xf32> -> vector<2x8x8xf32>
    "tpu.trace_stop"() : () -> ()
    %cst_104 = arith.constant 2.500000e-01 : f32
    %277 = vector.broadcast %cst_104 : f32 to vector<2x8x8xf32>
    %278 = arith.mulf %276, %277 : vector<2x8x8xf32>
    %cst_105 = arith.constant dense<0xFF800000> : vector<2x8xf32>
    %279 = vector.multi_reduction <maximumf>, %278, %cst_105 [2] : vector<2x8x8xf32> to vector<2x8xf32>
    %280 = vector.shape_cast %279 : vector<2x8xf32> to vector<2x8x1xf32>
    %281 = vector.broadcast %280 : vector<2x8x1xf32> to vector<2x8x8xf32>
    %282 = arith.subf %278, %281 : vector<2x8x8xf32>
    %283 = math.exp %282 : vector<2x8x8xf32>
    %cst_106 = arith.constant dense<0.000000e+00> : vector<2x8xf32>
    %284 = vector.multi_reduction <add>, %283, %cst_106 [2] : vector<2x8x8xf32> to vector<2x8xf32>
    %285 = vector.shape_cast %284 : vector<2x8xf32> to vector<2x8x1xf32>
    %286 = tpu.reciprocal %285 {approx = true} : vector<2x8x1xf32> -> vector<2x8x1xf32>
    %287 = vector.broadcast %286 : vector<2x8x1xf32> to vector<2x8x8xf32>
    %288 = arith.mulf %283, %287 : vector<2x8x8xf32>
    %289 = arith.truncf %288 : vector<2x8x8xf32> to vector<2x8x8xbf16>
    "tpu.trace_start"() <{level = 10 : i32, message = "bqk,bkd->bqd"}> : () -> ()
    %cst_107 = arith.constant dense<0.000000e+00> : vector<2x8x16xf32>
    %290 = tpu.matmul %289, %275, %cst_107 {dimension_numbers = #tpu.dot_dimension_numbers<[2], [1], [1], [2], [0, 0, 0, 1, 1, 2], [0], [0]>} : vector<2x8x8xbf16>, vector<2x8x16xbf16>, vector<2x8x16xf32> -> vector<2x8x16xf32>
    "tpu.trace_stop"() : () -> ()
    %291 = vector.shape_cast %290 : vector<2x8x16xf32> to vector<16x16xf32>
    %292 = vector.extract_strided_slice %241 {offsets = [0, 32], sizes = [16, 16], strides = [1, 1]} : vector<16x192xf32> to vector<16x16xf32>
    %293 = vector.shape_cast %292 : vector<16x16xf32> to vector<2x8x16xf32>
    %294 = arith.truncf %293 : vector<2x8x16xf32> to vector<2x8x16xbf16>
    %295 = vector.extract_strided_slice %241 {offsets = [0, 96], sizes = [16, 16], strides = [1, 1]} : vector<16x192xf32> to vector<16x16xf32>
    %296 = vector.shape_cast %295 : vector<16x16xf32> to vector<2x8x16xf32>
    %297 = arith.truncf %296 : vector<2x8x16xf32> to vector<2x8x16xbf16>
    %298 = vector.extract_strided_slice %241 {offsets = [0, 160], sizes = [16, 16], strides = [1, 1]} : vector<16x192xf32> to vector<16x16xf32>
    %299 = vector.shape_cast %298 : vector<16x16xf32> to vector<2x8x16xf32>
    %300 = arith.truncf %299 : vector<2x8x16xf32> to vector<2x8x16xbf16>
    "tpu.trace_start"() <{level = 10 : i32, message = "bqd,bkd->bqk"}> : () -> ()
    %cst_108 = arith.constant dense<0.000000e+00> : vector<2x8x8xf32>
    %301 = tpu.matmul %294, %297, %cst_108 {dimension_numbers = #tpu.dot_dimension_numbers<[2], [2], [1], [1], [0, 0, 0, 1, 1, 1], [0], [0]>} : vector<2x8x16xbf16>, vector<2x8x16xbf16>, vector<2x8x8xf32> -> vector<2x8x8xf32>
    "tpu.trace_stop"() : () -> ()
    %cst_109 = arith.constant 2.500000e-01 : f32
    %302 = vector.broadcast %cst_109 : f32 to vector<2x8x8xf32>
    %303 = arith.mulf %301, %302 : vector<2x8x8xf32>
    %cst_110 = arith.constant dense<0xFF800000> : vector<2x8xf32>
    %304 = vector.multi_reduction <maximumf>, %303, %cst_110 [2] : vector<2x8x8xf32> to vector<2x8xf32>
    %305 = vector.shape_cast %304 : vector<2x8xf32> to vector<2x8x1xf32>
    %306 = vector.broadcast %305 : vector<2x8x1xf32> to vector<2x8x8xf32>
    %307 = arith.subf %303, %306 : vector<2x8x8xf32>
    %308 = math.exp %307 : vector<2x8x8xf32>
    %cst_111 = arith.constant dense<0.000000e+00> : vector<2x8xf32>
    %309 = vector.multi_reduction <add>, %308, %cst_111 [2] : vector<2x8x8xf32> to vector<2x8xf32>
    %310 = vector.shape_cast %309 : vector<2x8xf32> to vector<2x8x1xf32>
    %311 = tpu.reciprocal %310 {approx = true} : vector<2x8x1xf32> -> vector<2x8x1xf32>
    %312 = vector.broadcast %311 : vector<2x8x1xf32> to vector<2x8x8xf32>
    %313 = arith.mulf %308, %312 : vector<2x8x8xf32>
    %314 = arith.truncf %313 : vector<2x8x8xf32> to vector<2x8x8xbf16>
    "tpu.trace_start"() <{level = 10 : i32, message = "bqk,bkd->bqd"}> : () -> ()
    %cst_112 = arith.constant dense<0.000000e+00> : vector<2x8x16xf32>
    %315 = tpu.matmul %314, %300, %cst_112 {dimension_numbers = #tpu.dot_dimension_numbers<[2], [1], [1], [2], [0, 0, 0, 1, 1, 2], [0], [0]>} : vector<2x8x8xbf16>, vector<2x8x16xbf16>, vector<2x8x16xf32> -> vector<2x8x16xf32>
    "tpu.trace_stop"() : () -> ()
    %316 = vector.shape_cast %315 : vector<2x8x16xf32> to vector<16x16xf32>
    %317 = vector.extract_strided_slice %241 {offsets = [0, 48], sizes = [16, 16], strides = [1, 1]} : vector<16x192xf32> to vector<16x16xf32>
    %318 = vector.shape_cast %317 : vector<16x16xf32> to vector<2x8x16xf32>
    %319 = arith.truncf %318 : vector<2x8x16xf32> to vector<2x8x16xbf16>
    %320 = vector.extract_strided_slice %241 {offsets = [0, 112], sizes = [16, 16], strides = [1, 1]} : vector<16x192xf32> to vector<16x16xf32>
    %321 = vector.shape_cast %320 : vector<16x16xf32> to vector<2x8x16xf32>
    %322 = arith.truncf %321 : vector<2x8x16xf32> to vector<2x8x16xbf16>
    %323 = vector.extract_strided_slice %241 {offsets = [0, 176], sizes = [16, 16], strides = [1, 1]} : vector<16x192xf32> to vector<16x16xf32>
    %324 = vector.shape_cast %323 : vector<16x16xf32> to vector<2x8x16xf32>
    %325 = arith.truncf %324 : vector<2x8x16xf32> to vector<2x8x16xbf16>
    "tpu.trace_start"() <{level = 10 : i32, message = "bqd,bkd->bqk"}> : () -> ()
    %cst_113 = arith.constant dense<0.000000e+00> : vector<2x8x8xf32>
    %326 = tpu.matmul %319, %322, %cst_113 {dimension_numbers = #tpu.dot_dimension_numbers<[2], [2], [1], [1], [0, 0, 0, 1, 1, 1], [0], [0]>} : vector<2x8x16xbf16>, vector<2x8x16xbf16>, vector<2x8x8xf32> -> vector<2x8x8xf32>
    "tpu.trace_stop"() : () -> ()
    %cst_114 = arith.constant 2.500000e-01 : f32
    %327 = vector.broadcast %cst_114 : f32 to vector<2x8x8xf32>
    %328 = arith.mulf %326, %327 : vector<2x8x8xf32>
    %cst_115 = arith.constant dense<0xFF800000> : vector<2x8xf32>
    %329 = vector.multi_reduction <maximumf>, %328, %cst_115 [2] : vector<2x8x8xf32> to vector<2x8xf32>
    %330 = vector.shape_cast %329 : vector<2x8xf32> to vector<2x8x1xf32>
    %331 = vector.broadcast %330 : vector<2x8x1xf32> to vector<2x8x8xf32>
    %332 = arith.subf %328, %331 : vector<2x8x8xf32>
    %333 = math.exp %332 : vector<2x8x8xf32>
    %cst_116 = arith.constant dense<0.000000e+00> : vector<2x8xf32>
    %334 = vector.multi_reduction <add>, %333, %cst_116 [2] : vector<2x8x8xf32> to vector<2x8xf32>
    %335 = vector.shape_cast %334 : vector<2x8xf32> to vector<2x8x1xf32>
    %336 = tpu.reciprocal %335 {approx = true} : vector<2x8x1xf32> -> vector<2x8x1xf32>
    %337 = vector.broadcast %336 : vector<2x8x1xf32> to vector<2x8x8xf32>
    %338 = arith.mulf %333, %337 : vector<2x8x8xf32>
    %339 = arith.truncf %338 : vector<2x8x8xf32> to vector<2x8x8xbf16>
    "tpu.trace_start"() <{level = 10 : i32, message = "bqk,bkd->bqd"}> : () -> ()
    %cst_117 = arith.constant dense<0.000000e+00> : vector<2x8x16xf32>
    %340 = tpu.matmul %339, %325, %cst_117 {dimension_numbers = #tpu.dot_dimension_numbers<[2], [1], [1], [2], [0, 0, 0, 1, 1, 2], [0], [0]>} : vector<2x8x8xbf16>, vector<2x8x16xbf16>, vector<2x8x16xf32> -> vector<2x8x16xf32>
    "tpu.trace_stop"() : () -> ()
    %341 = vector.shape_cast %340 : vector<2x8x16xf32> to vector<16x16xf32>
    %342 = tpu.concatenate %266, %291, %316, %341 in 1 : vector<16x16xf32>, vector<16x16xf32>, vector<16x16xf32>, vector<16x16xf32> -> vector<16x64xf32>
    %c1_118 = arith.constant 1 : index
    %c0_119 = arith.constant 0 : index
    %c0_120 = arith.constant 0 : index
    %343 = vector.load %arg12[%c1_118, %c0_119, %c0_120] : memref<2x64x64xbf16, #tpu.memory_space<vmem>>, vector<1x64x64xbf16>
    %344 = vector.shape_cast %343 : vector<1x64x64xbf16> to vector<64x64xbf16>
    %345 = arith.truncf %342 : vector<16x64xf32> to vector<16x64xbf16>
    %cst_121 = arith.constant dense<0.000000e+00> : vector<16x64xf32>
    %346 = tpu.matmul %345, %344, %cst_121 {dimension_numbers = #tpu.dot_dimension_numbers<[1], [0], [0], [1], [0, 0, 1, 1], [], []>} : vector<16x64xbf16>, vector<64x64xbf16>, vector<16x64xf32> -> vector<16x64xf32>
    %c1_122 = arith.constant 1 : index
    %c0_123 = arith.constant 0 : index
    %c0_124 = arith.constant 0 : index
    %347 = vector.load %arg13[%c1_122, %c0_123, %c0_124] : memref<2x1x64xf32, #tpu.memory_space<vmem>>, vector<1x1x64xf32>
    %348 = vector.shape_cast %347 : vector<1x1x64xf32> to vector<1x64xf32>
    %349 = vector.broadcast %348 : vector<1x64xf32> to vector<16x64xf32>
    %350 = arith.addf %346, %349 : vector<16x64xf32>
    %351 = arith.addf %233, %350 : vector<16x64xf32>
    %c1_125 = arith.constant 1 : index
    %c0_126 = arith.constant 0 : index
    %c0_127 = arith.constant 0 : index
    %352 = vector.load %arg14[%c1_125, %c0_126, %c0_127] : memref<2x1x64xf32, #tpu.memory_space<vmem>>, vector<1x1x64xf32>
    %353 = vector.shape_cast %352 : vector<1x1x64xf32> to vector<1x64xf32>
    %c1_128 = arith.constant 1 : index
    %c0_129 = arith.constant 0 : index
    %c0_130 = arith.constant 0 : index
    %354 = vector.load %arg15[%c1_128, %c0_129, %c0_130] : memref<2x1x64xf32, #tpu.memory_space<vmem>>, vector<1x1x64xf32>
    %355 = vector.shape_cast %354 : vector<1x1x64xf32> to vector<1x64xf32>
    %cst_131 = arith.constant dense<0.000000e+00> : vector<16xf32>
    %356 = vector.multi_reduction <add>, %351, %cst_131 [1] : vector<16x64xf32> to vector<16xf32>
    %357 = vector.shape_cast %356 : vector<16xf32> to vector<16x1xf32>
    %cst_132 = arith.constant 6.400000e+01 : f32
    %358 = vector.broadcast %cst_132 : f32 to vector<16x1xf32>
    %359 = arith.divf %357, %358 : vector<16x1xf32>
    %360 = vector.broadcast %359 : vector<16x1xf32> to vector<16x64xf32>
    %361 = arith.subf %351, %360 : vector<16x64xf32>
    %362 = arith.mulf %361, %361 : vector<16x64xf32>
    %cst_133 = arith.constant dense<0.000000e+00> : vector<16xf32>
    %363 = vector.multi_reduction <add>, %362, %cst_133 [1] : vector<16x64xf32> to vector<16xf32>
    %364 = vector.shape_cast %363 : vector<16xf32> to vector<16x1xf32>
    %cst_134 = arith.constant 6.400000e+01 : f32
    %365 = vector.broadcast %cst_134 : f32 to vector<16x1xf32>
    %366 = arith.divf %364, %365 : vector<16x1xf32>
    %367 = vector.broadcast %359 : vector<16x1xf32> to vector<16x64xf32>
    %368 = arith.subf %351, %367 : vector<16x64xf32>
    %cst_135 = arith.constant 9.99999974E-6 : f32
    %369 = vector.broadcast %cst_135 : f32 to vector<16x1xf32>
    %370 = arith.addf %366, %369 : vector<16x1xf32>
    %371 = math.rsqrt %370 : vector<16x1xf32>
    %372 = vector.broadcast %371 : vector<16x1xf32> to vector<16x64xf32>
    %373 = arith.mulf %368, %372 : vector<16x64xf32>
    %374 = vector.broadcast %353 : vector<1x64xf32> to vector<16x64xf32>
    %375 = arith.mulf %373, %374 : vector<16x64xf32>
    %376 = vector.broadcast %355 : vector<1x64xf32> to vector<16x64xf32>
    %377 = arith.addf %375, %376 : vector<16x64xf32>
    %c1_136 = arith.constant 1 : index
    %c0_137 = arith.constant 0 : index
    %c0_138 = arith.constant 0 : index
    %378 = vector.load %arg18[%c1_136, %c0_137, %c0_138] : memref<2x64x128xbf16, #tpu.memory_space<vmem>>, vector<1x64x128xbf16>
    %379 = vector.shape_cast %378 : vector<1x64x128xbf16> to vector<64x128xbf16>
    %380 = arith.truncf %377 : vector<16x64xf32> to vector<16x64xbf16>
    %cst_139 = arith.constant dense<0.000000e+00> : vector<16x128xf32>
    %381 = tpu.matmul %380, %379, %cst_139 {dimension_numbers = #tpu.dot_dimension_numbers<[1], [0], [0], [1], [0, 0, 1, 1], [], []>} : vector<16x64xbf16>, vector<64x128xbf16>, vector<16x128xf32> -> vector<16x128xf32>
    %c1_140 = arith.constant 1 : index
    %c0_141 = arith.constant 0 : index
    %c0_142 = arith.constant 0 : index
    %382 = vector.load %arg19[%c1_140, %c0_141, %c0_142] : memref<2x1x128xf32, #tpu.memory_space<vmem>>, vector<1x1x128xf32>
    %383 = vector.shape_cast %382 : vector<1x1x128xf32> to vector<1x128xf32>
    %384 = vector.broadcast %383 : vector<1x128xf32> to vector<16x128xf32>
    %385 = arith.addf %381, %384 : vector<16x128xf32>
    %cst_143 = arith.constant 0.000000e+00 : f32
    %386 = vector.broadcast %cst_143 : f32 to vector<16x128xf32>
    %387 = arith.maximumf %385, %386 : vector<16x128xf32>
    %c1_144 = arith.constant 1 : index
    %c0_145 = arith.constant 0 : index
    %c0_146 = arith.constant 0 : index
    %388 = vector.load %arg20[%c1_144, %c0_145, %c0_146] : memref<2x128x64xbf16, #tpu.memory_space<vmem>>, vector<1x128x64xbf16>
    %389 = vector.shape_cast %388 : vector<1x128x64xbf16> to vector<128x64xbf16>
    %390 = arith.truncf %387 : vector<16x128xf32> to vector<16x128xbf16>
    %cst_147 = arith.constant dense<0.000000e+00> : vector<16x64xf32>
    %391 = tpu.matmul %390, %389, %cst_147 {dimension_numbers = #tpu.dot_dimension_numbers<[1], [0], [0], [1], [0, 0, 1, 1], [], []>} : vector<16x128xbf16>, vector<128x64xbf16>, vector<16x64xf32> -> vector<16x64xf32>
    %c1_148 = arith.constant 1 : index
    %c0_149 = arith.constant 0 : index
    %c0_150 = arith.constant 0 : index
    %392 = vector.load %arg21[%c1_148, %c0_149, %c0_150] : memref<2x1x64xf32, #tpu.memory_space<vmem>>, vector<1x1x64xf32>
    %393 = vector.shape_cast %392 : vector<1x1x64xf32> to vector<1x64xf32>
    %394 = vector.broadcast %393 : vector<1x64xf32> to vector<16x64xf32>
    %395 = arith.addf %391, %394 : vector<16x64xf32>
    %396 = arith.addf %377, %395 : vector<16x64xf32>
    %c1_151 = arith.constant 1 : index
    %c0_152 = arith.constant 0 : index
    %c0_153 = arith.constant 0 : index
    %397 = vector.load %arg16[%c1_151, %c0_152, %c0_153] : memref<2x1x64xf32, #tpu.memory_space<vmem>>, vector<1x1x64xf32>
    %398 = vector.shape_cast %397 : vector<1x1x64xf32> to vector<1x64xf32>
    %c1_154 = arith.constant 1 : index
    %c0_155 = arith.constant 0 : index
    %c0_156 = arith.constant 0 : index
    %399 = vector.load %arg17[%c1_154, %c0_155, %c0_156] : memref<2x1x64xf32, #tpu.memory_space<vmem>>, vector<1x1x64xf32>
    %400 = vector.shape_cast %399 : vector<1x1x64xf32> to vector<1x64xf32>
    %cst_157 = arith.constant dense<0.000000e+00> : vector<16xf32>
    %401 = vector.multi_reduction <add>, %396, %cst_157 [1] : vector<16x64xf32> to vector<16xf32>
    %402 = vector.shape_cast %401 : vector<16xf32> to vector<16x1xf32>
    %cst_158 = arith.constant 6.400000e+01 : f32
    %403 = vector.broadcast %cst_158 : f32 to vector<16x1xf32>
    %404 = arith.divf %402, %403 : vector<16x1xf32>
    %405 = vector.broadcast %404 : vector<16x1xf32> to vector<16x64xf32>
    %406 = arith.subf %396, %405 : vector<16x64xf32>
    %407 = arith.mulf %406, %406 : vector<16x64xf32>
    %cst_159 = arith.constant dense<0.000000e+00> : vector<16xf32>
    %408 = vector.multi_reduction <add>, %407, %cst_159 [1] : vector<16x64xf32> to vector<16xf32>
    %409 = vector.shape_cast %408 : vector<16xf32> to vector<16x1xf32>
    %cst_160 = arith.constant 6.400000e+01 : f32
    %410 = vector.broadcast %cst_160 : f32 to vector<16x1xf32>
    %411 = arith.divf %409, %410 : vector<16x1xf32>
    %412 = vector.broadcast %404 : vector<16x1xf32> to vector<16x64xf32>
    %413 = arith.subf %396, %412 : vector<16x64xf32>
    %cst_161 = arith.constant 9.99999974E-6 : f32
    %414 = vector.broadcast %cst_161 : f32 to vector<16x1xf32>
    %415 = arith.addf %411, %414 : vector<16x1xf32>
    %416 = math.rsqrt %415 : vector<16x1xf32>
    %417 = vector.broadcast %416 : vector<16x1xf32> to vector<16x64xf32>
    %418 = arith.mulf %413, %417 : vector<16x64xf32>
    %419 = vector.broadcast %398 : vector<1x64xf32> to vector<16x64xf32>
    %420 = arith.mulf %418, %419 : vector<16x64xf32>
    %421 = vector.broadcast %400 : vector<1x64xf32> to vector<16x64xf32>
    %422 = arith.addf %420, %421 : vector<16x64xf32>
    %423 = vector.shape_cast %422 : vector<16x64xf32> to vector<2x8x64xf32>
    %cst_162 = arith.constant dense<0.000000e+00> : vector<2x64xf32>
    %424 = vector.multi_reduction <add>, %423, %cst_162 [1] : vector<2x8x64xf32> to vector<2x64xf32>
    %cst_163 = arith.constant 8.000000e+00 : f32
    %425 = vector.broadcast %cst_163 : f32 to vector<2x64xf32>
    %426 = arith.divf %424, %425 : vector<2x64xf32>
    %c0_164 = arith.constant 0 : index
    %c0_165 = arith.constant 0 : index
    %427 = vector.load %arg22[%c0_164, %c0_165] : memref<64x256xbf16, #tpu.memory_space<vmem>>, vector<64x256xbf16>
    %428 = arith.truncf %426 : vector<2x64xf32> to vector<2x64xbf16>
    %cst_166 = arith.constant dense<0.000000e+00> : vector<2x256xf32>
    %429 = tpu.matmul %428, %427, %cst_166 {dimension_numbers = #tpu.dot_dimension_numbers<[1], [0], [0], [1], [0, 0, 1, 1], [], []>} : vector<2x64xbf16>, vector<64x256xbf16>, vector<2x256xf32> -> vector<2x256xf32>
    %c0_167 = arith.constant 0 : index
    %c0_168 = arith.constant 0 : index
    %430 = vector.load %arg23[%c0_167, %c0_168] : memref<1x256xf32, #tpu.memory_space<vmem>>, vector<1x256xf32>
    %431 = vector.broadcast %430 : vector<1x256xf32> to vector<2x256xf32>
    %432 = arith.addf %429, %431 : vector<2x256xf32>
    %cst_169 = arith.constant 5.000000e-01 : f32
    %433 = vector.broadcast %cst_169 : f32 to vector<2x256xf32>
    %434 = arith.mulf %433, %432 : vector<2x256xf32>
    %cst_170 = arith.constant 0.707106769 : f32
    %435 = vector.broadcast %cst_170 : f32 to vector<2x256xf32>
    %436 = arith.mulf %432, %435 : vector<2x256xf32>
    %437 = math.erf %436 : vector<2x256xf32>
    %cst_171 = arith.constant 1.000000e+00 : f32
    %438 = vector.broadcast %cst_171 : f32 to vector<2x256xf32>
    %439 = arith.addf %438, %437 : vector<2x256xf32>
    %440 = arith.mulf %434, %439 : vector<2x256xf32>
    %c0_172 = arith.constant 0 : index
    %c0_173 = arith.constant 0 : index
    %441 = vector.load %arg24[%c0_172, %c0_173] : memref<256x12xbf16, #tpu.memory_space<vmem>>, vector<256x12xbf16>
    %442 = arith.truncf %440 : vector<2x256xf32> to vector<2x256xbf16>
    %cst_174 = arith.constant dense<0.000000e+00> : vector<2x12xf32>
    %443 = tpu.matmul %442, %441, %cst_174 {dimension_numbers = #tpu.dot_dimension_numbers<[1], [0], [0], [1], [0, 0, 1, 1], [], []>} : vector<2x256xbf16>, vector<256x12xbf16>, vector<2x12xf32> -> vector<2x12xf32>
    %c0_175 = arith.constant 0 : index
    %c0_176 = arith.constant 0 : index
    %444 = vector.load %arg25[%c0_175, %c0_176] : memref<1x12xf32, #tpu.memory_space<vmem>>, vector<1x12xf32>
    %445 = vector.broadcast %444 : vector<1x12xf32> to vector<2x12xf32>
    %446 = arith.addf %443, %445 : vector<2x12xf32>
    %447 = vector.extract_strided_slice %446 {offsets = [0, 0], sizes = [2, 6], strides = [1, 1]} : vector<2x12xf32> to vector<2x6xf32>
    %448 = vector.extract_strided_slice %446 {offsets = [0, 6], sizes = [2, 6], strides = [1, 1]} : vector<2x12xf32> to vector<2x6xf32>
    %c0_177 = arith.constant 0 : index
    %c0_178 = arith.constant 0 : index
    %449 = vector.load %arg4[%c0_177, %c0_178] : memref<2x6xf32, #tpu.memory_space<vmem>>, vector<2x6xf32>
    %cst_179 = arith.constant 5.000000e-01 : f32
    %450 = vector.broadcast %cst_179 : f32 to vector<2x6xf32>
    %451 = arith.mulf %450, %448 : vector<2x6xf32>
    %452 = math.exp %451 : vector<2x6xf32>
    %453 = arith.mulf %449, %452 : vector<2x6xf32>
    %454 = arith.addf %447, %453 : vector<2x6xf32>
    %c0_180 = arith.constant 0 : index
    %c0_181 = arith.constant 0 : index
    %455 = vector.load %arg26[%c0_180, %c0_181] : memref<64x256xbf16, #tpu.memory_space<vmem>>, vector<64x256xbf16>
    %456 = arith.truncf %426 : vector<2x64xf32> to vector<2x64xbf16>
    %cst_182 = arith.constant dense<0.000000e+00> : vector<2x256xf32>
    %457 = tpu.matmul %456, %455, %cst_182 {dimension_numbers = #tpu.dot_dimension_numbers<[1], [0], [0], [1], [0, 0, 1, 1], [], []>} : vector<2x64xbf16>, vector<64x256xbf16>, vector<2x256xf32> -> vector<2x256xf32>
    %c0_183 = arith.constant 0 : index
    %c0_184 = arith.constant 0 : index
    %458 = vector.load %arg27[%c0_183, %c0_184] : memref<1x256xf32, #tpu.memory_space<vmem>>, vector<1x256xf32>
    %459 = vector.broadcast %458 : vector<1x256xf32> to vector<2x256xf32>
    %460 = arith.addf %457, %459 : vector<2x256xf32>
    %cst_185 = arith.constant 5.000000e-01 : f32
    %461 = vector.broadcast %cst_185 : f32 to vector<2x256xf32>
    %462 = arith.mulf %461, %460 : vector<2x256xf32>
    %cst_186 = arith.constant 0.707106769 : f32
    %463 = vector.broadcast %cst_186 : f32 to vector<2x256xf32>
    %464 = arith.mulf %460, %463 : vector<2x256xf32>
    %465 = math.erf %464 : vector<2x256xf32>
    %cst_187 = arith.constant 1.000000e+00 : f32
    %466 = vector.broadcast %cst_187 : f32 to vector<2x256xf32>
    %467 = arith.addf %466, %465 : vector<2x256xf32>
    %468 = arith.mulf %462, %467 : vector<2x256xf32>
    %c0_188 = arith.constant 0 : index
    %c0_189 = arith.constant 0 : index
    %469 = vector.load %arg28[%c0_188, %c0_189] : memref<4x64xf32, #tpu.memory_space<vmem>>, vector<4x64xf32>
    %470 = vector.extract_strided_slice %468 {offsets = [0, 0], sizes = [2, 64], strides = [1, 1]} : vector<2x256xf32> to vector<2x64xf32>
    %471 = vector.extract_strided_slice %469 {offsets = [0, 0], sizes = [1, 64], strides = [1, 1]} : vector<4x64xf32> to vector<1x64xf32>
    %472 = vector.broadcast %471 : vector<1x64xf32> to vector<2x64xf32>
    %473 = arith.mulf %470, %472 : vector<2x64xf32>
    %cst_190 = arith.constant dense<0.000000e+00> : vector<2xf32>
    %474 = vector.multi_reduction <add>, %473, %cst_190 [1] : vector<2x64xf32> to vector<2xf32>
    %475 = vector.shape_cast %474 : vector<2xf32> to vector<2x1xf32>
    %476 = vector.extract_strided_slice %468 {offsets = [0, 64], sizes = [2, 64], strides = [1, 1]} : vector<2x256xf32> to vector<2x64xf32>
    %477 = vector.extract_strided_slice %469 {offsets = [1, 0], sizes = [1, 64], strides = [1, 1]} : vector<4x64xf32> to vector<1x64xf32>
    %478 = vector.broadcast %477 : vector<1x64xf32> to vector<2x64xf32>
    %479 = arith.mulf %476, %478 : vector<2x64xf32>
    %cst_191 = arith.constant dense<0.000000e+00> : vector<2xf32>
    %480 = vector.multi_reduction <add>, %479, %cst_191 [1] : vector<2x64xf32> to vector<2xf32>
    %481 = vector.shape_cast %480 : vector<2xf32> to vector<2x1xf32>
    %482 = vector.extract_strided_slice %468 {offsets = [0, 128], sizes = [2, 64], strides = [1, 1]} : vector<2x256xf32> to vector<2x64xf32>
    %483 = vector.extract_strided_slice %469 {offsets = [2, 0], sizes = [1, 64], strides = [1, 1]} : vector<4x64xf32> to vector<1x64xf32>
    %484 = vector.broadcast %483 : vector<1x64xf32> to vector<2x64xf32>
    %485 = arith.mulf %482, %484 : vector<2x64xf32>
    %cst_192 = arith.constant dense<0.000000e+00> : vector<2xf32>
    %486 = vector.multi_reduction <add>, %485, %cst_192 [1] : vector<2x64xf32> to vector<2xf32>
    %487 = vector.shape_cast %486 : vector<2xf32> to vector<2x1xf32>
    %488 = vector.extract_strided_slice %468 {offsets = [0, 192], sizes = [2, 64], strides = [1, 1]} : vector<2x256xf32> to vector<2x64xf32>
    %489 = vector.extract_strided_slice %469 {offsets = [3, 0], sizes = [1, 64], strides = [1, 1]} : vector<4x64xf32> to vector<1x64xf32>
    %490 = vector.broadcast %489 : vector<1x64xf32> to vector<2x64xf32>
    %491 = arith.mulf %488, %490 : vector<2x64xf32>
    %cst_193 = arith.constant dense<0.000000e+00> : vector<2xf32>
    %492 = vector.multi_reduction <add>, %491, %cst_193 [1] : vector<2x64xf32> to vector<2xf32>
    %493 = vector.shape_cast %492 : vector<2xf32> to vector<2x1xf32>
    %494 = tpu.concatenate %475, %481, %487, %493 in 1 : vector<2x1xf32>, vector<2x1xf32>, vector<2x1xf32>, vector<2x1xf32> -> vector<2x4xf32>
    %c0_194 = arith.constant 0 : index
    %c0_195 = arith.constant 0 : index
    %495 = vector.load %arg29[%c0_194, %c0_195] : memref<1x4xf32, #tpu.memory_space<vmem>>, vector<1x4xf32>
    %496 = vector.broadcast %495 : vector<1x4xf32> to vector<2x4xf32>
    %497 = arith.addf %494, %496 : vector<2x4xf32>
    %c0_196 = arith.constant 0 : index
    %c0_197 = arith.constant 0 : index
    %498 = vector.load %arg3[%c0_196, %c0_197] : memref<2x4xf32, #tpu.memory_space<vmem>>, vector<2x4xf32>
    %499 = tpu.concatenate %454, %498 in 1 : vector<2x6xf32>, vector<2x4xf32> -> vector<2x10xf32>
    %c0_198 = arith.constant 0 : index
    %c0_199 = arith.constant 0 : index
    %500 = vector.load %arg30[%c0_198, %c0_199] : memref<10x128xbf16, #tpu.memory_space<vmem>>, vector<10x128xbf16>
    %501 = arith.truncf %499 : vector<2x10xf32> to vector<2x10xbf16>
    %cst_200 = arith.constant dense<0.000000e+00> : vector<2x128xf32>
    %502 = tpu.matmul %501, %500, %cst_200 {dimension_numbers = #tpu.dot_dimension_numbers<[1], [0], [0], [1], [0, 0, 1, 1], [], []>} : vector<2x10xbf16>, vector<10x128xbf16>, vector<2x128xf32> -> vector<2x128xf32>
    %c0_201 = arith.constant 0 : index
    %c0_202 = arith.constant 0 : index
    %503 = vector.load %arg31[%c0_201, %c0_202] : memref<1x128xf32, #tpu.memory_space<vmem>>, vector<1x128xf32>
    %504 = vector.broadcast %503 : vector<1x128xf32> to vector<2x128xf32>
    %505 = arith.addf %502, %504 : vector<2x128xf32>
    %cst_203 = arith.constant 0.000000e+00 : f32
    %506 = vector.broadcast %cst_203 : f32 to vector<2x128xf32>
    %507 = arith.maximumf %505, %506 : vector<2x128xf32>
    %c0_204 = arith.constant 0 : index
    %c0_205 = arith.constant 0 : index
    %508 = vector.load %arg32[%c0_204, %c0_205] : memref<128x6xbf16, #tpu.memory_space<vmem>>, vector<128x6xbf16>
    %509 = arith.truncf %507 : vector<2x128xf32> to vector<2x128xbf16>
    %cst_206 = arith.constant dense<0.000000e+00> : vector<2x6xf32>
    %510 = tpu.matmul %509, %508, %cst_206 {dimension_numbers = #tpu.dot_dimension_numbers<[1], [0], [0], [1], [0, 0, 1, 1], [], []>} : vector<2x128xbf16>, vector<128x6xbf16>, vector<2x6xf32> -> vector<2x6xf32>
    %c0_207 = arith.constant 0 : index
    %c0_208 = arith.constant 0 : index
    %511 = vector.load %arg33[%c0_207, %c0_208] : memref<1x6xf32, #tpu.memory_space<vmem>>, vector<1x6xf32>
    %512 = vector.broadcast %511 : vector<1x6xf32> to vector<2x6xf32>
    %513 = arith.addf %510, %512 : vector<2x6xf32>
    %cst_209 = arith.constant dense<0xFF800000> : vector<2xf32>
    %514 = vector.multi_reduction <maximumf>, %513, %cst_209 [1] : vector<2x6xf32> to vector<2xf32>
    %515 = vector.shape_cast %514 : vector<2xf32> to vector<2x1xf32>
    %516 = vector.broadcast %515 : vector<2x1xf32> to vector<2x6xf32>
    %517 = arith.subf %513, %516 : vector<2x6xf32>
    %518 = math.exp %517 : vector<2x6xf32>
    %cst_210 = arith.constant dense<0.000000e+00> : vector<2xf32>
    %519 = vector.multi_reduction <add>, %518, %cst_210 [1] : vector<2x6xf32> to vector<2xf32>
    %520 = vector.shape_cast %519 : vector<2xf32> to vector<2x1xf32>
    %521 = vector.broadcast %520 : vector<2x1xf32> to vector<2x6xf32>
    %522 = arith.divf %518, %521 : vector<2x6xf32>
    %523 = arith.mulf %454, %522 : vector<2x6xf32>
    %524 = tpu.concatenate %523, %497 in 1 : vector<2x6xf32>, vector<2x4xf32> -> vector<2x10xf32>
    %c0_211 = arith.constant 0 : index
    %c0_212 = arith.constant 0 : index
    %525 = vector.load %arg34[%c0_211, %c0_212] : memref<1x10xf32, #tpu.memory_space<vmem>>, vector<1x10xf32>
    %526 = vector.broadcast %525 : vector<1x10xf32> to vector<2x10xf32>
    %527 = arith.mulf %524, %526 : vector<2x10xf32>
    %cst_213 = arith.constant dense<0.000000e+00> : vector<2xf32>
    %528 = vector.multi_reduction <add>, %527, %cst_213 [1] : vector<2x10xf32> to vector<2xf32>
    %529 = vector.shape_cast %528 : vector<2xf32> to vector<2x1xf32>
    %c0_214 = arith.constant 0 : index
    %c0_215 = arith.constant 0 : index
    %530 = vector.load %arg35[%c0_214, %c0_215] : memref<1x1xf32, #tpu.memory_space<vmem>>, vector<1x1xf32>
    %531 = vector.broadcast %530 : vector<1x1xf32> to vector<2x1xf32>
    %532 = arith.addf %529, %531 : vector<2x1xf32>
    %cst_216 = arith.constant 0.000000e+00 : f32
    %533 = vector.broadcast %cst_216 : f32 to vector<2x111xf32>
    %534 = tpu.concatenate %532, %522, %497, %454, %533 in 1 : vector<2x1xf32>, vector<2x6xf32>, vector<2x4xf32>, vector<2x6xf32>, vector<2x111xf32> -> vector<2x128xf32>
    %c0_217 = arith.constant 0 : index
    %c0_218 = arith.constant 0 : index
    %535 = vector.load %arg36[%c0_217, %c0_218] : memref<2x128xf32, #tpu.memory_space<vmem>>, vector<2x128xf32>
    tpu.vector_store %arg36[%c0_217, %c0_218], %534 {strides = array<i32>} : memref<2x128xf32, #tpu.memory_space<vmem>>, vector<2x128xf32>,
    return
  }
}

</mosaic_0001>

<bundles_post_ra>
// kernel: latent_difficulty_forward.1
= control target key start
LH: loop header
LB: loop body
LE: loop exit
PB: predicated region body
PF: predicated region fallthrough
CT: control target
= control target key end

     0   :  { %s5929_s6 = smov 1   ;;  %s5930_s10 = smov 2   ;;  %s6993_s0 = inlined_call_operand.smem [shape: u32[37], index: -1, kind: input, shape index: {}] }
   0x1   :  { %s6010_s5 = sld [smem:[%s6993_s0]]   ;;  %s5931_s14 = smov 3  }
   0x2   :  { %s6015_s9 = sld [smem:[%s6993_s0 + %s5929_s6]]   ;;  %s5932_s18 = smov 4  }
   0x3   :  { %s6020_s13 = sld [smem:[%s6993_s0 + %s5930_s10]]   ;;  %s5933_s22 = smov 5  }
   0x4   :  { %s6025_s17 = sld [smem:[%s6993_s0 + %s5931_s14]]   ;;  %s5934_s26 = smov 6  }
   0x5   :  { %s6030_s21 = sld [smem:[%s6993_s0 + %s5932_s18]]   ;;  %s5935_s30 = smov 7  }
   0x6   :  { %s6035_s25 = sld [smem:[%s6993_s0 + %s5933_s22]]   ;;  %s5936_s4 = smov 8  }
   0x7   :  { %7006 = sst [smem:[#allocation33_spill]] %s6010_s5  ;;  %s5937_s10 = smov 9  }
   0x8   :  { %s6040_s29 = sld [smem:[%s6993_s0 + %s5934_s26]]   ;;  %s5938_s15 = smov 10  }
   0x9   :  { %7007 = sst [smem:[#allocation34_spill]] %s6020_s13  ;;  %s5939_s20 = smov 11  }
   0xa   :  { %7008 = sst [smem:[#allocation35_spill]] %s6025_s17  ;;  %s5940_s26 = smov 12  }
   0xb   :  { %7009 = sst [smem:[#allocation36_spill]] %s6030_s21  ;;  %s5941_s1 = smov 13  }
   0xc   :  { %7010 = sst [smem:[#allocation37_spill]] %s6035_s25  ;;  %s5942_s7 = smov 14  }
   0xd   :  { %s6045_s3 = sld [smem:[%s6993_s0 + %s5935_s30]]   ;;  %s5944_s22 = smov 16  }
   0xe   :  { %s6050_s8 = sld [smem:[%s6993_s0 + %s5936_s4]]   ;;  %s5945_s28 = smov 17  }
   0xf   :  { %s6055_s14 = sld [smem:[%s6993_s0 + %s5937_s10]]   ;;  %s5964_s23 = smov 36  }
  0x10   :  { %s6060_s19 = sld [smem:[%s6993_s0 + %s5938_s15]]   ;;  %s5943_s15 = smov 15  }
  0x11   :  { %s6065_s24 = sld [smem:[%s6993_s0 + %s5939_s20]]  }
  0x12   :  { %s6070_s30 = sld [smem:[%s6993_s0 + %s5940_s26]]  }
  0x13   :  { %7011 = sst [smem:[#allocation38_spill]] %s6045_s3 }
  0x14   :  { %7012 = sst [smem:[#allocation39_spill]] %s6050_s8 }
  0x15   :  { %7013 = sst [smem:[#allocation40_spill]] %s6055_s14 }
  0x16   :  { %7014 = sst [smem:[#allocation41_spill]] %s6060_s19 }
  0x17   :  { %s6075_s6 = sld [smem:[%s6993_s0 + %s5941_s1]]  }
  0x18   :  { %7015 = sst [smem:[#allocation42_spill]] %s6070_s30 }
  0x19   :  { %s6080_s12 = sld [smem:[%s6993_s0 + %s5942_s7]]   ;;  %s5946_s7 = smov 18  }
  0x1a   :  { %s6085_s20 = sld [smem:[%s6993_s0 + %s5943_s15]]   ;;  %s5947_s15 = smov 19  }
  0x1b   :  { %s6090_s27 = sld [smem:[%s6993_s0 + %s5944_s22]]   ;;  %s5948_s22 = smov 20  }
  0x1c   :  { %s6095_s4 = sld [smem:[%s6993_s0 + %s5945_s28]]   ;;  %s5949_s28 = smov 21  }
  0x1d   :  { %s6100_s21 = sld [smem:[%s6993_s0 + %s5946_s7]]   ;;  %s5950_s7 = smov 22  }
  0x1e   :  { %s6105_s30 = sld [smem:[%s6993_s0 + %s5947_s15]]   ;;  %s5951_s15 = smov 23  }
  0x1f   :  { %s6115_s14 = sld [smem:[%s6993_s0 + %s5949_s28]]   ;;  %s5953_s28 = smov 25  }
  0x20   :  { %s6125_s19 = sld [smem:[%s6993_s0 + %s5951_s15]]   ;;  %s5955_s15 = smov 27  }
  0x21   :  { %7016 = sst [smem:[#allocation43_spill]] %s6090_s27 }
  0x22   :  { %s6110_s27 = sld [smem:[%s6993_s0 + %s5948_s22]]   ;;  %s5952_s22 = smov 24  }
  0x23   :  { %7017 = sst [smem:[#allocation44_spill]] %s6100_s21 }
  0x24   :  { %s6120_s21 = sld [smem:[%s6993_s0 + %s5950_s7]]   ;;  %s5954_s7 = smov 26  }
  0x25   :  { %s6135_s17 = sld [smem:[%s6993_s0 + %s5953_s28]]   ;;  %s5957_s28 = smov 29  }
  0x26   :  { %s6145_s3 = sld [smem:[%s6993_s0 + %s5955_s15]]   ;;  %s5959_s15 = smov 31  }
  0x27   :  { %s6155_s8 = sld [smem:[%s6993_s0 + %s5957_s28]]   ;;  %s5961_s28 = smov 33  }
  0x28   :  { %7018 = sst [smem:[#allocation45_spill]] %s6110_s27 }
  0x29   :  { %s6130_s27 = sld [smem:[%s6993_s0 + %s5952_s22]]   ;;  %s5956_s22 = smov 28  }
  0x2a   :  { %7019 = sst [smem:[#allocation46_spill]] %s6120_s21 }
  0x2b   :  { %s6140_s21 = sld [smem:[%s6993_s0 + %s5954_s7]]   ;;  %s5958_s7 = smov 30  }
  0x2c   :  { %s6165_s5 = sld [smem:[%s6993_s0 + %s5959_s15]]   ;;  %s5963_s15 = smov 35  }
  0x2d   :  { %s6175_s13 = sld [smem:[%s6993_s0 + %s5961_s28]]  }
  0x2f   :  { %7020 = sst [smem:[#allocation47_spill]] %s6130_s27 }
  0x30   :  { %s6150_s27 = sld [smem:[%s6993_s0 + %s5956_s22]]   ;;  %s5960_s22 = smov 32  }
  0x31   :  { %7021 = sst [smem:[#allocation48_spill]] %s6140_s21 }
  0x32   :  { %s6160_s21 = sld [smem:[%s6993_s0 + %s5958_s7]]   ;;  %s5962_s7 = smov 34  }
  0x33   :  { %7023 = sst [smem:[#allocation50_spill]] %s6165_s5 }
  0x34   :  { %s6170_s25 = sld [smem:[%s6993_s0 + %s5960_s22]]  }
  0x35   :  { %s4602_s5 = sld [smem:[%s6993_s0 + %s5963_s15]]  }
  0x38   :  { %7022 = sst [smem:[#allocation49_spill]] %s6160_s21 }
  0x39   :  { %s6180_s21 = sld [smem:[%s6993_s0 + %s5962_s7]]  }
  0x3a   :  { %7024 = sst [smem:[#allocation51_spill]] %s6170_s25 }
  0x3b   :  { %s6188_s25 = sld [smem:[%s6993_s0 + %s5964_s23]]   ;;  %v78_v0 = vstv %s4602_s5 }
  0x3c   :  { %79 = vst [vmem:[#allocation2] sm:$0x1] %v78_v0 }
  0x3d   :  { %80 = vsyncpa [#allocation4], 0 }
  0x3e   :  { %81 = vsyncpa [#allocation6], 0 }
  0x3f   :  { %82 = vsyncpa [#allocation9], 0 }
  0x40   :  { %83 = vsyncpa [#allocation12], 0 }
  0x41   :  { %84 = vsyncpa [#allocation15], 0 }
  0x42   :  { %85 = vsyncpa [#allocation18], 0 }
  0x43   :  { %86 = vsyncpa [#allocation21], 0 }
  0x44   :  { %87 = vsyncpa [#allocation24], 0  ;;  %s5965_s28 = smov [#allocation5]   ;;  %s5605_s2 = scalar_lea.hbm %s6065_s24, 64 }
  0x45   :  { %s123_s1 = sshll.u32 %s5965_s28, 4  ;;  %p5606_p0 = scmp.ne.s32.totalorder %s6065_s24, %s5605_s2  ;;  %s124_s1 = int_to_ptr.vmem [resolvable:$true] %s123_s1 }
  0x46   :  { %p5609_p1 = scmp.lt.u32.totalorder %s5605_s2, %s6065_s24 }
  0x48   :  { %p5611_p2 = pnand %p5609_p1, %p5606_p0 }
  0x4a   :  { %5614 = shalt.err (!%p5611_p2)
}
  0x4b   :  { %s5615_s0 = scalar_lea.vmem %s124_s1, 64  ;;  %p5620_p4 = scmp.lt.s32.totalorder %s124_s1, %s124_s1 }
  0x4c   :  { %p5616_p3 = scmp.ne.s32.totalorder %s124_s1, %s5615_s0  ;;  %p5621_p5 = scmp.lt.s32.totalorder %s5615_s0, %s5615_s0 }
  0x4e   :  { %p5622_p6 = por %p5621_p5, %p5620_p4 }
  0x50   :  { %p5623_p7 = pnand %p5622_p6, %p5616_p3 }
  0x52   :  { %5626 = shalt.err (!%p5623_p7)
}
  0x53   :  { %s5966_s5 = smov 32   ;;  %s5967_s7 = smov 2  }
  0x54   :  { %129 = dma.hbm_to_vmem [thread:$0]  %s6065_s24, 64, %s124_s1, [#allocation6], %s5966_s5, %s5966_s5, %s5967_s7  }
  0x55   :  { %s5968_s10 = smov [#allocation8]   ;;  %s5969_s15 = smov [#allocation11]  }
  0x56   :  { %s149_s11 = sshll.u32 %s5968_s10, 4  ;;  %s175_s16 = sshll.u32 %s5969_s15, 4  ;;  %s150_s11 = int_to_ptr.vmem [resolvable:$true] %s149_s11  ;;  %s176_s16 = int_to_ptr.vmem [resolvable:$true] %s175_s16 }
  0x57   :  { %s5627_s18 = scalar_lea.hbm %s6080_s12, 32 }
  0x58   :  { %p5628_p8 = scmp.ne.s32.totalorder %s6080_s12, %s5627_s18  ;;  %p5631_p9 = scmp.lt.u32.totalorder %s5627_s18, %s6080_s12 }
  0x5a   :  { %p5633_p10 = pnand %p5631_p9, %p5628_p8 }
  0x5c   :  { %5636 = shalt.err (!%p5633_p10)
}
  0x5d   :  { %s5637_s23 = scalar_lea.vmem %s150_s11, 32  ;;  %p5642_p12 = scmp.lt.s32.totalorder %s150_s11, %s150_s11 }
  0x5e   :  { %p5638_p11 = scmp.ne.s32.totalorder %s150_s11, %s5637_s23  ;;  %p5643_p13 = scmp.lt.s32.totalorder %s5637_s23, %s5637_s23 }
  0x60   :  { %p5644_p0 = por %p5643_p13, %p5642_p12 }
  0x62   :  { %p5645_p1 = pnand %p5644_p0, %p5638_p11 }
  0x64   :  { %5648 = shalt.err (!%p5645_p1)
}
  0x65   :  { %s5970_s22 = smov 16   ;;  %s5971_s24 = smov 1  }
  0x66   :  { %155 = dma.hbm_to_vmem [thread:$0]  %s6080_s12, 32, %s150_s11, [#allocation9], %s5970_s22, %s5970_s22, %s5971_s24  }
  0x67   :  { %s5649_s26 = scalar_lea.hbm %s6095_s4, 32 }
  0x68   :  { %p5650_p2 = scmp.ne.s32.totalorder %s6095_s4, %s5649_s26  ;;  %p5653_p3 = scmp.lt.u32.totalorder %s5649_s26, %s6095_s4 }
  0x6a   :  { %p5655_p4 = pnand %p5653_p3, %p5650_p2 }
  0x6c   :  { %5658 = shalt.err (!%p5655_p4)
}
  0x6d   :  { %s5659_s28 = scalar_lea.vmem %s176_s16, 32  ;;  %p5664_p6 = scmp.lt.s32.totalorder %s176_s16, %s176_s16 }
  0x6e   :  { %p5660_p5 = scmp.ne.s32.totalorder %s176_s16, %s5659_s28  ;;  %p5665_p7 = scmp.lt.s32.totalorder %s5659_s28, %s5659_s28 }
  0x70   :  { %p5666_p8 = por %p5665_p7, %p5664_p6 }
  0x72   :  { %p5667_p9 = pnand %p5666_p8, %p5660_p5 }
  0x74   :  { %5670 = shalt.err (!%p5667_p9)
}
  0x75   :  { %181 = dma.hbm_to_vmem [thread:$0]  %s6095_s4, 32, %s176_s16, [#allocation12], %s5970_s22, %s5970_s22, %s5971_s24  }
  0x76   :  { %s5972_s12 = smov [#allocation14]   ;;  %s5973_s2 = smov [#allocation17]  }
  0x77   :  { %s203_s1 = sshll.u32 %s5972_s12, 4  ;;  %s230_s0 = sshll.u32 %s5973_s2, 4  ;;  %s204_s1 = int_to_ptr.vmem [resolvable:$true] %s203_s1  ;;  %s231_s0 = int_to_ptr.vmem [resolvable:$true] %s230_s0 }
  0x78   :  { %s5671_s7 = scalar_lea.hbm %s6115_s14, 32 }
  0x79   :  { %p5672_p10 = scmp.ne.s32.totalorder %s6115_s14, %s5671_s7  ;;  %p5675_p11 = scmp.lt.u32.totalorder %s5671_s7, %s6115_s14 }
  0x7b   :  { %p5677_p12 = pnand %p5675_p11, %p5672_p10 }
  0x7d   :  { %5680 = shalt.err (!%p5677_p12)
}
  0x7e   :  { %s5681_s10 = scalar_lea.vmem %s204_s1, 32  ;;  %p5686_p0 = scmp.lt.s32.totalorder %s204_s1, %s204_s1 }
  0x7f   :  { %p5682_p13 = scmp.ne.s32.totalorder %s204_s1, %s5681_s10  ;;  %p5687_p1 = scmp.lt.s32.totalorder %s5681_s10, %s5681_s10 }
  0x81   :  { %p5688_p2 = por %p5687_p1, %p5686_p0 }
  0x83   :  { %p5689_p3 = pnand %p5688_p2, %p5682_p13 }
  0x85   :  { %5692 = shalt.err (!%p5689_p3)
}
  0x86   :  { %209 = dma.hbm_to_vmem [thread:$0]  %s6115_s14, 32, %s204_s1, [#allocation15], %s5970_s22, %s5970_s22, %s5971_s24  }
  0x87   :  { %s5693_s4 = scalar_lea.hbm %s6135_s17, 16 }
  0x88   :  { %p5694_p4 = scmp.ne.s32.totalorder %s6135_s17, %s5693_s4  ;;  %p5697_p5 = scmp.lt.u32.totalorder %s5693_s4, %s6135_s17 }
  0x8a   :  { %p5699_p6 = pnand %p5697_p5, %p5694_p4 }
  0x8c   :  { %5702 = shalt.err (!%p5699_p6)
}
  0x8d   :  { %s5703_s11 = scalar_lea.vmem %s231_s0, 16  ;;  %s5707_s15 = scalar_lea.vmem %s231_s0, 32 }
  0x8e   :  { %p5704_p7 = scmp.ne.s32.totalorder %s231_s0, %s5703_s11  ;;  %p5708_p8 = scmp.lt.s32.totalorder %s231_s0, %s231_s0 }
  0x8f   :  { %p5709_p9 = scmp.lt.s32.totalorder %s5707_s15, %s5703_s11 }
  0x91   :  { %p5710_p10 = por %p5709_p9, %p5708_p8 }
  0x93   :  { %p5711_p11 = pnand %p5710_p10, %p5704_p7 }
  0x95   :  { %5714 = shalt.err (!%p5711_p11)
}
  0x96   :  { %233 = dma.hbm_to_vmem [thread:$0]  %s6135_s17, 16, %s231_s0, [#allocation18]  }
  0x97   :  { %s5974_s14 = smov [#allocation20]   ;;  %s5975_s18 = smov [#allocation3]  }
  0x98   :  { %s252_s16 = sshll.u32 %s5974_s14, 4  ;;  %s106_s23 = sshll.u32 %s5975_s18, 4  ;;  %s253_s16 = int_to_ptr.vmem [resolvable:$true] %s252_s16  ;;  %s107_s23 = int_to_ptr.vmem [resolvable:$true] %s106_s23 }
  0x99   :  { %s5715_s26 = scalar_lea.hbm %s6150_s27, 64 }
  0x9a   :  { %p5716_p12 = scmp.ne.s32.totalorder %s6150_s27, %s5715_s26  ;;  %p5719_p13 = scmp.lt.u32.totalorder %s5715_s26, %s6150_s27 }
  0x9c   :  { %p5721_p0 = pnand %p5719_p13, %p5716_p12 }
  0x9e   :  { %5724 = shalt.err (!%p5721_p0)
}
  0x9f   :  { %s5725_s28 = scalar_lea.vmem %s253_s16, 64  ;;  %p5730_p2 = scmp.lt.s32.totalorder %s253_s16, %s253_s16 }
  0xa0   :  { %p5726_p1 = scmp.ne.s32.totalorder %s253_s16, %s5725_s28  ;;  %p5731_p3 = scmp.lt.s32.totalorder %s5725_s28, %s5725_s28 }
  0xa2   :  { %p5732_p4 = por %p5731_p3, %p5730_p2 }
  0xa4   :  { %p5733_p5 = pnand %p5732_p4, %p5726_p1 }
  0xa6   :  { %5736 = shalt.err (!%p5733_p5)
}
  0xa7   :  { %255 = dma.hbm_to_vmem [thread:$0]  %s6150_s27, 64, %s253_s16, [#allocation21]  }
  0xa8   :  { %s5737_s17 = scalar_lea.hbm %s6040_s29, 16 }
  0xa9   :  { %p5738_p6 = scmp.ne.s32.totalorder %s6040_s29, %s5737_s17  ;;  %p5741_p7 = scmp.lt.u32.totalorder %s5737_s17, %s6040_s29 }
  0xab   :  { %p5743_p8 = pnand %p5741_p7, %p5738_p6 }
  0xad   :  { %5746 = shalt.err (!%p5743_p8)
}
  0xae   :  { %s5747_s12 = scalar_lea.vmem %s107_s23, 16  ;;  %s5751_s1 = scalar_lea.vmem %s107_s23, 32 }
  0xaf   :  { %p5748_p9 = scmp.ne.s32.totalorder %s107_s23, %s5747_s12  ;;  %p5752_p10 = scmp.lt.s32.totalorder %s107_s23, %s107_s23 }
  0xb0   :  { %p5753_p11 = scmp.lt.s32.totalorder %s5751_s1, %s5747_s12 }
  0xb2   :  { %p5754_p12 = por %p5753_p11, %p5752_p10 }
  0xb4   :  { %p5755_p13 = pnand %p5754_p12, %p5748_p9 }
  0xb6   :  { %5758 = shalt.err (!%p5755_p13)
}
  0xb7   :  { %109 = dma.hbm_to_vmem [thread:$0]  %s6040_s29, 16, %s107_s23, [#allocation4]  }
  0xb8   :  { %s5976_s27 = smov [#allocation7]   ;;  %s5977_s0 = smov [#allocation10]  }
  0xb9   :  { %s137_s2 = sshll.u32 %s5976_s27, 4  ;;  %s161_s7 = sshll.u32 %s5977_s0, 4  ;;  %s138_s2 = int_to_ptr.vmem [resolvable:$true] %s137_s2  ;;  %s162_s7 = int_to_ptr.vmem [resolvable:$true] %s161_s7 }
  0xba   :  { %s5759_s10 = scalar_lea.hbm %s6075_s6, 32 }
  0xbb   :  { %p5760_p0 = scmp.ne.s32.totalorder %s6075_s6, %s5759_s10  ;;  %p5763_p1 = scmp.lt.u32.totalorder %s5759_s10, %s6075_s6 }
  0xbd   :  { %p5765_p2 = pnand %p5763_p1, %p5760_p0 }
  0xbf   :  { %5768 = shalt.err (!%p5765_p2)
}
  0xc0   :  { %s5769_s4 = scalar_lea.vmem %s138_s2, 32  ;;  %p5774_p4 = scmp.lt.s32.totalorder %s138_s2, %s138_s2 }
  0xc1   :  { %p5770_p3 = scmp.ne.s32.totalorder %s138_s2, %s5769_s4  ;;  %p5775_p5 = scmp.lt.s32.totalorder %s5769_s4, %s5769_s4 }
  0xc3   :  { %p5776_p6 = por %p5775_p5, %p5774_p4 }
  0xc5   :  { %p5777_p7 = pnand %p5776_p6, %p5770_p3 }
  0xc7   :  { %5780 = shalt.err (!%p5777_p7)
}
  0xc8   :  { %143 = dma.hbm_to_vmem [thread:$0]  %s6075_s6, 32, %s138_s2, [#allocation6], %s5970_s22, %s5970_s22, %s5971_s24  }
  0xc9   :  { %s5781_s29 = scalar_lea.hbm %s6085_s20, 32 }
  0xca   :  { %p5782_p8 = scmp.ne.s32.totalorder %s6085_s20, %s5781_s29  ;;  %p5785_p9 = scmp.lt.u32.totalorder %s5781_s29, %s6085_s20 }
  0xcc   :  { %p5787_p10 = pnand %p5785_p9, %p5782_p8 }
  0xce   :  { %5790 = shalt.err (!%p5787_p10)
}
  0xcf   :  { %s5791_s11 = scalar_lea.vmem %s162_s7, 32  ;;  %p5796_p12 = scmp.lt.s32.totalorder %s162_s7, %s162_s7 }
  0xd0   :  { %p5792_p11 = scmp.ne.s32.totalorder %s162_s7, %s5791_s11  ;;  %p5797_p13 = scmp.lt.s32.totalorder %s5791_s11, %s5791_s11 }
  0xd2   :  { %p5798_p0 = por %p5797_p13, %p5796_p12 }
  0xd4   :  { %p5799_p1 = pnand %p5798_p0, %p5792_p11 }
  0xd6   :  { %5802 = shalt.err (!%p5799_p1)
}
  0xd7   :  { %167 = dma.hbm_to_vmem [thread:$0]  %s6085_s20, 32, %s162_s7, [#allocation9], %s5970_s22, %s5970_s22, %s5971_s24  }
  0xd8   :  { %s5978_s6 = smov [#allocation13]   ;;  %s5979_s14 = smov [#allocation16]  }
  0xd9   :  { %s189_s15 = sshll.u32 %s5978_s6, 4  ;;  %s218_s16 = sshll.u32 %s5979_s14, 4  ;;  %s190_s15 = int_to_ptr.vmem [resolvable:$true] %s189_s15  ;;  %s219_s16 = int_to_ptr.vmem [resolvable:$true] %s218_s16 }
  0xda   :  { %s5803_s18 = scalar_lea.hbm %s6105_s30, 32 }
  0xdb   :  { %p5804_p2 = scmp.ne.s32.totalorder %s6105_s30, %s5803_s18  ;;  %p5807_p3 = scmp.lt.u32.totalorder %s5803_s18, %s6105_s30 }
  0xdd   :  { %p5809_p4 = pnand %p5807_p3, %p5804_p2 }
  0xdf   :  { %5812 = shalt.err (!%p5809_p4)
}
  0xe0   :  { %s5813_s23 = scalar_lea.vmem %s190_s15, 32  ;;  %p5818_p6 = scmp.lt.s32.totalorder %s190_s15, %s190_s15 }
  0xe1   :  { %p5814_p5 = scmp.ne.s32.totalorder %s190_s15, %s5813_s23  ;;  %p5819_p7 = scmp.lt.s32.totalorder %s5813_s23, %s5813_s23 }
  0xe3   :  { %p5820_p8 = por %p5819_p7, %p5818_p6 }
  0xe5   :  { %p5821_p9 = pnand %p5820_p8, %p5814_p5 }
  0xe7   :  { %5824 = shalt.err (!%p5821_p9)
}
  0xe8   :  { %195 = dma.hbm_to_vmem [thread:$0]  %s6105_s30, 32, %s190_s15, [#allocation12], %s5970_s22, %s5970_s22, %s5971_s24  }
  0xe9   :  { %s5825_s20 = scalar_lea.hbm %s6125_s19, 32 }
  0xea   :  { %p5826_p10 = scmp.ne.s32.totalorder %s6125_s19, %s5825_s20  ;;  %p5829_p11 = scmp.lt.u32.totalorder %s5825_s20, %s6125_s19 }
  0xec   :  { %p5831_p12 = pnand %p5829_p11, %p5826_p10 }
  0xee   :  { %5834 = shalt.err (!%p5831_p12)
}
  0xef   :  { %s5835_s26 = scalar_lea.vmem %s219_s16, 32  ;;  %p5840_p0 = scmp.lt.s32.totalorder %s219_s16, %s219_s16 }
  0xf0   :  { %p5836_p13 = scmp.ne.s32.totalorder %s219_s16, %s5835_s26  ;;  %p5841_p1 = scmp.lt.s32.totalorder %s5835_s26, %s5835_s26 }
  0xf2   :  { %p5842_p2 = por %p5841_p1, %p5840_p0 }
  0xf4   :  { %p5843_p3 = pnand %p5842_p2, %p5836_p13 }
  0xf6   :  { %5846 = shalt.err (!%p5843_p3)
}
  0xf7   :  { %221 = dma.hbm_to_vmem [thread:$0]  %s6125_s19, 32, %s219_s16, [#allocation15]  }
  0xf8   :  { %s5980_s28 = smov [#allocation19]   ;;  %s5981_s17 = smov [#allocation22]  }
  0xf9   :  { %s242_s30 = sshll.u32 %s5980_s28, 4  ;;  %s262_s12 = sshll.u32 %s5981_s17, 4  ;;  %s243_s30 = int_to_ptr.vmem [resolvable:$true] %s242_s30  ;;  %s263_s12 = int_to_ptr.vmem [resolvable:$true] %s262_s12 }
  0xfa   :  { %s5847_s1 = scalar_lea.hbm %s6145_s3, 32 }
  0xfb   :  { %p5848_p4 = scmp.ne.s32.totalorder %s6145_s3, %s5847_s1  ;;  %p5851_p5 = scmp.lt.u32.totalorder %s5847_s1, %s6145_s3 }
  0xfd   :  { %p5853_p6 = pnand %p5851_p5, %p5848_p4 }
  0xff   :  { %5856 = shalt.err (!%p5853_p6)
}
 0x100   :  { %s5857_s27 = scalar_lea.vmem %s243_s30, 32  ;;  %p5862_p8 = scmp.lt.s32.totalorder %s243_s30, %s243_s30 }
 0x101   :  { %p5858_p7 = scmp.ne.s32.totalorder %s243_s30, %s5857_s27  ;;  %p5863_p9 = scmp.lt.s32.totalorder %s5857_s27, %s5857_s27 }
 0x103   :  { %p5864_p10 = por %p5863_p9, %p5862_p8 }
 0x105   :  { %p5865_p11 = pnand %p5864_p10, %p5858_p7 }
 0x107   :  { %5868 = shalt.err (!%p5865_p11)
}
 0x108   :  { %245 = dma.hbm_to_vmem [thread:$0]  %s6145_s3, 32, %s243_s30, [#allocation18]  }
 0x109   :  { %s5869_s19 = scalar_lea.hbm %s6155_s8, 16 }
 0x10a   :  { %p5870_p12 = scmp.ne.s32.totalorder %s6155_s8, %s5869_s19  ;;  %p5873_p13 = scmp.lt.u32.totalorder %s5869_s19, %s6155_s8 }
 0x10c   :  { %p5875_p0 = pnand %p5873_p13, %p5870_p12 }
 0x10e   :  { %5878 = shalt.err (!%p5875_p0)
}
 0x10f   :  { %s5879_s2 = scalar_lea.vmem %s263_s12, 16  ;;  %s5883_s0 = scalar_lea.vmem %s263_s12, 32 }
 0x110   :  { %p5880_p1 = scmp.ne.s32.totalorder %s263_s12, %s5879_s2  ;;  %p5884_p2 = scmp.lt.s32.totalorder %s263_s12, %s263_s12 }
 0x111   :  { %p5885_p3 = scmp.lt.s32.totalorder %s5883_s0, %s5879_s2 }
 0x113   :  { %p5886_p4 = por %p5885_p3, %p5884_p2 }
 0x115   :  { %p5887_p5 = pnand %p5886_p4, %p5880_p1 }
 0x117   :  { %5890 = shalt.err (!%p5887_p5)
}
 0x118   :  { %265 = dma.hbm_to_vmem [thread:$0]  %s6155_s8, 16, %s263_s12, [#allocation21]  }
 0x119   :  { %s5982_s3 = smov [#allocation23]   ;;  %s5891_s10 = scalar_lea.hbm %s6180_s21, 16 }
 0x11a   :  { %s280_s7 = sshll.u32 %s5982_s3, 4  ;;  %p5892_p6 = scmp.ne.s32.totalorder %s6180_s21, %s5891_s10  ;;  %s281_s7 = int_to_ptr.vmem [resolvable:$true] %s280_s7 }
 0x11b   :  { %p5895_p7 = scmp.lt.u32.totalorder %s5891_s10, %s6180_s21 }
 0x11d   :  { %p5897_p8 = pnand %p5895_p7, %p5892_p6 }
 0x11f   :  { %5900 = shalt.err (!%p5897_p8)
}
 0x120   :  { %s5901_s4 = scalar_lea.vmem %s281_s7, 16  ;;  %s5905_s29 = scalar_lea.vmem %s281_s7, 32 }
 0x121   :  { %p5902_p9 = scmp.ne.s32.totalorder %s281_s7, %s5901_s4  ;;  %p5906_p10 = scmp.lt.s32.totalorder %s281_s7, %s281_s7 }
 0x122   :  { %p5907_p11 = scmp.lt.s32.totalorder %s5905_s29, %s5901_s4 }
 0x124   :  { %p5908_p12 = por %p5907_p11, %p5906_p10 }
 0x126   :  { %p5909_p13 = pnand %p5908_p12, %p5902_p9 }
 0x128   :  { %5912 = shalt.err (!%p5909_p13)
}
 0x129   :  { %283 = dma.hbm_to_vmem [thread:$0]  %s6180_s21, 16, %s281_s7, [#allocation24]  }
 0x12a   :  { %5913 = dma.done.wait [#allocation4], 16  }
 0x12b   :  { %5914 = vsyncadd [#allocation4], 4294967280 }
 0x12c   :  { %5915 = dma.done.wait [#allocation6], 96  }
 0x12d   :  { %5916 = vsyncadd [#allocation6], 4294967200 }
 0x12e   :  { %5917 = dma.done.wait [#allocation9], 64  }
 0x12f   :  { %5918 = vsyncadd [#allocation9], 4294967232 }
 0x130   :  { %5919 = dma.done.wait [#allocation12], 64  }
 0x131   :  { %5920 = vsyncadd [#allocation12], 4294967232 }
 0x132   :  { %5921 = dma.done.wait [#allocation15], 64  }
 0x133   :  { %5922 = vsyncadd [#allocation15], 4294967232 }
 0x134   :  { %5923 = dma.done.wait [#allocation18], 48  }
 0x135   :  { %5924 = vsyncadd [#allocation18], 4294967248 }
 0x136   :  { %5925 = dma.done.wait [#allocation21], 80  }
 0x137   :  { %5926 = vsyncadd [#allocation21], 4294967216 }
 0x138   :  { %5927 = dma.done.wait [#allocation24], 16  }
 0x139   :  { %5928 = vsyncadd [#allocation24], 4294967280  ;;  %s7025_s8 = sld [smem:[#allocation34_spill]]  ;;  %s7026_s21 = sld [smem:[#allocation37_spill]]  ;;  %v5983_v1 = vmov 0   ;;  %v5984_v2 = vmov 0.0   ;;  %v389_v22 = vlaneseq }
 0x13a   :  { %s7027_s11 = sld [smem:[#allocation33_spill]]  ;;  %5364 = vset.pattern.permute.xlu0 %v5983_v1  ;;  %5365 = vset.pattern.permute.xlu1 %v5983_v1  ;;  %vm5985_vm0 = vmmov 0   ;;  %s7028_s6 = sld [smem:[#allocation39_spill]]  ;;  %vm344_vm1 = vcmask 1043456   ;;  %v391_v3 = vld [vmem:[%s6015_s9] sm:$0xff]  ;;  %vm411_vm2 = vcmask 1041408  }
 0x13b   :  { %4959 = vmatprep.subr.bf16.mxu0 %v5984_v2  ;;  %4961 = vmatprep.mubr.msk.bf16.mxu0 %vm5985_vm0, %v5984_v2  ;;  %s7029_s15 = sld [smem:[#allocation38_spill]]  ;;  %s7030_s14 = sld [smem:[#allocation35_spill]]  ;;  %v392_v9 = vld [vmem:[%s6015_s9 + $0x8] sm:$0xff]  ;;  %vm340_vm3 = vcmask 64512   ;;  %vm407_vm4 = vcmask 31744   ;;  %v390_v23 = vand.u32 127, %v389_v22 }
 0x13c   :  { %4965 = vmatprep.subr.bf16.mxu1 %v5984_v2  ;;  %4967 = vmatprep.mubr.msk.bf16.mxu1 %vm5985_vm0, %v5984_v2  ;;  %v5986_v53 = vmov 2102212464   ;;  %v5987_v55 = vmov 920167782   ;;  %v5988_v58 = vmov 683565275  }
 0x13d   :  { %394 = vperm.xlu0 %5364, %v391_v3   ;;  %v458_v24 = vcvt.s32.f32 %v390_v23  ;;  %v5989_v60 = vmov 2475754826   ;;  %v5990_v63 = vmov 1326507024   ;;  %s7031_s9 = sld [smem:[#allocation41_spill]]  ;;  %s7032_s16 = sld [smem:[#allocation40_spill]] }
 0x13e   :  { %s5993_s18 = smov 64   ;;  %s5994_s23 = smov 48  }
 0x13f   :  { %v462_v4 = vld [vmem:[%s7025_s8] sm:$0xff]  ;;  %v463_v6 = vld [vmem:[%s7025_s8 + $0x8] sm:$0xff]  ;;  %v459_v25 = vmul.f32 -0.28782314, %v458_v24  ;;  %s5995_s20 = smov 112   ;;  %s5996_s26 = smov 96  }
 0x140   :  { %v464_v5 = vcvt.s32.f32 %v462_v4  ;;  %v331_v7 = vld [vmem:[%s7026_s21] sm:$0xf]  ;;  %v465_v10 = vcvt.s32.f32 %v463_v6  ;;  %v330_v12 = vld [vmem:[%s7027_s11 + $0x8] sm:$0xff]  ;;  %v5991_v4 = vmov 2131351028   ;;  %s5997_s28 = smov 80  }
 0x141   :  { %v329_v8 = vld [vmem:[%s7027_s11] sm:$0xff]  ;;  %v346_v11 = vsel %vm344_vm1, %v331_v7, 0  ;;  %397 = vperm.xlu0 %5364, %v392_v9   ;;  %v460_v26 = vmul.f32 1.442695, %v459_v25  ;;  %s7033_s30 = sld [smem:[#allocation42_spill]]  ;;  %s7034_s17 = sld [smem:[#allocation44_spill]] }
 0x142   :  { %v906_v13 = vld [vmem:[%s7028_s6] sm:$0x3]  ;;  %v466_v14 = vmul.f32 0.7853982, %v464_v5  ;;  %4960 = vmatpush3.bf16.msra.mxu0 %v346_v11  ;;  %v332_v15 = vpack.c.bf16 %v330_v12, %v329_v8  ;;  %v467_v18 = vmul.f32 0.7853982, %v465_v10 }
 0x143   :  { %4971 = vmatprep.subr.bf16.mxu0 %v5984_v2  ;;  %v919_v16 = vsel %vm411_vm2, %v906_v13, 0  ;;  %v406_v17 = vld [vmem:[%s7029_s15] sm:$0x3]  ;;  %5501 = vpow2.f32 %v460_v26  ;;  %s7035_s12 = sld [smem:[#allocation45_spill]]  ;;  %s7036_s1 = sld [smem:[#allocation43_spill]] }
 0x144   :  { %470 = vperm.xlu1 %5365, %v466_v14   ;;  %v905_v19 = vld [vmem:[%s7030_s14] sm:$0x3]  ;;  %v413_v20 = vsel %vm411_vm2, %v406_v17, 0  ;;  %s7039_s27 = sld [smem:[#allocation47_spill]]  ;;  %s7040_s19 = sld [smem:[#allocation49_spill]] }
 0x145   :  { %4962 = vmatmul.mubr.msk.bf16.vlgmr.msra.gmra.mrb[0].mxu0 %vm340_vm3, %v332_v15  ;;  %4966 = vmatpush3.bf16.msra.mxu1 %v413_v20  ;;  %v907_v21 = vpack.c.bf16 %v905_v19, %v905_v19  ;;  %s5998_s2 = smov 6   ;;  %s5999_s0 = smov 122  }
 0x146   :  { %4972 = vmatpush3.bf16.msra.mxu0 %v919_v16  ;;  %4973 = vmatprep.mubr.msk.bf16.mxu0 %vm5985_vm0, %v5984_v2  ;;  %s7041_s3 = sld [smem:[#allocation36_spill]]  ;;  %s7042_s7 = sld [smem:[#allocation51_spill]] }
 0x147   :  { %4977 = vmatprep.subr.bf16.mxu0 %v5984_v2  ;;  %s7043_s10 = sld [smem:[#allocation50_spill]]  ;;  %s6001_s4 = smov 11  }
 0x148   :  { %475 = vperm.xlu1 %5365, %v467_v18  }
 0x14d   :  { %4974 = vmatmul.mubr.msk.bf16.vlgmr.msra.gmra.mrb[4].mxu0 %vm407_vm4, %v907_v21  ;;  %v5502_v28 = vpop.eup %5501 }
 0x14e   :  { %4979 = vmatprep.mubr.msk.bf16.mxu0 %vm5985_vm0, %v5984_v2 }
 0x1bc   :  { %v395_v27 = vpop.permute.xlu0 %394 }
 0x1bd   :  { %vm399_vm5 = vcmp.eq.s32.totalorder %v395_v27, %v390_v23 }
 0x1be   :  { %v4606_v32 = vsel %vm399_vm5, 1.0, %v5984_v2 }
 0x1c0   :  { %v398_v30 = vpop.permute.xlu0 %397 }
 0x1c1   :  { %vm400_vm6 = vcmp.eq.s32.totalorder %v398_v30, %v390_v23 }
 0x1c2   :  { %v4607_v33 = vsel %vm400_vm6, 1.0, %v5984_v2 }
 0x1c3   :  { %v471_v29 = vpop.permute.xlu1 %470  ;;  %v405_v35 = vpack.c.bf16 %v4607_v33, %v4606_v32 }
 0x1c4   :  { %v6296_v31 = vmul.f32 %v5502_v28, %v471_v29 }
 0x1c5   :  { %4968 = vmatmul.mubr.msk.bf16.vlgmr.msra.gmra.mrb[0].mxu1 %vm407_vm4, %v405_v35 }
 0x1c6   :  { %v483_v34 = vand.u32 2139095040, %v6296_v31  ;;  %v480_v39 = vand.u32 2147483647, %v6296_v31  ;;  %1095 = vmatprep.mubr.bf16.mxu1 %v5983_v1 }
 0x1c7   :  { %v476_v36 = vpop.permute.xlu1 %475 }
 0x1c8   :  { %v484_v37 = vshrl.u32 %v483_v34, 23  ;;  %v6301_v38 = vmul.f32 %v5502_v28, %v476_v36  ;;  %v487_v44 = vand.u32 8388607, %v480_v39 }
 0x1ca   :  { %v4609_v40 = vadd.s32 4294967169, %v484_v37  ;;  %v587_v41 = vand.u32 2139095040, %v6301_v38  ;;  %v584_v46 = vand.u32 2147483647, %v6301_v38  ;;  %v488_v51 = vor.u32 8388608, %v487_v44 }
 0x1cc   :  { %v490_v42 = vadd.s32 1, %v4609_v40  ;;  %v588_v43 = vshrl.u32 %v587_v41, 23  ;;  %v6313_v57 = vand.u32 8388607, %v584_v46  ;;  %v528_v27 = vshll.u32 %v488_v51, 8 }
 0x1ce   :  { %vm491_vm7 = vcmp.gt.s32.totalorder %v490_v42, 0  ;;  %v4613_v45 = vadd.s32 4294967169, %v588_v43  ;;  %v592_v32 = vor.u32 8388608, %v6313_v57 }
 0x1cf   :  { %v492_v47 = vsel %vm491_vm7, %v490_v42, 0 }
 0x1d0   :  { %v493_v48 = vshrl.u32 %v492_v47, 5  ;;  %v494_v49 = vand.u32 31, %v492_v47  ;;  %v594_v50 = vadd.s32 1, %v4613_v45 }
 0x1d2   :  { %v495_v52 = vsub.s32 32, %v494_v49  ;;  %v506_v54 = vshll.u32 %v5986_v53, %v494_v49  ;;  %v509_v56 = vshll.u32 %v5987_v55, %v494_v49  ;;  %vm515_vm8 = vcmp.lt.s32.totalorder %v493_v48, 4 }
 0x1d3   :  { %vm595_vm9 = vcmp.gt.s32.totalorder %v594_v50, 0  ;;  %v497_v59 = vshll.u32 %v5988_v58, %v494_v49  ;;  %v500_v61 = vshll.u32 %v5989_v60, %v494_v49  ;;  %v503_v5 = vshll.u32 %v5991_v4, %v494_v49 }
 0x1d4   :  { %v507_v62 = vshrl.u32 %v5987_v55, %v495_v52  ;;  %v510_v0 = vshrl.u32 %v5990_v63, %v495_v52  ;;  %v596_v3 = vsel %vm595_vm9, %v594_v50, 0  ;;  %v496_v7 = vshrl.u32 %v5988_v58, %v495_v52 }
 0x1d5   :  { %v598_v6 = vand.u32 31, %v596_v3  ;;  %v498_v8 = vshrl.u32 %v5989_v60, %v495_v52  ;;  %v501_v9 = vshrl.u32 %v5991_v4, %v495_v52  ;;  %v6315_v12 = vshrl.u32 %v596_v3, 5 }
 0x1d6   :  { %v508_v10 = vor.u32 %v507_v62, %v506_v54  ;;  %v511_v11 = vor.u32 %v510_v0, %v509_v56  ;;  %v504_v13 = vshrl.u32 %v5986_v53, %v495_v52  ;;  %vm512_vm10 = vcmp.lt.s32.totalorder %v493_v48, 1 }
 0x1d7   :  { %v599_v14 = vsub.s32 32, %v598_v6  ;;  %v610_v15 = vshll.u32 %v5986_v53, %v598_v6  ;;  %v613_v16 = vshll.u32 %v5987_v55, %v598_v6  ;;  %v499_v19 = vor.u32 %v498_v8, %v497_v59 }
 0x1d8   :  { %v521_v17 = vsel %vm515_vm8, %v508_v10, 920167782  ;;  %v525_v18 = vsel %vm515_vm8, %v511_v11, 1326507024  ;;  %v502_v20 = vor.u32 %v501_v9, %v500_v61  ;;  %v505_v24 = vor.u32 %v504_v13, %v503_v5 }
 0x1d9   :  { %v611_v21 = vshrl.u32 %v5987_v55, %v599_v14  ;;  %v614_v23 = vshrl.u32 %v5990_v63, %v599_v14  ;;  %vm513_vm11 = vcmp.lt.s32.totalorder %v493_v48, 2  ;;  %vm514_vm12 = vcmp.lt.s32.totalorder %v493_v48, 3 }
 0x1da   :  { %v516_v25 = vsel %vm512_vm10, %v496_v7, %v499_v19  ;;  %v520_v26 = vsel %vm512_vm10, %v499_v19, %v502_v20  ;;  %v517_v29 = vsel %vm515_vm8, %v505_v24, 2102212464  ;;  %v522_v30 = vsel %vm514_vm12, %v505_v24, %v521_v17 }
 0x1db   :  { %v615_v28 = vor.u32 %v614_v23, %v613_v16  ;;  %v518_v33 = vsel %vm514_vm12, %v502_v20, %v517_v29  ;;  %v523_v34 = vsel %vm513_vm11, %v520_v26, %v522_v30  ;;  %v524_v35 = vsel %vm512_vm10, %v502_v20, %v505_v24 }
 0x1dc   :  { %v526_v36 = vsel %vm514_vm12, %v508_v10, %v525_v18  ;;  %v612_v37 = vor.u32 %v611_v21, %v610_v15  ;;  %vm619_vm13 = vcmp.lt.s32.totalorder %v6315_v12, 4  ;;  %v519_v40 = vsel %vm513_vm11, %v516_v25, %v518_v33 }
 0x1dd   :  { %v527_v41 = vsel %vm513_vm11, %v524_v35, %v526_v36  ;;  %v6333_v44 = vmul.u32.u64.low %v528_v27, %v523_v34  ;;  %v6334_v45 = vmul.u32.u64.high %v528_v27, %v523_v34, %v6333_v44  ;;  %v600_v47 = vshrl.u32 %v5988_v58, %v599_v14 }
 0x1de   :  { %v6330_v42 = vmul.u32.u64.low %v528_v27, %v527_v41  ;;  %v6331_v43 = vmul.u32.u64.high %v528_v27, %v527_v41, %v6330_v42  ;;  %v601_v49 = vshll.u32 %v5988_v58, %v598_v6  ;;  %v602_v50 = vshrl.u32 %v5989_v60, %v599_v14 }
 0x1df   :  { %v604_v51 = vshll.u32 %v5989_v60, %v598_v6  ;;  %v629_v52 = vsel %vm619_vm13, %v615_v28, 1326507024  ;;  %v605_v54 = vshrl.u32 %v5991_v4, %v599_v14  ;;  %v607_v55 = vshll.u32 %v5991_v4, %v598_v6 }
 0x1e0   :  { %v608_v56 = vshrl.u32 %v5986_v53, %v599_v14  ;;  %v535_v57 = vmul.u32 %v528_v27, %v519_v40  ;;  %v603_v48 = vor.u32 %v602_v50, %v601_v49  ;;  %vm616_vm14 = vcmp.lt.s32.totalorder %v6315_v12, 1 }
 0x1e1   :  { %vm618_vm15 = vcmp.lt.s32.totalorder %v6315_v12, 3  ;;  %v625_v59 = vsel %vm619_vm13, %v612_v37, 920167782  ;;  %vm537_vm2 = vc.u32 %v6331_v43, %v6333_v44  ;;  %v538_v58 = vadd.s32 1, %v6334_v45 }
 0x1e2   :  { %v606_v60 = vor.u32 %v605_v54, %v604_v51  ;;  %v609_v61 = vor.u32 %v608_v56, %v607_v55  ;;  %vm617_vm4 = vcmp.lt.s32.totalorder %v6315_v12, 2  ;;  %v630_v53 = vsel %vm618_vm15, %v612_v37, %v629_v52 }
 0x1e3   :  { %v632_v62 = vshll.u32 %v592_v32, 8  ;;  %v539_v63 = vsel %vm537_vm2, %v538_v58, %v6334_v45  ;;  %v620_v7 = vsel %vm616_vm14, %v600_v47, %v603_v48  ;;  %v536_v35 = vadd.s32 %v6333_v44, %v6331_v43 }
 0x1e4   :  { %v624_v0 = vsel %vm616_vm14, %v603_v48, %v606_v60  ;;  %v540_v3 = vadd.s32 %v539_v63, %v535_v57  ;;  %v621_v4 = vsel %vm619_vm13, %v609_v61, 2102212464  ;;  %v626_v5 = vsel %vm618_vm15, %v609_v61, %v625_v59 }
 0x1e5   :  { %v628_v6 = vsel %vm616_vm14, %v606_v60, %v609_v61  ;;  %v627_v8 = vsel %vm617_vm4, %v624_v0, %v626_v5  ;;  %v622_v11 = vsel %vm618_vm15, %v606_v60, %v621_v4  ;;  %vm482_vm8 = vcmp.lt.s32.totalorder %v6296_v31, 0 }
 0x1e6   :  { %v631_v9 = vsel %vm617_vm4, %v628_v6, %v630_v53  ;;  %v541_v10 = vadd.s32 536870912, %v540_v3  ;;  %v6368_v15 = vmul.u32.u64.low %v632_v62, %v627_v8  ;;  %v6369_v16 = vmul.u32.u64.high %v632_v62, %v627_v8, %v6368_v15 }
 0x1e7   :  { %v6365_v13 = vmul.u32.u64.low %v632_v62, %v631_v9  ;;  %v6366_v14 = vmul.u32.u64.high %v632_v62, %v631_v9, %v6365_v13  ;;  %v623_v18 = vsel %vm617_vm4, %v620_v7, %v622_v11  ;;  %vm481_vm9 = vcmp.le.f32.partialorder %v480_v39, 0.7853982 }
 0x1e8   :  { %v542_v17 = vshrl.u32 %v541_v10, 30  ;;  %v642_v20 = vadd.s32 1, %v6369_v16  ;;  %v639_v23 = vmul.u32 %v632_v62, %v623_v18  ;;  %vm586_vm10 = vcmp.lt.s32.totalorder %v6301_v38, 0 }
 0x1e9   :  { %vm641_vm5 = vc.u32 %v6366_v14, %v6368_v15  ;;  %v640_v43 = vadd.s32 %v6368_v15, %v6366_v14  ;;  %vm585_vm11 = vcmp.le.f32.partialorder %v584_v46, 0.7853982 }
 0x1ea   :  { %v543_v19 = vshll.u32 %v542_v17, 30  ;;  %v643_v24 = vsel %vm641_vm5, %v642_v20, %v6369_v16  ;;  %v566_v48 = vsub.s32 4, %v542_v17  ;;  %vm572_vm5 = vweird.f32 %v6296_v31 }
 0x1eb   :  { %v644_v26 = vadd.s32 %v643_v24, %v639_v23 }
 0x1ec   :  { %v544_v21 = vsub.s32 %v540_v3, %v543_v19  ;;  %v567_v0 = vsel %vm482_vm8, %v566_v48, %v542_v17 }
 0x1ed   :  { %v645_v28 = vadd.s32 536870912, %v644_v26  ;;  %v569_v6 = vsel %vm481_vm9, 0, %v567_v0  ;;  %v5405_v0 = vld [vmem:[%s7031_s9 + $0x30] ss:$8 sps:$4 sm:$0xff]  }
 0x1ee   :  { %v546_v25 = vsub.s32 0, %v544_v21  ;;  %v573_v10 = vadd.s32 3, %v569_v6  ;;  %v781_v14 = vand.u32 3, %v569_v6  ;;  %v4625_v6 = vld [vmem:[%s7032_s16] ss:$0 sm:$0xff] }
 0x1ef   :  { %v646_v30 = vshrl.u32 %v645_v28, 30 }
 0x1f0   :  { %v4610_v27 = vmin.u32 %v546_v25, %v544_v21  ;;  %v574_v16 = vand.u32 3, %v573_v10  ;;  %vm786_vm12 = vcmp.eq.s32.totalorder %v781_v14, 2  ;;  %vm783_vm15 = vcmp.eq.s32.totalorder %v781_v14, 0 }
 0x1f1   :  { %v647_v33 = vshll.u32 %v646_v30, 30  ;;  %v670_v13 = vsub.s32 4, %v646_v30  ;;  %vm782_vm4 = vcmp.lt.s32.totalorder %v781_v14, 2 }
 0x1f2   :  { %v548_v29 = vclz %v4610_v27  ;;  %vm579_vm13 = vcmp.eq.s32.totalorder %v574_v16, 2  ;;  %vm576_vm14 = vcmp.eq.s32.totalorder %v574_v16, 0  ;;  %vm575_vm2 = vcmp.lt.s32.totalorder %v574_v16, 2 }
 0x1f3   :  { %v648_v34 = vsub.s32 %v644_v26, %v647_v33  ;;  %v671_v17 = vsel %vm586_vm10, %v670_v13, %v646_v30 }
 0x1f4   :  { %v4611_v32 = vadd.s32 4294967294, %v548_v29  ;;  %v673_v24 = vsel %vm585_vm11, 0, %v671_v17 }
 0x1f5   :  { %v650_v40 = vsub.s32 0, %v648_v34  ;;  %v677_v30 = vadd.s32 3, %v673_v24 }
 0x1f6   :  { %vm4612_vm6 = vcmp.lt.s32.totalorder %v4611_v32, 0 }
 0x1f7   :  { %v551_v12 = vsel %vm4612_vm6, 0, %v4611_v32  ;;  %v4614_v47 = vmin.u32 %v650_v40, %v648_v34 }
 0x1f8   :  { %v552_v36 = vsub.s32 32, %v551_v12  ;;  %v556_v37 = vsub.s32 4294967266, %v551_v12  ;;  %v553_v41 = vshll.u32 %v544_v21, %v551_v12 }
 0x1f9   :  { %v652_v51 = vclz %v4614_v47 }
 0x1fa   :  { %v554_v42 = vshrl.u32 %v536_v35, %v552_v36  ;;  %v557_v45 = vadd.s32 127, %v556_v37  ;;  %v5396_v36 = vld [vmem:[%s7031_s9] ss:$8 sps:$4 sm:$0xff]   ;;  %v5398_v37 = vld [vmem:[%s7031_s9 + $0x4] ss:$8 sps:$4 sm:$0xff]  }
 0x1fb   :  { %v4615_v54 = vadd.s32 4294967294, %v652_v51  ;;  %1063 = vmatprep.subr.bf16.mxu1 %v5398_v37 }
 0x1fc   :  { %v555_v49 = vor.u32 %v554_v42, %v553_v41  ;;  %v558_v50 = vshll.u32 %v557_v45, 23  ;;  %v5401_v41 = vld [vmem:[%s7031_s9 + $0x14] ss:$8 sps:$4 sm:$0xff]   ;;  %v678_v42 = vand.u32 3, %v677_v30  ;;  %1064 = vmatpush1.bf16.msra.mxu1 %v5396_v36  ;;  %v5399_v45 = vld [vmem:[%s7031_s9 + $0x10] ss:$8 sps:$4 sm:$0xff]  }
 0x1fd   :  { %vm4616_vm7 = vcmp.lt.s32.totalorder %v4615_v54, 0  ;;  %1065 = vmatprep.subr.bf16.mxu1 %v5401_v41 }
 0x1fe   :  { %v559_v52 = vor.u32 4788187, %v558_v50  ;;  %v562_v56 = vcvt.s32.f32 %v555_v49  ;;  %v655_v59 = vsel %vm4616_vm7, 0, %v4615_v54  ;;  %vm683_vm6 = vcmp.eq.s32.totalorder %v678_v42, 2 }
 0x1ff   :  { %v656_v44 = vsub.s32 32, %v655_v59  ;;  %v660_v58 = vsub.s32 4294967266, %v655_v59  ;;  %v657_v61 = vshll.u32 %v648_v34, %v655_v59 }
 0x200   :  { %v560_v55 = vand.u32 2147483647, %v559_v52  ;;  %1066 = vmatpush1.bf16.msra.mxu1 %v5399_v45 }
 0x201   :  { %v658_v53 = vshrl.u32 %v640_v43, %v656_v44  ;;  %v661_v62 = vadd.s32 127, %v660_v58 }
 0x202   :  { %v563_v57 = vmul.f32 %v562_v56, %v560_v55 }
 0x203   :  { %v659_v4 = vor.u32 %v658_v53, %v657_v61  ;;  %v662_v5 = vshll.u32 %v661_v62, 23  ;;  %v5402_v53 = vld [vmem:[%s7031_s9 + $0x20] ss:$8 sps:$4 sm:$0xff]   ;;  %v5404_v62 = vld [vmem:[%s7031_s9 + $0x24] ss:$8 sps:$4 sm:$0xff]  }
 0x204   :  { %v564_v60 = vxor.u32 2147483648, %v563_v57  ;;  %1067 = vmatprep.subr.bf16.mxu1 %v5404_v62 }
 0x205   :  { %v663_v7 = vor.u32 4788187, %v662_v5  ;;  %v666_v9 = vcvt.s32.f32 %v659_v4  ;;  %1068 = vmatpush1.bf16.msra.mxu1 %v5402_v53  ;;  %v6406_v4 = vshrl.u32 %v389_v22, 7 }
 0x206   :  { %v565_v63 = vsel %vm482_vm8, %v564_v60, %v563_v57  ;;  %vm680_vm8 = vcmp.eq.s32.totalorder %v678_v42, 0 }
 0x207   :  { %v568_v3 = vsel %vm481_vm9, %v6296_v31, %v565_v63  ;;  %v664_v8 = vand.u32 2147483647, %v663_v7  ;;  %v884_v31 = vand.u32 3, %v673_v24  ;;  %v5407_v63 = vld [vmem:[%s7031_s9 + $0x34] ss:$8 sps:$4 sm:$0xff]   ;;  %v6411_v13 = vsub.s32 0, %v6406_v4 }
 0x208   :  { %5503 = vcosq.f32 %v568_v3  ;;  %1069 = vmatprep.subr.bf16.mxu1 %v5407_v63 }
 0x209   :  { %5505 = vsinq.f32 %v568_v3  ;;  %v667_v11 = vmul.f32 %v666_v9, %v664_v8  ;;  %vm889_vm7 = vcmp.eq.s32.totalorder %v884_v31, 2  ;;  %vm886_vm9 = vcmp.eq.s32.totalorder %v884_v31, 0  ;;  %1070 = vmatpush1.bf16.msra.mxu1 %v5405_v0 }
 0x20a   :  { %4989 = vmatprep.subr.bf16.mxu1 %v5984_v2  ;;  %v5992_v3 = vmov 1966171168  }
 0x20b   :  { %v668_v15 = vxor.u32 2147483648, %v667_v11 }
 0x20d   :  { %v669_v39 = vsel %vm586_vm10, %v668_v15, %v667_v11  ;;  %vm679_vm10 = vcmp.lt.s32.totalorder %v678_v42, 2  ;;  %v4604_v11 = vld [vmem:[#allocation3] ss:$0 sm:$0xff] }
 0x20e   :  { %v672_v19 = vsel %vm585_vm11, %v6301_v38, %v669_v39  ;;  %vm885_vm11 = vcmp.lt.s32.totalorder %v884_v31, 2 }
 0x20f   :  { %5507 = vcosq.f32 %v672_v19 }
 0x210   :  { %5509 = vsinq.f32 %v672_v19 }
 0x212   :  { %v5504_v18 = vpop.eup %5503 }
 0x213   :  { %v5506_v20 = vpop.eup %5505  ;;  %v580_v21 = vxor.u32 2147483648, %v5504_v18 }
 0x214   :  { %v577_v23 = vxor.u32 2147483648, %v5506_v20 }
 0x215   :  { %v581_v25 = vsel %vm579_vm13, %v580_v21, %v5506_v20  ;;  %v788_v26 = vsel %vm786_vm12, %v580_v21, %v5506_v20  ;;  %vm676_vm12 = vweird.f32 %v6301_v38  ;;  %v965_v38 = vunpack.c.l.s4 %v5992_v3 }
 0x216   :  { %v578_v46 = vsel %vm576_vm14, %v5504_v18, %v577_v23  ;;  %v785_v27 = vsel %vm783_vm15, %v5504_v18, %v577_v23  ;;  %vm902_vm13 = vcmask 261120   ;;  %vm1059_vm14 = vcmask 523264  }
 0x217   :  { %v582_v28 = vsel %vm575_vm2, %v578_v46, %v581_v25  ;;  %v789_v29 = vsel %vm782_vm4, %v785_v27, %v788_v26  ;;  %v966_v5 = vunpack.c.0.s8 %v965_v38  ;;  %vm1113_vm15 = vcmask 130048  }
 0x218   :  { %v6387_v32 = vpop.f32.mrb[0].mxu0  ;;  %v6389_v33 = vsel %vm572_vm5, nan, %v582_v28  ;;  %v790_v12 = vsel %vm572_vm5, nan, %v789_v29  ;;  %vm2023_vm2 = vcmask 392192   ;;  %vm4338_vm4 = vcmask 80896  }
 0x219   :  { %v4963_v34 = vpop.f32.mrb[1].mxu0  ;;  %896 = vrot.lane.b32.xlu0 %v790_v12, %s5966_s5  ;;  %v5508_v47 = vpop.eup %5507  ;;  %v969_v8 = vsub.s32 %v966_v5, %v6406_v4  ;;  %v383_v16 = vadd.f32 %v4604_v11, %v6387_v32  ;;  %vm4258_vm5 = vcmask 517120  }
 0x21a   :  { %v6392_v35 = vpop.f32.mrb[2].mxu0  ;;  %v5510_v49 = vpop.eup %5509  ;;  %v684_v50 = vxor.u32 2147483648, %v5508_v47  ;;  %v6430_v34 = vsub.s32 1, %v6406_v4 }
 0x21b   :  { %v4964_v40 = vpop.f32.mrb[3].mxu0  ;;  %v681_v51 = vxor.u32 2147483648, %v5510_v49  ;;  %v386_v18 = vadd.f32 %v4604_v11, %v6392_v35 }
 0x21c   :  { %v891_v54 = vsel %vm889_vm7, %v684_v50, %v5510_v49  ;;  %v685_v55 = vsel %vm683_vm6, %v684_v50, %v5510_v49  ;;  %vm4499_vm6 = vcmask 41984   ;;  %vm4302_vm7 = vcmask 7168  }
 0x21d   :  { %v888_v57 = vsel %vm886_vm9, %v5508_v47, %v681_v51  ;;  %v682_v48 = vsel %vm680_vm8, %v5508_v47, %v681_v51  ;;  %vm4304_vm8 = vcmask 15360   ;;  %vm4306_vm9 = vcmask 23552  }
 0x21e   :  { %v892_v43 = vsel %vm885_vm11, %v888_v57, %v891_v54  ;;  %v686_v44 = vsel %vm679_vm10, %v682_v48, %v685_v55  ;;  %vm4525_vm10 = vcmask 74752   ;;  %vm4549_vm11 = vcmask 56320  }
 0x21f   :  { %v893_v60 = vsel %vm676_vm12, nan, %v892_v43  ;;  %v687_v61 = vsel %vm676_vm12, nan, %v686_v44  ;;  %vm4551_vm12 = vcmask 89088  }
 0x220   :  { %v955_v52 = vpop.f32.mrb[4].mxu0  ;;  %898 = vrot.lane.b32.xlu1 %v893_v60, %s5966_s5 }
 0x221   :  { %v4975_v56 = vpop.f32.mrb[5].mxu0  ;;  %v956_v7 = vadd.f32 %v4625_v6, %v955_v52 }
 0x222   :  { %v958_v59 = vpop.f32.mrb[6].mxu0 }
 0x223   :  { %v4976_v58 = vpop.f32.mrb[7].mxu0  ;;  %v970_v9 = vrot.slane %v956_v7, %v969_v8 }
 0x225   :  { %v971_v10 = vcombine.high %v970_v9, %v970_v9  ;;  %v978_v14 = vrot.slane %v970_v9, %v969_v8 }
 0x227   :  { %v985_v39 = vrot.slane %v971_v10, %v969_v8  ;;  %v989_v20 = vrot.slane %v978_v14, %v6411_v13 }
 0x229   :  { %v993_v46 = vrot.slane %v985_v39, %v6411_v13 }
 0x28b   :  { %v897_v15 = vpop.permute.xlu0 %896 }
 0x28c   :  { %v903_v23 = vsel %vm902_vm13, %v6389_v33, %v897_v15  ;;  %v1007_v33 = vld [vmem:[#allocation5] sm:$0x3] }
 0x28d   :  { %v1012_v35 = vrot.slane %v1007_v33, %v6411_v13  ;;  %v1016_v36 = vrot.slane %v1007_v33, %v6430_v34 }
 0x292   :  { %v899_v22 = vpop.permute.xlu1 %898 }
 0x293   :  { %v904_v28 = vsel %vm902_vm13, %v687_v61, %v899_v22 }
 0x298   :  { %v449_v17 = vpop.f32.mrb[0].mxu1 }
 0x299   :  { %v456_v19 = vadd.f32 %v449_v17, %v383_v16  ;;  %v4969_v21 = vpop.f32.mrb[1].mxu1 }
 0x29a   :  { %v452_v24 = vpop.f32.mrb[2].mxu1 }
 0x29b   :  { %v961_v25 = vadd.f32 %v903_v23, %v456_v19  ;;  %v457_v26 = vadd.f32 %v452_v24, %v386_v18  ;;  %v4970_v27 = vpop.f32.mrb[3].mxu1 }
 0x29d   :  { %v6420_v29 = vadd.f32 %v989_v20, %v961_v25  ;;  %v962_v30 = vadd.f32 %v904_v28, %v457_v26 }
 0x29f   :  { %v6422_v32 = vadd.f32 %v993_v46, %v962_v30 }
 0x2a1   :  { %v1006_v12 = vpack.c.bf16 %v6422_v32, %v6420_v29 }
 0x2a3   :  { %4635 = vmatmul.mubr.msk.bf16.vlgmr.msra.gmra.mrb[4].mxu1 %vm1059_vm14, %v1006_v12 }
 0x2a4   :  { %4991 = vmatprep.mubr.msk.bf16.mxu1 %vm5985_vm0, %v5984_v2 }
 0x376   :  { %v1097_v37 = vpop.f32.mrb[4].mxu1 }
 0x377   :  { %v1098_v40 = vadd.f32 %v1097_v37, %v1012_v35  ;;  %v1099_v41 = vpop.f32.mrb[5].mxu1 }
 0x378   :  { %v1100_v42 = vadd.f32 %v1099_v41, %v1016_v36  ;;  %v1101_v31 = vpop.f32.mrb[6].mxu1 }
 0x379   :  { %v6434_v45 = vpack.c.bf16 %v1098_v40, %v1098_v40  ;;  %v1102_v47 = vadd.f32 %v1101_v31, %v1012_v35  ;;  %v1103_v49 = vpop.f32.mrb[7].mxu1 }
 0x37a   :  { %v6436_v50 = vpack.c.bf16 %v1100_v42, %v1100_v42  ;;  %v1104_v51 = vadd.f32 %v1103_v49, %v1016_v36 }
 0x37b   :  { %v6438_v52 = vpack.c.bf16 %v1102_v47, %v1102_v47  ;;  %1111 = vrot.lane.b32.xlu0 %v6434_v45, %s5993_s18 }
 0x37c   :  { %v1239_v54 = vsel %vm344_vm1, %v6436_v50, 0  ;;  %v6455_v59 = vpack.c.bf16 %v1104_v51, %v1104_v51 }
 0x37d   :  { %1161 = vrot.lane.b32.xlu1 %v6438_v52, %s5993_s18  ;;  %4990 = vmatpush3.bf16.msra.mxu1 %v1239_v54 }
 0x37e   :  { %5001 = vmatprep.subr.bf16.mxu1 %v5984_v2  ;;  %v1285_v43 = vsel %vm344_vm1, %v6455_v59, 0 }
 0x3ed   :  { %v1112_v55 = vpop.permute.xlu0 %1111 }
 0x3ee   :  { %v1118_v56 = vsel %vm1113_vm15, %v1112_v55, 0 }
 0x3ef   :  { %4978 = vmatpush3.bf16.xpose.msra.mxu0 %v1118_v56  ;;  %v1162_v57 = vpop.permute.xlu1 %1161 }
 0x3f0   :  { %4983 = vmatprep.subr.bf16.mxu0 %v5984_v2  ;;  %v1167_v48 = vsel %vm1113_vm15, %v1162_v57, 0 }
 0x3f6   :  { %4980 = vmatmul.mubr.msk.bf16.vlgmr.msra.gmra.mrb[8].mxu0 %vm1113_vm15, %v6434_v45 }
 0x3f7   :  { %4984 = vmatpush3.bf16.xpose.msra.mxu0 %v1167_v48  ;;  %4985 = vmatprep.mubr.msk.bf16.mxu0 %vm5985_vm0, %v5984_v2 }
 0x3f8   :  { %4995 = vmatprep.subr.bf16.mxu0 %v5984_v2 }
 0x3fe   :  { %4986 = vmatmul.mubr.msk.bf16.vlgmr.msra.gmra.mrb[12].mxu0 %vm1113_vm15, %v6438_v52 }
 0x3ff   :  { %4996 = vmatpush3.bf16.msra.mxu0 %v1285_v43  ;;  %4997 = vmatprep.mubr.msk.bf16.mxu0 %vm5985_vm0, %v5984_v2 }
 0x400   :  { %5007 = vmatprep.subr.bf16.mxu0 %v5984_v2 }
 0x4c9   :  { %v1154_v44 = vpop.f32.mrb[8].mxu0 }
 0x4ca   :  { %v1209_v58 = vmul.f32 0.25, %v1154_v44  ;;  %v4981_v60 = vpop.f32.mrb[9].mxu0 }
 0x4cb   :  { %v1157_v61 = vpop.f32.mrb[10].mxu0 }
 0x4cc   :  { %v4982_v53 = vpop.f32.mrb[11].mxu0  ;;  %v1211_v62 = vsel %vm340_vm3, %v1209_v58, -inf }
 0x4cd   :  { %1212 = vmax.xlane.f32.xlu0 %v1211_v62 }
 0x4d1   :  { %v1203_v63 = vpop.f32.mrb[12].mxu0 }
 0x4d2   :  { %v1210_v0 = vmul.f32 0.25, %v1203_v63  ;;  %v4987_v3 = vpop.f32.mrb[13].mxu0 }
 0x4d3   :  { %v1206_v38 = vpop.f32.mrb[14].mxu0 }
 0x4d4   :  { %v4988_v5 = vpop.f32.mrb[15].mxu0  ;;  %v1214_v6 = vsel %vm340_vm3, %v1210_v0, -inf }
 0x4d5   :  { %1215 = vmax.xlane.f32.xlu1 %v1214_v6 }
 0x4e6   :  { %1329 = vrot.lane.b32.xlu1 %v6434_v45, %s5994_s23 }
 0x4ea   :  { %1327 = vrot.lane.b32.xlu1 %v6434_v45, %s5995_s20 }
 0x4ee   :  { %1377 = vrot.lane.b32.xlu1 %v6438_v52, %s5995_s20 }
 0x55a   :  { %v1213_v7 = vpop.xlane.xlu0 %1212 }
 0x55b   :  { %v1217_v8 = vsub.f32 %v1209_v58, %v1213_v7 }
 0x55d   :  { %v1219_v9 = vmul.f32 1.442695, %v1217_v8 }
 0x55f   :  { %5511 = vpow2.f32 %v1219_v9 }
 0x562   :  { %v1216_v10 = vpop.xlane.xlu1 %1215 }
 0x563   :  { %v1218_v11 = vsub.f32 %v1210_v0, %v1216_v10 }
 0x565   :  { %v1221_v14 = vmul.f32 1.442695, %v1218_v11 }
 0x566   :  { %v1330_v21 = vpop.permute.xlu1 %1329 }
 0x567   :  { %5513 = vpow2.f32 %v1221_v14  ;;  %v1335_v24 = vsel %vm1113_vm15, %v1330_v21, 0 }
 0x569   :  { %v5512_v15 = vpop.eup %5511 }
 0x56a   :  { %v1223_v16 = vsel %vm340_vm3, %v5512_v15, 0.0  ;;  %v1328_v28 = vpop.permute.xlu1 %1327 }
 0x56b   :  { %1224 = vadd.xlane.f32.xlu0 %v1223_v16 }
 0x56e   :  { %v1378_v12 = vpop.permute.xlu1 %1377 }
 0x571   :  { %v5514_v39 = vpop.eup %5513 }
 0x572   :  { %v1226_v17 = vsel %vm340_vm3, %v5514_v39, 0.0 }
 0x573   :  { %1227 = vadd.xlane.f32.xlu0 %v1226_v17 }
 0x589   :  { %1379 = vrot.lane.b32.xlu0 %v6438_v52, %s5994_s23 }
 0x5f8   :  { %v1225_v22 = vpop.xlane.xlu0 %1224 }
 0x5f9   :  { %5515 = vrcp.f32 %v1225_v22 }
 0x600   :  { %v1228_v18 = vpop.xlane.xlu0 %1227 }
 0x601   :  { %5517 = vrcp.f32 %v1228_v18 }
 0x603   :  { %v5516_v19 = vpop.eup %5515 }
 0x604   :  { %v1231_v20 = vmul.f32 %v5516_v19, %v5512_v15  ;;  %v1380_v46 = vpop.permute.xlu0 %1379 }
 0x605   :  { %v1385_v30 = vsel %vm1113_vm15, %v1380_v46, 0 }
 0x606   :  { %v1233_v23 = vpack.c.bf16 %v1231_v20, %v1231_v20 }
 0x608   :  { %4992 = vmatmul.mubr.msk.bf16.vlgmr.msra.gmra.mrb[8].mxu1 %vm340_vm3, %v1233_v23 }
 0x609   :  { %5002 = vmatpush3.bf16.xpose.msra.mxu1 %v1335_v24  ;;  %5003 = vmatprep.mubr.msk.bf16.mxu1 %vm5985_vm0, %v5984_v2 }
 0x60a   :  { %5013 = vmatprep.subr.bf16.mxu1 %v5984_v2 }
 0x60b   :  { %v5518_v25 = vpop.eup %5517 }
 0x60c   :  { %v1232_v26 = vmul.f32 %v5518_v25, %v5514_v39 }
 0x60e   :  { %v1234_v27 = vpack.c.bf16 %v1232_v26, %v1232_v26 }
 0x610   :  { %4998 = vmatmul.mubr.msk.bf16.vlgmr.msra.gmra.mrb[16].mxu0 %vm340_vm3, %v1234_v27  ;;  %5004 = vmatmul.mubr.msk.bf16.vlgmr.msra.gmra.mrb[12].mxu1 %vm1113_vm15, %v1328_v28 }
 0x611   :  { %5008 = vmatpush3.bf16.xpose.msra.mxu0 %v1385_v30  ;;  %5009 = vmatprep.mubr.msk.bf16.mxu0 %vm5985_vm0, %v5984_v2 }
 0x612   :  { %5019 = vmatprep.subr.bf16.mxu0 %v5984_v2  ;;  %5015 = vmatprep.mubr.msk.bf16.mxu1 %vm5985_vm0, %v5984_v2 }
 0x618   :  { %5010 = vmatmul.mubr.msk.bf16.vlgmr.msra.gmra.mrb[20].mxu0 %vm1113_vm15, %v1378_v12 }
 0x619   :  { %5021 = vmatprep.mubr.msk.bf16.mxu0 %vm5985_vm0, %v5984_v2 }
 0x6db   :  { %v6492_v33 = vpop.f32.mrb[8].mxu1 }
 0x6dc   :  { %v4993_v35 = vpop.f32.mrb[9].mxu1 }
 0x6dd   :  { %v1278_v36 = vpop.f32.mrb[10].mxu1 }
 0x6de   :  { %v4994_v37 = vpop.f32.mrb[11].mxu1 }
 0x6e3   :  { %v6494_v40 = vpop.f32.mrb[16].mxu0  ;;  %v1371_v41 = vpop.f32.mrb[12].mxu1 }
 0x6e4   :  { %v1427_v42 = vmul.f32 0.25, %v1371_v41  ;;  %v4999_v31 = vpop.f32.mrb[17].mxu0  ;;  %v5005_v47 = vpop.f32.mrb[13].mxu1 }
 0x6e5   :  { %v1324_v49 = vpop.f32.mrb[18].mxu0  ;;  %v1374_v51 = vpop.f32.mrb[14].mxu1 }
 0x6e6   :  { %v5000_v54 = vpop.f32.mrb[19].mxu0  ;;  %v5006_v55 = vpop.f32.mrb[15].mxu1  ;;  %v1429_v56 = vsel %vm340_vm3, %v1427_v42, -inf }
 0x6e7   :  { %1430 = vmax.xlane.f32.xlu0 %v1429_v56 }
 0x6eb   :  { %v1421_v57 = vpop.f32.mrb[20].mxu0 }
 0x6ec   :  { %v1428_v48 = vmul.f32 0.25, %v1421_v57  ;;  %v5011_v43 = vpop.f32.mrb[21].mxu0 }
 0x6ed   :  { %v1424_v44 = vpop.f32.mrb[22].mxu0 }
 0x6ee   :  { %v5012_v58 = vpop.f32.mrb[23].mxu0  ;;  %v1432_v60 = vsel %vm340_vm3, %v1428_v48, -inf }
 0x6ef   :  { %1433 = vmax.xlane.f32.xlu1 %v1432_v60 }
 0x700   :  { %1454 = vrot.lane.b32.xlu1 %v6436_v50, %s5995_s20 }
 0x704   :  { %1553 = vrot.lane.b32.xlu1 %v6434_v45, %s5966_s5 }
 0x708   :  { %1603 = vrot.lane.b32.xlu1 %v6438_v52, %s5966_s5 }
 0x70c   :  { %1601 = vrot.lane.b32.xlu1 %v6438_v52, %s5996_s26 }
 0x774   :  { %v1431_v61 = vpop.xlane.xlu0 %1430 }
 0x775   :  { %v1435_v53 = vsub.f32 %v1427_v42, %v1431_v61 }
 0x777   :  { %v1437_v62 = vmul.f32 1.442695, %v1435_v53 }
 0x779   :  { %5519 = vpow2.f32 %v1437_v62 }
 0x77c   :  { %v1434_v63 = vpop.xlane.xlu1 %1433 }
 0x77d   :  { %v1436_v0 = vsub.f32 %v1428_v48, %v1434_v63 }
 0x77f   :  { %v1439_v3 = vmul.f32 1.442695, %v1436_v0 }
 0x780   :  { %v1455_v38 = vpop.permute.xlu1 %1454 }
 0x781   :  { %5521 = vpow2.f32 %v1439_v3  ;;  %v1460_v5 = vsel %vm344_vm1, %v1455_v38, 0 }
 0x782   :  { %5014 = vmatpush3.bf16.msra.mxu1 %v1460_v5 }
 0x783   :  { %v5520_v6 = vpop.eup %5519  ;;  %5025 = vmatprep.subr.bf16.mxu1 %v5984_v2 }
 0x784   :  { %v1441_v7 = vsel %vm340_vm3, %v5520_v6, 0.0  ;;  %v1554_v39 = vpop.permute.xlu1 %1553 }
 0x785   :  { %1442 = vadd.xlane.f32.xlu0 %v1441_v7  ;;  %v1559_v18 = vsel %vm1113_vm15, %v1554_v39, 0 }
 0x788   :  { %v1604_v21 = vpop.permute.xlu1 %1603 }
 0x789   :  { %v1609_v25 = vsel %vm1113_vm15, %v1604_v21, 0 }
 0x78b   :  { %v5522_v8 = vpop.eup %5521 }
 0x78c   :  { %v1444_v9 = vsel %vm340_vm3, %v5522_v8, 0.0  ;;  %v1602_v26 = vpop.permute.xlu1 %1601 }
 0x78d   :  { %1445 = vadd.xlane.f32.xlu0 %v1444_v9 }
 0x7a3   :  { %1503 = vrot.lane.b32.xlu0 %v6455_v59, %s5995_s20 }
 0x7a7   :  { %1551 = vrot.lane.b32.xlu0 %v6434_v45, %s5996_s26 }
 0x812   :  { %v1443_v10 = vpop.xlane.xlu0 %1442 }
 0x813   :  { %5523 = vrcp.f32 %v1443_v10 }
 0x81a   :  { %v1446_v11 = vpop.xlane.xlu0 %1445 }
 0x81b   :  { %5525 = vrcp.f32 %v1446_v11 }
 0x81d   :  { %v5524_v14 = vpop.eup %5523 }
 0x81e   :  { %v1504_v15 = vpop.permute.xlu0 %1503  ;;  %v1449_v16 = vmul.f32 %v5524_v14, %v5520_v6 }
 0x81f   :  { %v1509_v17 = vsel %vm344_vm1, %v1504_v15, 0 }
 0x820   :  { %5020 = vmatpush3.bf16.msra.mxu0 %v1509_v17  ;;  %v1451_v22 = vpack.c.bf16 %v1449_v16, %v1449_v16 }
 0x821   :  { %5031 = vmatprep.subr.bf16.mxu0 %v5984_v2 }
 0x822   :  { %5016 = vmatmul.mubr.msk.bf16.vlgmr.msra.gmra.mrb[16].mxu1 %vm340_vm3, %v1451_v22  ;;  %v1552_v24 = vpop.permute.xlu0 %1551 }
 0x823   :  { %5026 = vmatpush3.bf16.xpose.msra.mxu1 %v1559_v18  ;;  %5027 = vmatprep.mubr.msk.bf16.mxu1 %vm5985_vm0, %v5984_v2 }
 0x824   :  { %5037 = vmatprep.subr.bf16.mxu1 %v5984_v2 }
 0x825   :  { %v5526_v19 = vpop.eup %5525 }
 0x826   :  { %v1450_v20 = vmul.f32 %v5526_v19, %v5522_v8 }
 0x828   :  { %v1452_v23 = vpack.c.bf16 %v1450_v20, %v1450_v20 }
 0x82a   :  { %5022 = vmatmul.mubr.msk.bf16.vlgmr.msra.gmra.mrb[24].mxu0 %vm340_vm3, %v1452_v23  ;;  %5028 = vmatmul.mubr.msk.bf16.vlgmr.msra.gmra.mrb[20].mxu1 %vm1113_vm15, %v1552_v24 }
 0x82b   :  { %5032 = vmatpush3.bf16.xpose.msra.mxu0 %v1609_v25  ;;  %5033 = vmatprep.mubr.msk.bf16.mxu0 %vm5985_vm0, %v5984_v2 }
 0x82c   :  { %5043 = vmatprep.subr.bf16.mxu0 %v5984_v2  ;;  %5039 = vmatprep.mubr.msk.bf16.mxu1 %vm5985_vm0, %v5984_v2 }
 0x832   :  { %5034 = vmatmul.mubr.msk.bf16.vlgmr.msra.gmra.mrb[28].mxu0 %vm1113_vm15, %v1602_v26 }
 0x833   :  { %5045 = vmatprep.mubr.msk.bf16.mxu0 %vm5985_vm0, %v5984_v2 }
 0x8f5   :  { %v6532_v46 = vpop.f32.mrb[16].mxu1 }
 0x8f6   :  { %v5017_v27 = vpop.f32.mrb[17].mxu1 }
 0x8f7   :  { %v1499_v28 = vpop.f32.mrb[18].mxu1 }
 0x8f8   :  { %v5018_v30 = vpop.f32.mrb[19].mxu1 }
 0x8fd   :  { %v6534_v12 = vpop.f32.mrb[24].mxu0  ;;  %v1595_v35 = vpop.f32.mrb[20].mxu1 }
 0x8fe   :  { %v5366_v36 = vpack.i.bf16 %v6534_v12, %v6532_v46  ;;  %v1651_v37 = vmul.f32 0.25, %v1595_v35  ;;  %v5023_v41 = vpop.f32.mrb[25].mxu0  ;;  %v5029_v42 = vpop.f32.mrb[21].mxu1 }
 0x8ff   :  { %v1548_v31 = vpop.f32.mrb[26].mxu0  ;;  %v1598_v47 = vpop.f32.mrb[22].mxu1 }
 0x900   :  { %v5024_v49 = vpop.f32.mrb[27].mxu0  ;;  %v5030_v51 = vpop.f32.mrb[23].mxu1  ;;  %v1653_v54 = vsel %vm340_vm3, %v1651_v37, -inf }
 0x901   :  { %1654 = vmax.xlane.f32.xlu0 %v1653_v54 }
 0x905   :  { %v1645_v55 = vpop.f32.mrb[28].mxu0 }
 0x906   :  { %v1652_v56 = vmul.f32 0.25, %v1645_v55  ;;  %v5035_v57 = vpop.f32.mrb[29].mxu0 }
 0x907   :  { %v1648_v48 = vpop.f32.mrb[30].mxu0 }
 0x908   :  { %v5036_v43 = vpop.f32.mrb[31].mxu0  ;;  %v1656_v44 = vsel %vm340_vm3, %v1652_v56, -inf }
 0x909   :  { %1657 = vmax.xlane.f32.xlu1 %v1656_v44 }
 0x91a   :  { %1677 = vrot.lane.b32.xlu1 %v6436_v50, %s5996_s26 }
 0x91e   :  { %1775 = vrot.lane.b32.xlu1 %v6434_v45, %s5970_s22 }
 0x922   :  { %1825 = vrot.lane.b32.xlu1 %v6438_v52, %s5970_s22 }
 0x926   :  { %1823 = vrot.lane.b32.xlu1 %v6438_v52, %s5997_s28 }
 0x98e   :  { %v1655_v58 = vpop.xlane.xlu0 %1654 }
 0x98f   :  { %v1659_v60 = vsub.f32 %v1651_v37, %v1655_v58 }
 0x991   :  { %v1661_v61 = vmul.f32 1.442695, %v1659_v60 }
 0x993   :  { %5527 = vpow2.f32 %v1661_v61 }
 0x996   :  { %v1658_v53 = vpop.xlane.xlu1 %1657 }
 0x997   :  { %v1660_v62 = vsub.f32 %v1652_v56, %v1658_v53 }
 0x999   :  { %v1663_v63 = vmul.f32 1.442695, %v1660_v62 }
 0x99a   :  { %v1678_v0 = vpop.permute.xlu1 %1677 }
 0x99b   :  { %5529 = vpow2.f32 %v1663_v63  ;;  %v1683_v3 = vsel %vm344_vm1, %v1678_v0, 0 }
 0x99c   :  { %5038 = vmatpush3.bf16.msra.mxu1 %v1683_v3 }
 0x99d   :  { %v5528_v38 = vpop.eup %5527  ;;  %5049 = vmatprep.subr.bf16.mxu1 %v5984_v2 }
 0x99e   :  { %v1665_v5 = vsel %vm340_vm3, %v5528_v38, 0.0  ;;  %v1776_v14 = vpop.permute.xlu1 %1775 }
 0x99f   :  { %1666 = vadd.xlane.f32.xlu0 %v1665_v5  ;;  %v1781_v39 = vsel %vm1113_vm15, %v1776_v14, 0  ;;  %v5409_v14 = vld [vmem:[%s7033_s30 + $0x8] sm:$0xff]  }
 0x9a2   :  { %v1826_v22 = vpop.permute.xlu1 %1825 }
 0x9a3   :  { %v1831_v20 = vsel %vm1113_vm15, %v1826_v22, 0 }
 0x9a5   :  { %v5530_v6 = vpop.eup %5529 }
 0x9a6   :  { %v1668_v52 = vsel %vm340_vm3, %v5530_v6, 0.0  ;;  %v1824_v21 = vpop.permute.xlu1 %1823 }
 0x9a7   :  { %1669 = vadd.xlane.f32.xlu0 %v1668_v52 }
 0x9bd   :  { %1725 = vrot.lane.b32.xlu0 %v6455_v59, %s5996_s26 }
 0x9c1   :  { %1773 = vrot.lane.b32.xlu0 %v6434_v45, %s5997_s28 }
 0xa2c   :  { %v1667_v7 = vpop.xlane.xlu0 %1666 }
 0xa2d   :  { %5531 = vrcp.f32 %v1667_v7 }
 0xa34   :  { %v1670_v8 = vpop.xlane.xlu0 %1669 }
 0xa35   :  { %5533 = vrcp.f32 %v1670_v8 }
 0xa37   :  { %v5532_v9 = vpop.eup %5531 }
 0xa38   :  { %v1673_v10 = vmul.f32 %v5532_v9, %v5528_v38  ;;  %v1726_v11 = vpop.permute.xlu0 %1725 }
 0xa39   :  { %v1731_v15 = vsel %vm344_vm1, %v1726_v11, 0  ;;  %v5408_v11 = vld [vmem:[%s7033_s30] sm:$0xff]  }
 0xa3a   :  { %5044 = vmatpush3.bf16.msra.mxu0 %v1731_v15  ;;  %v1675_v16 = vpack.c.bf16 %v1673_v10, %v1673_v10  ;;  %v5410_v15 = vld [vmem:[%s7033_s30 + $0x10] sm:$0xff]  }
 0xa3b   :  { %5055 = vmatprep.subr.bf16.mxu0 %v5984_v2 }
 0xa3c   :  { %5040 = vmatmul.mubr.msk.bf16.vlgmr.msra.gmra.mrb[24].mxu1 %vm340_vm3, %v1675_v16  ;;  %v1774_v19 = vpop.permute.xlu0 %1773 }
 0xa3d   :  { %5050 = vmatpush3.bf16.xpose.msra.mxu1 %v1781_v39  ;;  %5051 = vmatprep.mubr.msk.bf16.mxu1 %vm5985_vm0, %v5984_v2 }
 0xa3e   :  { %5061 = vmatprep.subr.bf16.mxu1 %v5984_v2 }
 0xa3f   :  { %v5534_v45 = vpop.eup %5533 }
 0xa40   :  { %v1674_v17 = vmul.f32 %v5534_v45, %v5530_v6  ;;  %v5411_v45 = vld [vmem:[%s7033_s30 + $0x18] sm:$0xff]  }
 0xa42   :  { %v1676_v18 = vpack.c.bf16 %v1674_v17, %v1674_v17 }
 0xa44   :  { %5046 = vmatmul.mubr.msk.bf16.vlgmr.msra.gmra.mrb[32].mxu0 %vm340_vm3, %v1676_v18  ;;  %5052 = vmatmul.mubr.msk.bf16.vlgmr.msra.gmra.mrb[28].mxu1 %vm1113_vm15, %v1774_v19 }
 0xa45   :  { %5056 = vmatpush3.bf16.xpose.msra.mxu0 %v1831_v20  ;;  %5057 = vmatprep.mubr.msk.bf16.mxu0 %vm5985_vm0, %v5984_v2 }
 0xa46   :  { %5067 = vmatprep.subr.bf16.mxu0 %v5984_v2  ;;  %5063 = vmatprep.mubr.msk.bf16.mxu1 %vm5985_vm0, %v5984_v2 }
 0xa4c   :  { %5058 = vmatmul.mubr.msk.bf16.vlgmr.msra.gmra.mrb[36].mxu0 %vm1113_vm15, %v1824_v21 }
 0xa4d   :  { %5069 = vmatprep.mubr.msk.bf16.mxu0 %vm5985_vm0, %v5984_v2 }
 0xb0f   :  { %v1719_v23 = vpop.f32.mrb[24].mxu1 }
 0xb10   :  { %v5041_v24 = vpop.f32.mrb[25].mxu1 }
 0xb11   :  { %v1722_v25 = vpop.f32.mrb[26].mxu1 }
 0xb12   :  { %v5042_v26 = vpop.f32.mrb[27].mxu1 }
 0xb17   :  { %v1767_v27 = vpop.f32.mrb[32].mxu0  ;;  %v1817_v28 = vpop.f32.mrb[28].mxu1 }
 0xb18   :  { %v5371_v30 = vpack.i.bf16 %v1767_v27, %v1719_v23  ;;  %v1873_v35 = vmul.f32 0.25, %v1817_v28  ;;  %v5047_v37 = vpop.f32.mrb[33].mxu0  ;;  %v5053_v41 = vpop.f32.mrb[29].mxu1 }
 0xb19   :  { %v1770_v42 = vpop.f32.mrb[34].mxu0  ;;  %v1820_v31 = vpop.f32.mrb[30].mxu1 }
 0xb1a   :  { %v5048_v47 = vpop.f32.mrb[35].mxu0  ;;  %v5054_v49 = vpop.f32.mrb[31].mxu1  ;;  %v1875_v51 = vsel %vm340_vm3, %v1873_v35, -inf }
 0xb1b   :  { %1876 = vmax.xlane.f32.xlu0 %v1875_v51 }
 0xb1f   :  { %v1867_v54 = vpop.f32.mrb[36].mxu0 }
 0xb20   :  { %v1874_v55 = vmul.f32 0.25, %v1867_v54  ;;  %v5059_v56 = vpop.f32.mrb[37].mxu0 }
 0xb21   :  { %v1870_v57 = vpop.f32.mrb[38].mxu0 }
 0xb22   :  { %v5060_v48 = vpop.f32.mrb[39].mxu0  ;;  %v1878_v43 = vsel %vm340_vm3, %v1874_v55, -inf }
 0xb23   :  { %1879 = vmax.xlane.f32.xlu1 %v1878_v43 }
 0xb34   :  { %1899 = vrot.lane.b32.xlu1 %v6436_v50, %s5997_s28 }
 0xb38   :  { %5367 = vrot.lane.b32.xlu1 %v5366_v36, %s5970_s22 }
 0xb3c   :  { %5372 = vrot.lane.b32.xlu1 %v5371_v30, %s5966_s5 }
 0xba8   :  { %v1877_v44 = vpop.xlane.xlu0 %1876 }
 0xba9   :  { %v1881_v58 = vsub.f32 %v1873_v35, %v1877_v44 }
 0xbab   :  { %v1883_v60 = vmul.f32 1.442695, %v1881_v58 }
 0xbad   :  { %5535 = vpow2.f32 %v1883_v60 }
 0xbb0   :  { %v1880_v61 = vpop.xlane.xlu1 %1879 }
 0xbb1   :  { %v1882_v53 = vsub.f32 %v1874_v55, %v1880_v61 }
 0xbb3   :  { %v1885_v62 = vmul.f32 1.442695, %v1882_v53 }
 0xbb4   :  { %v1900_v63 = vpop.permute.xlu1 %1899 }
 0xbb5   :  { %5537 = vpow2.f32 %v1885_v62  ;;  %v1905_v0 = vsel %vm344_vm1, %v1900_v63, 0 }
 0xbb6   :  { %5062 = vmatpush3.bf16.msra.mxu1 %v1905_v0 }
 0xbb7   :  { %v5536_v50 = vpop.eup %5535  ;;  %5073 = vmatprep.subr.bf16.mxu1 %v5984_v2 }
 0xbb8   :  { %v1887_v46 = vsel %vm340_vm3, %v5536_v50, 0.0  ;;  %v5368_v24 = vpop.permute.xlu1 %5367 }
 0xbb9   :  { %1888 = vadd.xlane.f32.xlu0 %v1887_v46  ;;  %v5370_v26 = vunpack.i.h.bf16 %v5368_v24  ;;  %v5369_v27 = vunpack.i.l.bf16 %v5368_v24  ;;  %v5417_v24 = vld [vmem:[%s7035_s12 + $0x8] sm:$0xff]  }
 0xbbb   :  { %v2020_v37 = vsel %vm1113_vm15, %v6494_v40, %v5370_v26  ;;  %v2019_v41 = vsel %vm1113_vm15, %v6492_v33, %v5369_v27  ;;  %v4652_v40 = vld [vmem:[#allocation7] ss:$0 sm:$0xff]  ;;  %v5419_v26 = vld [vmem:[%s7035_s12 + $0x18] sm:$0xff]  }
 0xbbc   :  { %v5373_v25 = vpop.permute.xlu1 %5372  ;;  %v5420_v27 = vld [vmem:[%s7035_s12 + $0x20] sm:$0xff]  }
 0xbbd   :  { %v5375_v28 = vunpack.i.h.bf16 %v5373_v25  ;;  %v5374_v30 = vunpack.i.l.bf16 %v5373_v25  ;;  %v5418_v25 = vld [vmem:[%s7035_s12 + $0x10] sm:$0xff]  }
 0xbbf   :  { %v5538_v12 = vpop.eup %5537  ;;  %v2021_v47 = vsel %vm902_vm13, %v2019_v41, %v5374_v30  ;;  %v2022_v49 = vsel %vm902_vm13, %v2020_v37, %v5375_v28  ;;  %v5421_v28 = vld [vmem:[%s7035_s12 + $0x28] sm:$0xff]   ;;  %v5422_v30 = vld [vmem:[%s7035_s12 + $0x30] sm:$0xff]  }
 0xbc0   :  { %v1890_v36 = vsel %vm340_vm3, %v5538_v12, 0.0  ;;  %v4660_v37 = vld [vmem:[#allocation13] ss:$0 sm:$0xff] }
 0xbc1   :  { %1891 = vadd.xlane.f32.xlu0 %v1890_v36 }
 0xbd7   :  { %1947 = vrot.lane.b32.xlu0 %v6455_v59, %s5997_s28 }
 0xc46   :  { %v1889_v3 = vpop.xlane.xlu0 %1888 }
 0xc47   :  { %5539 = vrcp.f32 %v1889_v3 }
 0xc4e   :  { %v1892_v38 = vpop.xlane.xlu0 %1891 }
 0xc4f   :  { %5541 = vrcp.f32 %v1892_v38  ;;  %v5412_v38 = vld [vmem:[%s7034_s17] sm:$0xff]  }
 0xc51   :  { %v5540_v5 = vpop.eup %5539 }
 0xc52   :  { %v1895_v6 = vmul.f32 %v5540_v5, %v5536_v50  ;;  %v1948_v52 = vpop.permute.xlu0 %1947  ;;  %v5413_v5 = vld [vmem:[%s7034_s17 + $0x8] sm:$0xff]  }
 0xc53   :  { %v1953_v7 = vsel %vm344_vm1, %v1948_v52, 0  ;;  %v5415_v52 = vld [vmem:[%s7034_s17 + $0x18] sm:$0xff]  }
 0xc54   :  { %5068 = vmatpush3.bf16.msra.mxu0 %v1953_v7  ;;  %v1897_v8 = vpack.c.bf16 %v1895_v6, %v1895_v6  ;;  %v5414_v6 = vld [vmem:[%s7034_s17 + $0x10] sm:$0xff]  }
 0xc56   :  { %5064 = vmatmul.mubr.msk.bf16.vlgmr.msra.gmra.mrb[32].mxu1 %vm340_vm3, %v1897_v8 }
 0xc57   :  { %5081 = vmatprep.mubr.msk.bf16.mxu1 %vm5985_vm0, %v5984_v2  ;;  %5074 = vmatpush3.bf16.msra.mxu1 %v5408_v11 }
 0xc58   :  { %5075 = vmatprep.subr.bf16.mxu1 %v5984_v2 }
 0xc59   :  { %v5542_v59 = vpop.eup %5541 }
 0xc5a   :  { %v1896_v9 = vmul.f32 %v5542_v59, %v5538_v12 }
 0xc5b   :  { %5076 = vmatpush3.bf16.msra.mxu1 %v5409_v14 }
 0xc5c   :  { %v1898_v10 = vpack.c.bf16 %v1896_v9, %v1896_v9  ;;  %5077 = vmatprep.subr.bf16.mxu1 %v5984_v2 }
 0xc5e   :  { %5070 = vmatmul.mubr.msk.bf16.vlgmr.msra.gmra.mrb[40].mxu0 %vm340_vm3, %v1898_v10 }
 0xc5f   :  { %2500 = vmatprep.mubr.bf16.mxu0 %v5983_v1  ;;  %5078 = vmatpush3.bf16.msra.mxu1 %v5410_v15  ;;  %v4658_v15 = vld [vmem:[#allocation8] ss:$0 sm:$0xff] }
 0xc60   :  { %5079 = vmatprep.subr.bf16.mxu1 %v5984_v2 }
 0xc63   :  { %5080 = vmatpush3.bf16.msra.mxu1 %v5411_v45 }
 0xc64   :  { %5085 = vmatprep.subr.bf16.mxu1 %v5984_v2 }
 0xd29   :  { %v1941_v16 = vpop.f32.mrb[32].mxu1 }
 0xd2a   :  { %v5065_v39 = vpop.f32.mrb[33].mxu1 }
 0xd2b   :  { %v1944_v17 = vpop.f32.mrb[34].mxu1 }
 0xd2c   :  { %v5066_v22 = vpop.f32.mrb[35].mxu1 }
 0xd2d   :  { %v4659_v22 = vld [vmem:[#allocation10] ss:$0 sm:$0xff] }
 0xd31   :  { %v1989_v18 = vpop.f32.mrb[40].mxu0 }
 0xd32   :  { %v5376_v19 = vpack.i.bf16 %v1989_v18, %v1941_v16  ;;  %v5071_v20 = vpop.f32.mrb[41].mxu0 }
 0xd33   :  { %v1992_v21 = vpop.f32.mrb[42].mxu0 }
 0xd34   :  { %5377 = vrot.lane.b32.xlu0 %v5376_v19, %s5994_s23  ;;  %v5072_v23 = vpop.f32.mrb[43].mxu0  ;;  %v5416_v21 = vld [vmem:[%s7035_s12] sm:$0xff]  }
 0xda6   :  { %v5378_v35 = vpop.permute.xlu0 %5377 }
 0xda7   :  { %v5380_v42 = vunpack.i.h.bf16 %v5378_v35  ;;  %v5379_v31 = vunpack.i.l.bf16 %v5378_v35  ;;  %v5423_v35 = vld [vmem:[%s7035_s12 + $0x38] sm:$0xff]  }
 0xda9   :  { %v2025_v51 = vsel %vm2023_vm2, %v2022_v49, %v5380_v42  ;;  %v2024_v54 = vsel %vm2023_vm2, %v2021_v47, %v5379_v31 }
 0xdaa   :  { %v2034_v55 = vpack.c.bf16 %v2025_v51, %v2024_v54 }
 0xdac   :  { %5082 = vmatmul.mubr.msk.bf16.vlgmr.msra.gmra.mrb[36].mxu1 %vm1059_vm14, %v2034_v55 }
 0xdad   :  { %5093 = vmatprep.mubr.msk.bf16.mxu1 %vm5985_vm0, %v5984_v2  ;;  %5086 = vmatpush3.bf16.msra.mxu1 %v5412_v38 }
 0xdae   :  { %5087 = vmatprep.subr.bf16.mxu1 %v5984_v2 }
 0xdb1   :  { %5088 = vmatpush3.bf16.msra.mxu1 %v5413_v5  ;;  %v5426_v5 = vld [vmem:[%s7031_s9 + $0x44] ss:$8 sps:$4 sm:$0xff]  }
 0xdb2   :  { %5089 = vmatprep.subr.bf16.mxu1 %v5984_v2  ;;  %2468 = vmatprep.subr.bf16.mxu0 %v5426_v5 }
 0xdb5   :  { %5090 = vmatpush3.bf16.msra.mxu1 %v5414_v6  ;;  %v5424_v6 = vld [vmem:[%s7031_s9 + $0x40] ss:$8 sps:$4 sm:$0xff]  }
 0xdb6   :  { %5091 = vmatprep.subr.bf16.mxu1 %v5984_v2  ;;  %2469 = vmatpush1.bf16.msra.mxu0 %v5424_v6 }
 0xdb9   :  { %5092 = vmatpush3.bf16.msra.mxu1 %v5415_v52  ;;  %v5429_v52 = vld [vmem:[%s7031_s9 + $0x54] ss:$8 sps:$4 sm:$0xff]  }
 0xdba   :  { %5097 = vmatprep.subr.bf16.mxu1 %v5984_v2  ;;  %2470 = vmatprep.subr.bf16.mxu0 %v5429_v52 }
 0xe7f   :  { %v2103_v56 = vpop.f32.mrb[36].mxu1 }
 0xe80   :  { %v2104_v57 = vadd.f32 %v4652_v40, %v2103_v56  ;;  %v5083_v33 = vpop.f32.mrb[37].mxu1  ;;  %v4666_v56 = vld [vmem:[#allocation14] ss:$0 sm:$0xff] }
 0xe81   :  { %v2106_v48 = vpop.f32.mrb[38].mxu1 }
 0xe82   :  { %v2107_v43 = vadd.f32 %v4652_v40, %v2106_v48  ;;  %v5084_v44 = vpop.f32.mrb[39].mxu1  ;;  %v2110_v58 = vadd.f32 %v2104_v57, %v6420_v29 }
 0xe84   :  { %v2114_v60 = vsel %vm1059_vm14, %v2110_v58, 0.0  ;;  %v2111_v61 = vadd.f32 %v2107_v43, %v6422_v32 }
 0xe85   :  { %2115 = vadd.xlane.f32.xlu1 %v2114_v60 }
 0xe86   :  { %v2117_v53 = vsel %vm1059_vm14, %v2111_v61, 0.0 }
 0xe87   :  { %2118 = vadd.xlane.f32.xlu0 %v2117_v53 }
 0xf12   :  { %v2116_v62 = vpop.xlane.xlu1 %2115 }
 0xf13   :  { %v2121_v63 = vmul.f32 0.015625, %v2116_v62 }
 0xf14   :  { %v2119_v0 = vpop.xlane.xlu0 %2118 }
 0xf15   :  { %v2123_v50 = vsub.f32 %v2110_v58, %v2121_v63  ;;  %v2122_v46 = vmul.f32 0.015625, %v2119_v0 }
 0xf17   :  { %v2124_v12 = vsub.f32 %v2111_v61, %v2122_v46  ;;  %v2125_v36 = vmul.f32 %v2123_v50, %v2123_v50 }
 0xf19   :  { %v2127_v29 = vsel %vm1059_vm14, %v2125_v36, 0.0  ;;  %v2126_v3 = vmul.f32 %v2124_v12, %v2124_v12 }
 0xf1a   :  { %2128 = vadd.xlane.f32.xlu0 %v2127_v29 }
 0xf1b   :  { %v2130_v32 = vsel %vm1059_vm14, %v2126_v3, 0.0 }
 0xf1c   :  { %2131 = vadd.xlane.f32.xlu1 %v2130_v32 }
 0xfa7   :  { %v2129_v7 = vpop.xlane.xlu0 %2128 }
 0xfa8   :  { %v2133_v8 = vmul.f32 0.015625, %v2129_v7  ;;  %v5427_v7 = vld [vmem:[%s7031_s9 + $0x50] ss:$8 sps:$4 sm:$0xff]  }
 0xfa9   :  { %v2132_v59 = vpop.xlane.xlu1 %2131  ;;  %2471 = vmatpush1.bf16.msra.mxu0 %v5427_v7 }
 0xfaa   :  { %v2135_v9 = vadd.f32 1e-05, %v2133_v8  ;;  %v2134_v10 = vmul.f32 0.015625, %v2132_v59  ;;  %v5432_v8 = vld [vmem:[%s7031_s9 + $0x64] ss:$8 sps:$4 sm:$0xff]  }
 0xfab   :  { %v5430_v59 = vld [vmem:[%s7031_s9 + $0x60] ss:$8 sps:$4 sm:$0xff]   ;;  %2472 = vmatprep.subr.bf16.mxu0 %v5432_v8 }
 0xfac   :  { %5543 = vrsqrt.f32 %v2135_v9  ;;  %v2136_v11 = vadd.f32 1e-05, %v2134_v10  ;;  %v5435_v9 = vld [vmem:[%s7031_s9 + $0x74] ss:$8 sps:$4 sm:$0xff]   ;;  %v5433_v10 = vld [vmem:[%s7031_s9 + $0x70] ss:$8 sps:$4 sm:$0xff]  }
 0xfad   :  { %2473 = vmatpush1.bf16.msra.mxu0 %v5430_v59 }
 0xfae   :  { %5545 = vrsqrt.f32 %v2136_v11  ;;  %2474 = vmatprep.subr.bf16.mxu0 %v5435_v9 }
 0xfb1   :  { %2475 = vmatpush1.bf16.msra.mxu0 %v5433_v10 }
 0xfb2   :  { %5117 = vmatprep.subr.bf16.mxu0 %v5984_v2 }
 0xfb6   :  { %v5544_v14 = vpop.eup %5543 }
 0xfb7   :  { %v2139_v16 = vmul.f32 %v5544_v14, %v2123_v50 }
 0xfb8   :  { %v5546_v39 = vpop.eup %5545 }
 0xfb9   :  { %v2147_v45 = vmul.f32 %v4658_v15, %v2139_v16  ;;  %v2140_v17 = vmul.f32 %v5546_v39, %v2124_v12 }
 0xfbb   :  { %v2148_v18 = vmul.f32 %v4658_v15, %v2140_v17  ;;  %v2155_v19 = vadd.f32 %v4659_v22, %v2147_v45 }
 0xfbd   :  { %v2156_v20 = vadd.f32 %v4659_v22, %v2148_v18  ;;  %v4675_v22 = vld [vmem:[%s7036_s1] ss:$0 sm:$0xff] }
 0xfbf   :  { %v2165_v23 = vpack.c.bf16 %v2156_v20, %v2155_v19 }
 0xfc1   :  { %5094 = vmatmul.mubr.msk.bf16.vlgmr.msra.gmra.mrb[40].mxu1 %vm1059_vm14, %v2165_v23  ;;  %v4676_v23 = vld [vmem:[#allocation11] ss:$0 sm:$0xff] }
 0xfc2   :  { %5098 = vmatpush3.bf16.msra.mxu1 %v5416_v21  ;;  %5113 = vmatprep.mubr.msk.bf16.mxu1 %vm5985_vm0, %v5984_v2 }
 0xfc3   :  { %5099 = vmatprep.subr.bf16.mxu1 %v5984_v2 }
 0xfc6   :  { %5100 = vmatpush3.bf16.msra.mxu1 %v5417_v24 }
 0xfc7   :  { %5101 = vmatprep.subr.bf16.mxu1 %v5984_v2 }
 0xfca   :  { %5102 = vmatpush3.bf16.msra.mxu1 %v5418_v25 }
 0xfcb   :  { %5103 = vmatprep.subr.bf16.mxu1 %v5984_v2 }
 0xfce   :  { %5104 = vmatpush3.bf16.msra.mxu1 %v5419_v26 }
 0xfcf   :  { %5105 = vmatprep.subr.bf16.mxu1 %v5984_v2 }
 0xfd2   :  { %5106 = vmatpush3.bf16.msra.mxu1 %v5420_v27 }
 0xfd3   :  { %5107 = vmatprep.subr.bf16.mxu1 %v5984_v2 }
 0xfd6   :  { %5108 = vmatpush3.bf16.msra.mxu1 %v5421_v28  ;;  %v2413_v28 = vld [vmem:[#allocation5 + $0x2] sm:$0x3] }
 0xfd7   :  { %5109 = vmatprep.subr.bf16.mxu1 %v5984_v2 }
 0xfda   :  { %5110 = vmatpush3.bf16.msra.mxu1 %v5422_v30  ;;  %v2418_v30 = vrot.slane %v2413_v28, %v6411_v13 }
 0xfdb   :  { %5111 = vmatprep.subr.bf16.mxu1 %v5984_v2 }
 0xfde   :  { %5112 = vmatpush3.bf16.msra.mxu1 %v5423_v35  ;;  %v2422_v35 = vrot.slane %v2413_v28, %v6430_v34 }
 0xfdf   :  { %5129 = vmatprep.subr.bf16.mxu1 %v5984_v2 }
0x1094   :  { %v2234_v41 = vpop.f32.mrb[40].mxu1 }
0x1095   :  { %v2235_v42 = vadd.f32 %v4660_v37, %v2234_v41  ;;  %v5095_v31 = vpop.f32.mrb[41].mxu1 }
0x1096   :  { %v2237_v47 = vpop.f32.mrb[42].mxu1 }
0x1097   :  { %v2238_v49 = vadd.f32 %v4660_v37, %v2237_v47  ;;  %v5096_v51 = vpop.f32.mrb[43].mxu1  ;;  %v2241_v54 = vmax.f32 %v2235_v42, 0.0 }
0x1099   :  { %v2242_v55 = vmax.f32 %v2238_v49, 0.0 }
0x109b   :  { %v2259_v40 = vpack.c.bf16 %v2242_v55, %v2241_v54 }
0x109d   :  { %5114 = vmatmul.mubr.bf16.vlgmr.msra.gmra.mrb[44].mxu1 %v2259_v40 }
0x109e   :  { %5131 = vmatprep.mubr.msk.bf16.mxu1 %vm5985_vm0, %v5984_v2 }
0x1170   :  { %v2349_v57 = vpop.f32.mrb[44].mxu1 }
0x1171   :  { %v2350_v33 = vadd.f32 %v4666_v56, %v2349_v57  ;;  %v5115_v48 = vpop.f32.mrb[45].mxu1 }
0x1172   :  { %v2352_v43 = vpop.f32.mrb[46].mxu1 }
0x1173   :  { %v2353_v44 = vadd.f32 %v4666_v56, %v2352_v43  ;;  %v5116_v58 = vpop.f32.mrb[47].mxu1  ;;  %v2356_v60 = vadd.f32 %v2350_v33, %v2155_v19 }
0x1175   :  { %v2360_v61 = vsel %vm1059_vm14, %v2356_v60, 0.0  ;;  %v2357_v53 = vadd.f32 %v2353_v44, %v2156_v20 }
0x1176   :  { %2361 = vadd.xlane.f32.xlu0 %v2360_v61 }
0x1177   :  { %v2363_v62 = vsel %vm1059_vm14, %v2357_v53, 0.0 }
0x1178   :  { %2364 = vadd.xlane.f32.xlu1 %v2363_v62 }
0x1203   :  { %v2362_v63 = vpop.xlane.xlu0 %2361 }
0x1204   :  { %v2366_v0 = vmul.f32 0.015625, %v2362_v63 }
0x1205   :  { %v2365_v50 = vpop.xlane.xlu1 %2364 }
0x1206   :  { %v2368_v46 = vsub.f32 %v2356_v60, %v2366_v0  ;;  %v2367_v12 = vmul.f32 0.015625, %v2365_v50 }
0x1208   :  { %v2369_v36 = vsub.f32 %v2357_v53, %v2367_v12  ;;  %v2370_v29 = vmul.f32 %v2368_v46, %v2368_v46 }
0x120a   :  { %v2372_v3 = vsel %vm1059_vm14, %v2370_v29, 0.0  ;;  %v2371_v32 = vmul.f32 %v2369_v36, %v2369_v36 }
0x120b   :  { %2373 = vadd.xlane.f32.xlu0 %v2372_v3 }
0x120c   :  { %v2375_v38 = vsel %vm1059_vm14, %v2371_v32, 0.0 }
0x120d   :  { %2376 = vadd.xlane.f32.xlu1 %v2375_v38 }
0x1298   :  { %v2374_v11 = vpop.xlane.xlu0 %2373 }
0x1299   :  { %v2378_v14 = vmul.f32 0.015625, %v2374_v11 }
0x129a   :  { %v2377_v15 = vpop.xlane.xlu1 %2376 }
0x129b   :  { %v2380_v16 = vadd.f32 1e-05, %v2378_v14  ;;  %v2379_v39 = vmul.f32 0.015625, %v2377_v15 }
0x129d   :  { %5547 = vrsqrt.f32 %v2380_v16  ;;  %v2381_v45 = vadd.f32 1e-05, %v2379_v39 }
0x129f   :  { %5549 = vrsqrt.f32 %v2381_v45 }
0x12a7   :  { %v5548_v17 = vpop.eup %5547 }
0x12a8   :  { %v2384_v18 = vmul.f32 %v5548_v17, %v2368_v46 }
0x12a9   :  { %v5550_v19 = vpop.eup %5549 }
0x12aa   :  { %v2392_v20 = vmul.f32 %v4675_v22, %v2384_v18  ;;  %v2385_v21 = vmul.f32 %v5550_v19, %v2369_v36 }
0x12ac   :  { %v2393_v24 = vmul.f32 %v4675_v22, %v2385_v21  ;;  %v6664_v25 = vadd.f32 %v4676_v23, %v2392_v20 }
0x12ae   :  { %v6666_v26 = vadd.f32 %v4676_v23, %v2393_v24 }
0x12b0   :  { %v2411_v27 = vpack.c.bf16 %v6666_v26, %v6664_v25 }
0x12b2   :  { %4693 = vmatmul.mubr.msk.bf16.vlgmr.msra.gmra.mrb[44].mxu0 %vm1059_vm14, %v2411_v27 }
0x12b3   :  { %5119 = vmatprep.mubr.msk.bf16.mxu0 %vm5985_vm0, %v5984_v2 }
0x1385   :  { %v2502_v37 = vpop.f32.mrb[44].mxu0 }
0x1386   :  { %v2503_v41 = vadd.f32 %v2502_v37, %v2418_v30  ;;  %v2504_v42 = vpop.f32.mrb[45].mxu0 }
0x1387   :  { %v2505_v31 = vadd.f32 %v2504_v42, %v2422_v35  ;;  %v2506_v47 = vpop.f32.mrb[46].mxu0 }
0x1388   :  { %v6675_v49 = vpack.c.bf16 %v2503_v41, %v2503_v41  ;;  %v2507_v51 = vadd.f32 %v2506_v47, %v2418_v30  ;;  %v2508_v54 = vpop.f32.mrb[47].mxu0 }
0x1389   :  { %v6677_v55 = vpack.c.bf16 %v2505_v31, %v2505_v31  ;;  %v2509_v40 = vadd.f32 %v2508_v54, %v2422_v35 }
0x138a   :  { %v6679_v56 = vpack.c.bf16 %v2507_v51, %v2507_v51  ;;  %2516 = vrot.lane.b32.xlu0 %v6675_v49, %s5993_s18 }
0x138b   :  { %v2643_v57 = vsel %vm344_vm1, %v6677_v55, 0  ;;  %v6696_v58 = vpack.c.bf16 %v2509_v40, %v2509_v40 }
0x138c   :  { %2565 = vrot.lane.b32.xlu1 %v6679_v56, %s5993_s18  ;;  %5130 = vmatpush3.bf16.msra.mxu1 %v2643_v57 }
0x138d   :  { %5141 = vmatprep.subr.bf16.mxu1 %v5984_v2  ;;  %v2689_v60 = vsel %vm344_vm1, %v6696_v58, 0 }
0x13fc   :  { %v2517_v33 = vpop.permute.xlu0 %2516 }
0x13fd   :  { %v2522_v48 = vsel %vm1113_vm15, %v2517_v33, 0 }
0x13fe   :  { %5118 = vmatpush3.bf16.xpose.msra.mxu0 %v2522_v48  ;;  %v2566_v43 = vpop.permute.xlu1 %2565 }
0x13ff   :  { %5123 = vmatprep.subr.bf16.mxu0 %v5984_v2  ;;  %v2571_v44 = vsel %vm1113_vm15, %v2566_v43, 0 }
0x1405   :  { %5120 = vmatmul.mubr.msk.bf16.vlgmr.msra.gmra.mrb[48].mxu0 %vm1113_vm15, %v6675_v49 }
0x1406   :  { %5124 = vmatpush3.bf16.xpose.msra.mxu0 %v2571_v44  ;;  %5125 = vmatprep.mubr.msk.bf16.mxu0 %vm5985_vm0, %v5984_v2 }
0x1407   :  { %5135 = vmatprep.subr.bf16.mxu0 %v5984_v2 }
0x140d   :  { %5126 = vmatmul.mubr.msk.bf16.vlgmr.msra.gmra.mrb[52].mxu0 %vm1113_vm15, %v6679_v56 }
0x140e   :  { %5136 = vmatpush3.bf16.msra.mxu0 %v2689_v60  ;;  %5137 = vmatprep.mubr.msk.bf16.mxu0 %vm5985_vm0, %v5984_v2 }
0x140f   :  { %5147 = vmatprep.subr.bf16.mxu0 %v5984_v2 }
0x14d8   :  { %v2558_v61 = vpop.f32.mrb[48].mxu0 }
0x14d9   :  { %v2613_v53 = vmul.f32 0.25, %v2558_v61  ;;  %v5121_v62 = vpop.f32.mrb[49].mxu0 }
0x14da   :  { %v2561_v63 = vpop.f32.mrb[50].mxu0 }
0x14db   :  { %v5122_v0 = vpop.f32.mrb[51].mxu0  ;;  %v2615_v50 = vsel %vm340_vm3, %v2613_v53, -inf }
0x14dc   :  { %2616 = vmax.xlane.f32.xlu1 %v2615_v50 }
0x14e0   :  { %v2607_v46 = vpop.f32.mrb[52].mxu0 }
0x14e1   :  { %v2614_v12 = vmul.f32 0.25, %v2607_v46  ;;  %v5127_v36 = vpop.f32.mrb[53].mxu0 }
0x14e2   :  { %v2610_v29 = vpop.f32.mrb[54].mxu0 }
0x14e3   :  { %v5128_v3 = vpop.f32.mrb[55].mxu0  ;;  %v2618_v32 = vsel %vm340_vm3, %v2614_v12, -inf }
0x14e4   :  { %2619 = vmax.xlane.f32.xlu0 %v2618_v32 }
0x1569   :  { %v2617_v38 = vpop.xlane.xlu1 %2616 }
0x156a   :  { %v2621_v5 = vsub.f32 %v2613_v53, %v2617_v38 }
0x156c   :  { %v2623_v6 = vmul.f32 1.442695, %v2621_v5 }
0x156e   :  { %5551 = vpow2.f32 %v2623_v6 }
0x1571   :  { %v2620_v52 = vpop.xlane.xlu0 %2619 }
0x1572   :  { %v2622_v7 = vsub.f32 %v2614_v12, %v2620_v52 }
0x1574   :  { %v2625_v8 = vmul.f32 1.442695, %v2622_v7 }
0x1576   :  { %5553 = vpow2.f32 %v2625_v8 }
0x1578   :  { %v5552_v59 = vpop.eup %5551 }
0x1579   :  { %v2627_v9 = vsel %vm340_vm3, %v5552_v59, 0.0 }
0x157a   :  { %2628 = vadd.xlane.f32.xlu0 %v2627_v9 }
0x1580   :  { %v5554_v10 = vpop.eup %5553 }
0x1581   :  { %v2630_v11 = vsel %vm340_vm3, %v5554_v10, 0.0 }
0x1582   :  { %2631 = vadd.xlane.f32.xlu1 %v2630_v11 }
0x1590   :  { %2733 = vrot.lane.b32.xlu0 %v6675_v49, %s5994_s23 }
0x1593   :  { %2783 = vrot.lane.b32.xlu1 %v6679_v56, %s5994_s23 }
0x1594   :  { %2781 = vrot.lane.b32.xlu0 %v6679_v56, %s5995_s20 }
0x1597   :  { %2731 = vrot.lane.b32.xlu1 %v6675_v49, %s5995_s20 }
0x1607   :  { %v2629_v14 = vpop.xlane.xlu0 %2628 }
0x1608   :  { %5555 = vrcp.f32 %v2629_v14 }
0x160b   :  { %v2734_v45 = vpop.permute.xlu0 %2733 }
0x160c   :  { %v2739_v22 = vsel %vm1113_vm15, %v2734_v45, 0 }
0x160f   :  { %v2632_v15 = vpop.xlane.xlu1 %2631  ;;  %v2782_v27 = vpop.permute.xlu0 %2781 }
0x1610   :  { %5557 = vrcp.f32 %v2632_v15 }
0x1612   :  { %v5556_v16 = vpop.eup %5555 }
0x1613   :  { %v2635_v39 = vmul.f32 %v5556_v16, %v5552_v59  ;;  %v2784_v18 = vpop.permute.xlu1 %2783 }
0x1614   :  { %v2789_v24 = vsel %vm1113_vm15, %v2784_v18, 0 }
0x1615   :  { %v2637_v17 = vpack.c.bf16 %v2635_v39, %v2635_v39 }
0x1617   :  { %5132 = vmatmul.mubr.msk.bf16.vlgmr.msra.gmra.mrb[48].mxu1 %vm340_vm3, %v2637_v17  ;;  %v2732_v23 = vpop.permute.xlu1 %2731 }
0x1618   :  { %5142 = vmatpush3.bf16.xpose.msra.mxu1 %v2739_v22  ;;  %5143 = vmatprep.mubr.msk.bf16.mxu1 %vm5985_vm0, %v5984_v2 }
0x1619   :  { %5153 = vmatprep.subr.bf16.mxu1 %v5984_v2 }
0x161a   :  { %v5558_v19 = vpop.eup %5557 }
0x161b   :  { %v2636_v20 = vmul.f32 %v5558_v19, %v5554_v10 }
0x161d   :  { %v2638_v21 = vpack.c.bf16 %v2636_v20, %v2636_v20 }
0x161f   :  { %5138 = vmatmul.mubr.msk.bf16.vlgmr.msra.gmra.mrb[56].mxu0 %vm340_vm3, %v2638_v21  ;;  %5144 = vmatmul.mubr.msk.bf16.vlgmr.msra.gmra.mrb[52].mxu1 %vm1113_vm15, %v2732_v23 }
0x1620   :  { %5148 = vmatpush3.bf16.xpose.msra.mxu0 %v2789_v24  ;;  %5149 = vmatprep.mubr.msk.bf16.mxu0 %vm5985_vm0, %v5984_v2 }
0x1621   :  { %5159 = vmatprep.subr.bf16.mxu0 %v5984_v2  ;;  %5155 = vmatprep.mubr.msk.bf16.mxu1 %vm5985_vm0, %v5984_v2 }
0x1627   :  { %5150 = vmatmul.mubr.msk.bf16.vlgmr.msra.gmra.mrb[60].mxu0 %vm1113_vm15, %v2782_v27 }
0x1628   :  { %5161 = vmatprep.mubr.msk.bf16.mxu0 %vm5985_vm0, %v5984_v2 }
0x16ea   :  { %v6733_v28 = vpop.f32.mrb[48].mxu1 }
0x16eb   :  { %v5133_v30 = vpop.f32.mrb[49].mxu1 }
0x16ec   :  { %v2682_v35 = vpop.f32.mrb[50].mxu1 }
0x16ed   :  { %v5134_v37 = vpop.f32.mrb[51].mxu1 }
0x16f2   :  { %v6735_v41 = vpop.f32.mrb[56].mxu0  ;;  %v2775_v42 = vpop.f32.mrb[52].mxu1 }
0x16f3   :  { %v2831_v31 = vmul.f32 0.25, %v2775_v42  ;;  %v5139_v47 = vpop.f32.mrb[57].mxu0  ;;  %v5145_v51 = vpop.f32.mrb[53].mxu1 }
0x16f4   :  { %v2728_v54 = vpop.f32.mrb[58].mxu0  ;;  %v2778_v40 = vpop.f32.mrb[54].mxu1 }
0x16f5   :  { %v5140_v57 = vpop.f32.mrb[59].mxu0  ;;  %v5146_v33 = vpop.f32.mrb[55].mxu1  ;;  %v2833_v48 = vsel %vm340_vm3, %v2831_v31, -inf }
0x16f6   :  { %2834 = vmax.xlane.f32.xlu1 %v2833_v48 }
0x16fa   :  { %v2825_v43 = vpop.f32.mrb[60].mxu0 }
0x16fb   :  { %v2832_v44 = vmul.f32 0.25, %v2825_v43  ;;  %v5151_v60 = vpop.f32.mrb[61].mxu0 }
0x16fc   :  { %v2828_v61 = vpop.f32.mrb[62].mxu0 }
0x16fd   :  { %v5152_v53 = vpop.f32.mrb[63].mxu0  ;;  %v2836_v62 = vsel %vm340_vm3, %v2832_v44, -inf }
0x16fe   :  { %2837 = vmax.xlane.f32.xlu0 %v2836_v62 }
0x1707   :  { %2907 = vrot.lane.b32.xlu1 %v6696_v58, %s5995_s20 }
0x1714   :  { %2858 = vrot.lane.b32.xlu0 %v6677_v55, %s5995_s20 }
0x1783   :  { %v2835_v63 = vpop.xlane.xlu1 %2834 }
0x1784   :  { %v2839_v0 = vsub.f32 %v2831_v31, %v2835_v63 }
0x1786   :  { %v2841_v50 = vmul.f32 1.442695, %v2839_v0 }
0x1787   :  { %v2908_v46 = vpop.permute.xlu1 %2907 }
0x1788   :  { %5559 = vpow2.f32 %v2841_v50  ;;  %v2913_v12 = vsel %vm344_vm1, %v2908_v46, 0 }
0x1789   :  { %5160 = vmatpush3.bf16.msra.mxu0 %v2913_v12 }
0x178a   :  { %5171 = vmatprep.subr.bf16.mxu0 %v5984_v2 }
0x178b   :  { %v2838_v36 = vpop.xlane.xlu0 %2837 }
0x178c   :  { %v2840_v29 = vsub.f32 %v2832_v44, %v2838_v36 }
0x178e   :  { %v2843_v3 = vmul.f32 1.442695, %v2840_v29 }
0x178f   :  { %v2859_v32 = vpop.permute.xlu0 %2858 }
0x1790   :  { %5561 = vpow2.f32 %v2843_v3  ;;  %v2864_v38 = vsel %vm344_vm1, %v2859_v32, 0 }
0x1791   :  { %5154 = vmatpush3.bf16.msra.mxu1 %v2864_v38 }
0x1792   :  { %v5560_v5 = vpop.eup %5559  ;;  %5165 = vmatprep.subr.bf16.mxu1 %v5984_v2 }
0x1793   :  { %v2845_v6 = vsel %vm340_vm3, %v5560_v5, 0.0 }
0x1794   :  { %2846 = vadd.xlane.f32.xlu0 %v2845_v6 }
0x179a   :  { %v5562_v52 = vpop.eup %5561 }
0x179b   :  { %v2848_v7 = vsel %vm340_vm3, %v5562_v52, 0.0 }
0x179c   :  { %2849 = vadd.xlane.f32.xlu1 %v2848_v7 }
0x17aa   :  { %3007 = vrot.lane.b32.xlu0 %v6679_v56, %s5966_s5 }
0x17ad   :  { %2957 = vrot.lane.b32.xlu1 %v6675_v49, %s5966_s5 }
0x17ae   :  { %3005 = vrot.lane.b32.xlu0 %v6679_v56, %s5996_s26 }
0x17b1   :  { %2955 = vrot.lane.b32.xlu1 %v6675_v49, %s5996_s26 }
0x1821   :  { %v2847_v8 = vpop.xlane.xlu0 %2846 }
0x1822   :  { %5563 = vrcp.f32 %v2847_v8 }
0x1825   :  { %v3008_v45 = vpop.permute.xlu0 %3007 }
0x1826   :  { %v3013_v18 = vsel %vm1113_vm15, %v3008_v45, 0 }
0x1829   :  { %v2850_v59 = vpop.xlane.xlu1 %2849  ;;  %v3006_v19 = vpop.permute.xlu0 %3005 }
0x182a   :  { %5565 = vrcp.f32 %v2850_v59 }
0x182c   :  { %v5564_v9 = vpop.eup %5563 }
0x182d   :  { %v2853_v10 = vmul.f32 %v5564_v9, %v5560_v5  ;;  %v2958_v11 = vpop.permute.xlu1 %2957 }
0x182e   :  { %v2963_v15 = vsel %vm1113_vm15, %v2958_v11, 0 }
0x182f   :  { %v2855_v14 = vpack.c.bf16 %v2853_v10, %v2853_v10 }
0x1831   :  { %5156 = vmatmul.mubr.msk.bf16.vlgmr.msra.gmra.mrb[56].mxu1 %vm340_vm3, %v2855_v14  ;;  %v2956_v22 = vpop.permute.xlu1 %2955 }
0x1832   :  { %5166 = vmatpush3.bf16.xpose.msra.mxu1 %v2963_v15  ;;  %5167 = vmatprep.mubr.msk.bf16.mxu1 %vm5985_vm0, %v5984_v2 }
0x1833   :  { %5177 = vmatprep.subr.bf16.mxu1 %v5984_v2 }
0x1834   :  { %v5566_v16 = vpop.eup %5565 }
0x1835   :  { %v2854_v39 = vmul.f32 %v5566_v16, %v5562_v52 }
0x1837   :  { %v2856_v17 = vpack.c.bf16 %v2854_v39, %v2854_v39 }
0x1839   :  { %5162 = vmatmul.mubr.msk.bf16.vlgmr.msra.gmra.mrb[64].mxu0 %vm340_vm3, %v2856_v17  ;;  %5168 = vmatmul.mubr.msk.bf16.vlgmr.msra.gmra.mrb[60].mxu1 %vm1113_vm15, %v2956_v22 }
0x183a   :  { %5172 = vmatpush3.bf16.xpose.msra.mxu0 %v3013_v18  ;;  %5173 = vmatprep.mubr.msk.bf16.mxu0 %vm5985_vm0, %v5984_v2 }
0x183b   :  { %5183 = vmatprep.subr.bf16.mxu0 %v5984_v2  ;;  %5179 = vmatprep.mubr.msk.bf16.mxu1 %vm5985_vm0, %v5984_v2 }
0x1841   :  { %5174 = vmatmul.mubr.msk.bf16.vlgmr.msra.gmra.mrb[68].mxu0 %vm1113_vm15, %v3006_v19 }
0x1842   :  { %5185 = vmatprep.mubr.msk.bf16.mxu0 %vm5985_vm0, %v5984_v2 }
0x1904   :  { %v6773_v20 = vpop.f32.mrb[56].mxu1 }
0x1905   :  { %v5157_v21 = vpop.f32.mrb[57].mxu1 }
0x1906   :  { %v2903_v23 = vpop.f32.mrb[58].mxu1 }
0x1907   :  { %v5158_v24 = vpop.f32.mrb[59].mxu1 }
0x190c   :  { %v6775_v27 = vpop.f32.mrb[64].mxu0  ;;  %v2999_v30 = vpop.f32.mrb[60].mxu1 }
0x190d   :  { %v5381_v35 = vpack.i.bf16 %v6775_v27, %v6773_v20  ;;  %v3055_v37 = vmul.f32 0.25, %v2999_v30  ;;  %v5163_v42 = vpop.f32.mrb[65].mxu0  ;;  %v5169_v31 = vpop.f32.mrb[61].mxu1 }
0x190e   :  { %v2952_v47 = vpop.f32.mrb[66].mxu0  ;;  %v3002_v51 = vpop.f32.mrb[62].mxu1 }
0x190f   :  { %v5164_v54 = vpop.f32.mrb[67].mxu0  ;;  %v5170_v40 = vpop.f32.mrb[63].mxu1  ;;  %v3057_v57 = vsel %vm340_vm3, %v3055_v37, -inf }
0x1910   :  { %3058 = vmax.xlane.f32.xlu1 %v3057_v57 }
0x1914   :  { %v3049_v33 = vpop.f32.mrb[68].mxu0 }
0x1915   :  { %v3056_v48 = vmul.f32 0.25, %v3049_v33  ;;  %v5175_v43 = vpop.f32.mrb[69].mxu0 }
0x1916   :  { %v3052_v44 = vpop.f32.mrb[70].mxu0 }
0x1917   :  { %v5176_v60 = vpop.f32.mrb[71].mxu0  ;;  %v3060_v61 = vsel %vm340_vm3, %v3056_v48, -inf }
0x1918   :  { %3061 = vmax.xlane.f32.xlu0 %v3060_v61 }
0x1921   :  { %3129 = vrot.lane.b32.xlu1 %v6696_v58, %s5996_s26 }
0x192e   :  { %3081 = vrot.lane.b32.xlu0 %v6677_v55, %s5996_s26 }
0x199d   :  { %v3059_v53 = vpop.xlane.xlu1 %3058 }
0x199e   :  { %v3063_v62 = vsub.f32 %v3055_v37, %v3059_v53 }
0x19a0   :  { %v3065_v63 = vmul.f32 1.442695, %v3063_v62 }
0x19a1   :  { %v3130_v0 = vpop.permute.xlu1 %3129 }
0x19a2   :  { %5567 = vpow2.f32 %v3065_v63  ;;  %v3135_v50 = vsel %vm344_vm1, %v3130_v0, 0 }
0x19a3   :  { %5184 = vmatpush3.bf16.msra.mxu0 %v3135_v50 }
0x19a4   :  { %5195 = vmatprep.subr.bf16.mxu0 %v5984_v2 }
0x19a5   :  { %v3062_v46 = vpop.xlane.xlu0 %3061 }
0x19a6   :  { %v3064_v12 = vsub.f32 %v3056_v48, %v3062_v46 }
0x19a8   :  { %v3067_v36 = vmul.f32 1.442695, %v3064_v12 }
0x19a9   :  { %v3082_v29 = vpop.permute.xlu0 %3081 }
0x19aa   :  { %5569 = vpow2.f32 %v3067_v36  ;;  %v3087_v3 = vsel %vm344_vm1, %v3082_v29, 0 }
0x19ab   :  { %5178 = vmatpush3.bf16.msra.mxu1 %v3087_v3 }
0x19ac   :  { %v5568_v32 = vpop.eup %5567  ;;  %5189 = vmatprep.subr.bf16.mxu1 %v5984_v2 }
0x19ad   :  { %v3069_v38 = vsel %vm340_vm3, %v5568_v32, 0.0 }
0x19ae   :  { %3070 = vadd.xlane.f32.xlu0 %v3069_v38 }
0x19b4   :  { %v5570_v5 = vpop.eup %5569 }
0x19b5   :  { %v3072_v6 = vsel %vm340_vm3, %v5570_v5, 0.0 }
0x19b6   :  { %3073 = vadd.xlane.f32.xlu1 %v3072_v6 }
0x19c4   :  { %3229 = vrot.lane.b32.xlu0 %v6679_v56, %s5970_s22 }
0x19c7   :  { %3179 = vrot.lane.b32.xlu1 %v6675_v49, %s5970_s22 }
0x19c8   :  { %3227 = vrot.lane.b32.xlu0 %v6679_v56, %s5997_s28 }
0x19cb   :  { %3177 = vrot.lane.b32.xlu1 %v6675_v49, %s5997_s28 }
0x1a3b   :  { %v3071_v52 = vpop.xlane.xlu0 %3070 }
0x1a3c   :  { %5571 = vrcp.f32 %v3071_v52 }
0x1a3f   :  { %v3230_v14 = vpop.permute.xlu0 %3229 }
0x1a40   :  { %v3235_v39 = vsel %vm1113_vm15, %v3230_v14, 0 }
0x1a43   :  { %v3074_v7 = vpop.xlane.xlu1 %3073  ;;  %v3228_v45 = vpop.permute.xlu0 %3227 }
0x1a44   :  { %5573 = vrcp.f32 %v3074_v7 }
0x1a46   :  { %v5572_v8 = vpop.eup %5571 }
0x1a47   :  { %v3077_v59 = vmul.f32 %v5572_v8, %v5568_v32  ;;  %v3180_v9 = vpop.permute.xlu1 %3179  ;;  %v5436_v8 = vld [vmem:[%s7033_s30 + $0x20] sm:$0xff]  }
0x1a48   :  { %v3185_v11 = vsel %vm1113_vm15, %v3180_v9, 0  ;;  %v5438_v9 = vld [vmem:[%s7033_s30 + $0x30] sm:$0xff]  }
0x1a49   :  { %v3079_v10 = vpack.c.bf16 %v3077_v59, %v3077_v59  ;;  %v5437_v59 = vld [vmem:[%s7033_s30 + $0x28] sm:$0xff]  }
0x1a4b   :  { %5180 = vmatmul.mubr.msk.bf16.vlgmr.msra.gmra.mrb[64].mxu1 %vm340_vm3, %v3079_v10  ;;  %v3178_v16 = vpop.permute.xlu1 %3177 }
0x1a4c   :  { %5190 = vmatpush3.bf16.xpose.msra.mxu1 %v3185_v11  ;;  %5191 = vmatprep.mubr.msk.bf16.mxu1 %vm5985_vm0, %v5984_v2 }
0x1a4d   :  { %5201 = vmatprep.subr.bf16.mxu1 %v5984_v2 }
0x1a4e   :  { %v5574_v56 = vpop.eup %5573 }
0x1a4f   :  { %v3078_v49 = vmul.f32 %v5574_v56, %v5570_v5  ;;  %v5439_v56 = vld [vmem:[%s7033_s30 + $0x38] sm:$0xff]  }
0x1a51   :  { %v3080_v15 = vpack.c.bf16 %v3078_v49, %v3078_v49 }
0x1a53   :  { %5186 = vmatmul.mubr.msk.bf16.vlgmr.msra.gmra.mrb[72].mxu0 %vm340_vm3, %v3080_v15  ;;  %5192 = vmatmul.mubr.msk.bf16.vlgmr.msra.gmra.mrb[68].mxu1 %vm1113_vm15, %v3178_v16 }
0x1a54   :  { %5196 = vmatpush3.bf16.xpose.msra.mxu0 %v3235_v39  ;;  %5197 = vmatprep.mubr.msk.bf16.mxu0 %vm5985_vm0, %v5984_v2 }
0x1a55   :  { %5207 = vmatprep.subr.bf16.mxu0 %v5984_v2  ;;  %5203 = vmatprep.mubr.msk.bf16.mxu1 %vm5985_vm0, %v5984_v2 }
0x1a5b   :  { %5198 = vmatmul.mubr.msk.bf16.vlgmr.msra.gmra.mrb[76].mxu0 %vm1113_vm15, %v3228_v45 }
0x1a5c   :  { %5209 = vmatprep.mubr.msk.bf16.mxu0 %vm5985_vm0, %v5984_v2 }
0x1b1e   :  { %v3123_v17 = vpop.f32.mrb[64].mxu1 }
0x1b1f   :  { %v5181_v22 = vpop.f32.mrb[65].mxu1 }
0x1b20   :  { %v3126_v18 = vpop.f32.mrb[66].mxu1 }
0x1b21   :  { %v5182_v19 = vpop.f32.mrb[67].mxu1 }
0x1b26   :  { %v3171_v21 = vpop.f32.mrb[72].mxu0  ;;  %v3221_v23 = vpop.f32.mrb[68].mxu1 }
0x1b27   :  { %v5386_v24 = vpack.i.bf16 %v3171_v21, %v3123_v17  ;;  %v3277_v30 = vmul.f32 0.25, %v3221_v23  ;;  %v5187_v37 = vpop.f32.mrb[73].mxu0  ;;  %v5193_v42 = vpop.f32.mrb[69].mxu1 }
0x1b28   :  { %v3174_v31 = vpop.f32.mrb[74].mxu0  ;;  %v3224_v47 = vpop.f32.mrb[70].mxu1 }
0x1b29   :  { %v5188_v51 = vpop.f32.mrb[75].mxu0  ;;  %v5194_v54 = vpop.f32.mrb[71].mxu1  ;;  %v3279_v40 = vsel %vm340_vm3, %v3277_v30, -inf }
0x1b2a   :  { %3280 = vmax.xlane.f32.xlu1 %v3279_v40 }
0x1b2e   :  { %v3271_v57 = vpop.f32.mrb[76].mxu0 }
0x1b2f   :  { %v3278_v33 = vmul.f32 0.25, %v3271_v57  ;;  %v5199_v48 = vpop.f32.mrb[77].mxu0 }
0x1b30   :  { %v3274_v43 = vpop.f32.mrb[78].mxu0 }
0x1b31   :  { %v5200_v44 = vpop.f32.mrb[79].mxu0  ;;  %v3282_v60 = vsel %vm340_vm3, %v3278_v33, -inf }
0x1b32   :  { %3283 = vmax.xlane.f32.xlu0 %v3282_v60 }
0x1bb7   :  { %v3281_v61 = vpop.xlane.xlu1 %3280 }
0x1bb8   :  { %v3285_v53 = vsub.f32 %v3277_v30, %v3281_v61 }
0x1bba   :  { %v3287_v62 = vmul.f32 1.442695, %v3285_v53 }
0x1bbc   :  { %5575 = vpow2.f32 %v3287_v62 }
0x1bbf   :  { %v3284_v63 = vpop.xlane.xlu0 %3283 }
0x1bc0   :  { %v3286_v0 = vsub.f32 %v3278_v33, %v3284_v63 }
0x1bc2   :  { %v3289_v50 = vmul.f32 1.442695, %v3286_v0 }
0x1bc4   :  { %5577 = vpow2.f32 %v3289_v50 }
0x1bc6   :  { %v5576_v46 = vpop.eup %5575 }
0x1bc7   :  { %v3291_v12 = vsel %vm340_vm3, %v5576_v46, 0.0 }
0x1bc8   :  { %3292 = vadd.xlane.f32.xlu0 %v3291_v12 }
0x1bce   :  { %v5578_v36 = vpop.eup %5577 }
0x1bcf   :  { %v3294_v29 = vsel %vm340_vm3, %v5578_v36, 0.0 }
0x1bd0   :  { %3295 = vadd.xlane.f32.xlu1 %v3294_v29 }
0x1bde   :  { %3303 = vrot.lane.b32.xlu0 %v6677_v55, %s5997_s28 }
0x1be1   :  { %3351 = vrot.lane.b32.xlu1 %v6696_v58, %s5997_s28 }
0x1be2   :  { %5387 = vrot.lane.b32.xlu0 %v5386_v24, %s5966_s5  ;;  %s7037_s5 = sld [smem:[#allocation46_spill]] }
0x1be5   :  { %5382 = vrot.lane.b32.xlu1 %v5381_v35, %s5970_s22  ;;  %s7038_s22 = sld [smem:[#allocation48_spill]] }
0x1c55   :  { %v3293_v3 = vpop.xlane.xlu0 %3292 }
0x1c56   :  { %5579 = vrcp.f32 %v3293_v3 }
0x1c59   :  { %v3304_v32 = vpop.permute.xlu0 %3303 }
0x1c5a   :  { %v3309_v38 = vsel %vm344_vm1, %v3304_v32, 0 }
0x1c5b   :  { %5202 = vmatpush3.bf16.msra.mxu1 %v3309_v38 }
0x1c5c   :  { %5213 = vmatprep.subr.bf16.mxu1 %v5984_v2 }
0x1c5d   :  { %v3296_v5 = vpop.xlane.xlu1 %3295  ;;  %v5388_v21 = vpop.permute.xlu0 %5387 }
0x1c5e   :  { %5581 = vrcp.f32 %v3296_v5  ;;  %v5390_v30 = vunpack.i.h.bf16 %v5388_v21  ;;  %v5389_v37 = vunpack.i.l.bf16 %v5388_v21  ;;  %v5440_v5 = vld [vmem:[%s7034_s17 + $0x20] sm:$0xff]  }
0x1c60   :  { %v5580_v55 = vpop.eup %5579 }
0x1c61   :  { %v3299_v58 = vmul.f32 %v5580_v55, %v5576_v46  ;;  %v3352_v6 = vpop.permute.xlu1 %3351  ;;  %v5441_v55 = vld [vmem:[%s7034_s17 + $0x28] sm:$0xff]  }
0x1c62   :  { %v3357_v52 = vsel %vm344_vm1, %v3352_v6, 0  ;;  %v5444_v6 = vld [vmem:[%s7035_s12 + $0x40] sm:$0xff]   ;;  %vm3857_vm1 = vcmask 1041409  }
0x1c63   :  { %5208 = vmatpush3.bf16.msra.mxu0 %v3357_v52  ;;  %v3301_v20 = vpack.c.bf16 %v3299_v58, %v3299_v58  ;;  %v5442_v58 = vld [vmem:[%s7034_s17 + $0x30] sm:$0xff]   ;;  %v5445_v52 = vld [vmem:[%s7035_s12 + $0x48] sm:$0xff]  }
0x1c64   :  { %5225 = vmatprep.subr.bf16.mxu0 %v5984_v2 }
0x1c65   :  { %5204 = vmatmul.mubr.msk.bf16.vlgmr.msra.gmra.mrb[72].mxu1 %vm340_vm3, %v3301_v20  ;;  %v5383_v22 = vpop.permute.xlu1 %5382  ;;  %v5443_v20 = vld [vmem:[%s7034_s17 + $0x38] sm:$0xff]  }
0x1c66   :  { %5221 = vmatprep.mubr.msk.bf16.mxu1 %vm5985_vm0, %v5984_v2  ;;  %5214 = vmatpush3.bf16.msra.mxu1 %v5436_v8  ;;  %v5385_v18 = vunpack.i.h.bf16 %v5383_v22  ;;  %v5384_v19 = vunpack.i.l.bf16 %v5383_v22  ;;  %v5449_v8 = vld [vmem:[%s7035_s12 + $0x68] sm:$0xff]  }
0x1c67   :  { %5215 = vmatprep.subr.bf16.mxu1 %v5984_v2  ;;  %v4725_v22 = vld [vmem:[#allocation10 + $0x1] ss:$0 sm:$0xff] }
0x1c68   :  { %v5582_v27 = vpop.eup %5581  ;;  %v3424_v23 = vsel %vm1113_vm15, %v6735_v41, %v5385_v18  ;;  %v3423_v24 = vsel %vm1113_vm15, %v6733_v28, %v5384_v19  ;;  %v4718_v28 = vld [vmem:[#allocation7 + $0x1] ss:$0 sm:$0xff] }
0x1c69   :  { %v3300_v35 = vmul.f32 %v5582_v27, %v5578_v36  ;;  %v3425_v51 = vsel %vm902_vm13, %v3423_v24, %v5389_v37  ;;  %v3426_v54 = vsel %vm902_vm13, %v3424_v23, %v5390_v30  ;;  %v5446_v27 = vld [vmem:[%s7035_s12 + $0x50] sm:$0xff]   ;;  %v5451_v30 = vld [vmem:[%s7035_s12 + $0x78] sm:$0xff]   ;;  %vm4553_vm13 = vcmask 138240  }
0x1c6a   :  { %5216 = vmatpush3.bf16.msra.mxu1 %v5437_v59  ;;  %v5450_v24 = vld [vmem:[%s7035_s12 + $0x70] sm:$0xff]  }
0x1c6b   :  { %v3302_v7 = vpack.c.bf16 %v3300_v35, %v3300_v35  ;;  %5217 = vmatprep.subr.bf16.mxu1 %v5984_v2  ;;  %v5447_v35 = vld [vmem:[%s7035_s12 + $0x58] sm:$0xff]   ;;  %v4734_v37 = vld [vmem:[#allocation13 + $0x1] ss:$0 sm:$0xff] }
0x1c6d   :  { %5210 = vmatmul.mubr.msk.bf16.vlgmr.msra.gmra.mrb[80].mxu0 %vm340_vm3, %v3302_v7  ;;  %v5448_v7 = vld [vmem:[%s7035_s12 + $0x60] sm:$0xff]   ;;  %vm4342_vm3 = vcmask 1044480  }
0x1c6e   :  { %5233 = vmatprep.mubr.msk.bf16.mxu0 %vm5985_vm0, %v5984_v2  ;;  %5218 = vmatpush3.bf16.msra.mxu1 %v5438_v9 }
0x1c6f   :  { %5219 = vmatprep.subr.bf16.mxu1 %v5984_v2  ;;  %5226 = vmatpush3.bf16.msra.mxu0 %v5440_v5  ;;  %v5452_v5 = vld [vmem:[%s7037_s5] ss:$8 sps:$4 sm:$0xff]  }
0x1c70   :  { %5227 = vmatprep.subr.bf16.mxu0 %v5984_v2 }
0x1c72   :  { %5220 = vmatpush3.bf16.msra.mxu1 %v5439_v56 }
0x1c73   :  { %5237 = vmatprep.subr.bf16.mxu1 %v5984_v2  ;;  %5228 = vmatpush3.bf16.msra.mxu0 %v5441_v55  ;;  %v5454_v55 = vld [vmem:[%s7037_s5 + $0x4] ss:$8 sps:$4 sm:$0xff]  }
0x1c74   :  { %5229 = vmatprep.subr.bf16.mxu0 %v5984_v2 }
0x1c77   :  { %5230 = vmatpush3.bf16.msra.mxu0 %v5442_v58  ;;  %v5455_v58 = vld [vmem:[%s7038_s22] ss:$8 sps:$4 sm:$0xff]  }
0x1c78   :  { %5231 = vmatprep.subr.bf16.mxu0 %v5984_v2 }
0x1c7b   :  { %5232 = vmatpush3.bf16.msra.mxu0 %v5443_v20  ;;  %v5463_v20 = vld [vmem:[%s7038_s22 + $0x14] ss:$8 sps:$4 sm:$0xff]  }
0x1c7c   :  { %3903 = vmatprep.subr.bf16.mxu0 %v5454_v55  ;;  %v5483_v55 = vld [vmem:[%s7039_s27 + $0x18] sm:$0xff]  }
0x1d38   :  { %v3345_v10 = vpop.f32.mrb[72].mxu1 }
0x1d39   :  { %v5205_v11 = vpop.f32.mrb[73].mxu1 }
0x1d3a   :  { %v3348_v49 = vpop.f32.mrb[74].mxu1 }
0x1d3b   :  { %v5206_v14 = vpop.f32.mrb[75].mxu1 }
0x1d40   :  { %v3393_v15 = vpop.f32.mrb[80].mxu0 }
0x1d41   :  { %v5391_v16 = vpack.i.bf16 %v3393_v15, %v3345_v10  ;;  %v5211_v39 = vpop.f32.mrb[81].mxu0 }
0x1d42   :  { %v3396_v45 = vpop.f32.mrb[82].mxu0 }
0x1d43   :  { %5392 = vrot.lane.b32.xlu1 %v5391_v16, %s5994_s23  ;;  %v5212_v17 = vpop.f32.mrb[83].mxu0  ;;  %v4724_v16 = vld [vmem:[#allocation8 + $0x1] ss:$0 sm:$0xff] }
0x1db5   :  { %v5393_v42 = vpop.permute.xlu1 %5392 }
0x1db6   :  { %v5395_v31 = vunpack.i.h.bf16 %v5393_v42  ;;  %v5394_v47 = vunpack.i.l.bf16 %v5393_v42 }
0x1db8   :  { %v3428_v40 = vsel %vm2023_vm2, %v3426_v54, %v5395_v31  ;;  %v3427_v57 = vsel %vm2023_vm2, %v3425_v51, %v5394_v47 }
0x1db9   :  { %v3438_v33 = vpack.c.bf16 %v3428_v40, %v3427_v57 }
0x1dbb   :  { %5222 = vmatmul.mubr.msk.bf16.vlgmr.msra.gmra.mrb[76].mxu1 %vm1059_vm14, %v3438_v33 }
0x1dbc   :  { %5253 = vmatprep.mubr.msk.bf16.mxu1 %vm5985_vm0, %v5984_v2  ;;  %5238 = vmatpush3.bf16.msra.mxu1 %v5444_v6  ;;  %v5457_v6 = vld [vmem:[%s7038_s22 + $0x4] ss:$8 sps:$4 sm:$0xff]  }
0x1dbd   :  { %5239 = vmatprep.subr.bf16.mxu1 %v5984_v2 }
0x1dc0   :  { %5240 = vmatpush3.bf16.msra.mxu1 %v5445_v52  ;;  %v5460_v52 = vld [vmem:[%s7037_s5 + $0x14] ss:$8 sps:$4 sm:$0xff]  }
0x1dc1   :  { %5241 = vmatprep.subr.bf16.mxu1 %v5984_v2 }
0x1dc4   :  { %5242 = vmatpush3.bf16.msra.mxu1 %v5446_v27  ;;  %v5458_v27 = vld [vmem:[%s7037_s5 + $0x10] ss:$8 sps:$4 sm:$0xff]  }
0x1dc5   :  { %5243 = vmatprep.subr.bf16.mxu1 %v5984_v2 }
0x1dc8   :  { %5244 = vmatpush3.bf16.msra.mxu1 %v5447_v35  ;;  %v5461_v35 = vld [vmem:[%s7038_s22 + $0x10] ss:$8 sps:$4 sm:$0xff]  }
0x1dc9   :  { %5245 = vmatprep.subr.bf16.mxu1 %v5984_v2 }
0x1dcc   :  { %5246 = vmatpush3.bf16.msra.mxu1 %v5448_v7  ;;  %v5466_v7 = vld [vmem:[%s7037_s5 + $0x24] ss:$8 sps:$4 sm:$0xff]  }
0x1dcd   :  { %5247 = vmatprep.subr.bf16.mxu1 %v5984_v2 }
0x1dd0   :  { %5248 = vmatpush3.bf16.msra.mxu1 %v5449_v8  ;;  %v5469_v8 = vld [vmem:[%s7038_s22 + $0x24] ss:$8 sps:$4 sm:$0xff]  }
0x1dd1   :  { %5249 = vmatprep.subr.bf16.mxu1 %v5984_v2 }
0x1dd4   :  { %5250 = vmatpush3.bf16.msra.mxu1 %v5450_v24  ;;  %v4767_v24 = vld [vmem:[#allocation11 + $0x1] ss:$0 sm:$0xff] }
0x1dd5   :  { %5251 = vmatprep.subr.bf16.mxu1 %v5984_v2 }
0x1dd8   :  { %5252 = vmatpush3.bf16.msra.mxu1 %v5451_v30 }
0x1dd9   :  { %4201 = vmatprep.subr.bf16.mxu1 %v5457_v6  ;;  %v5485_v6 = vld [vmem:[%s7039_s27 + $0x20] sm:$0xff]  }
0x1e8e   :  { %v3508_v41 = vpop.f32.mrb[76].mxu1 }
0x1e8f   :  { %v3509_v48 = vadd.f32 %v4718_v28, %v3508_v41  ;;  %v5223_v43 = vpop.f32.mrb[77].mxu1  ;;  %v4756_v41 = vld [vmem:[#allocation14 + $0x1] ss:$0 sm:$0xff] }
0x1e90   :  { %v3511_v44 = vpop.f32.mrb[78].mxu1 }
0x1e91   :  { %v3512_v60 = vadd.f32 %v4718_v28, %v3511_v44  ;;  %v5224_v61 = vpop.f32.mrb[79].mxu1  ;;  %v3515_v53 = vadd.f32 %v3509_v48, %v6664_v25 }
0x1e93   :  { %v3521_v62 = vsel %vm1059_vm14, %v3515_v53, 0.0  ;;  %v3516_v63 = vadd.f32 %v3512_v60, %v6666_v26 }
0x1e94   :  { %3522 = vadd.xlane.f32.xlu0 %v3521_v62 }
0x1e95   :  { %v3524_v0 = vsel %vm1059_vm14, %v3516_v63, 0.0 }
0x1e96   :  { %3525 = vadd.xlane.f32.xlu1 %v3524_v0 }
0x1f21   :  { %v3523_v50 = vpop.xlane.xlu0 %3522 }
0x1f22   :  { %v3527_v46 = vmul.f32 0.015625, %v3523_v50 }
0x1f23   :  { %v3526_v12 = vpop.xlane.xlu1 %3525 }
0x1f24   :  { %v3529_v36 = vsub.f32 %v3515_v53, %v3527_v46  ;;  %v3528_v29 = vmul.f32 0.015625, %v3526_v12 }
0x1f26   :  { %v3530_v3 = vsub.f32 %v3516_v63, %v3528_v29  ;;  %v3531_v25 = vmul.f32 %v3529_v36, %v3529_v36 }
0x1f28   :  { %v3533_v32 = vsel %vm1059_vm14, %v3531_v25, 0.0  ;;  %v3532_v38 = vmul.f32 %v3530_v3, %v3530_v3 }
0x1f29   :  { %3534 = vadd.xlane.f32.xlu0 %v3533_v32 }
0x1f2a   :  { %v3536_v26 = vsel %vm1059_vm14, %v3532_v38, 0.0 }
0x1f2d   :  { %3537 = vadd.xlane.f32.xlu0 %v3536_v26 }
0x1fb6   :  { %v3535_v59 = vpop.xlane.xlu0 %3534 }
0x1fb7   :  { %v3539_v9 = vmul.f32 0.015625, %v3535_v59  ;;  %v5464_v59 = vld [vmem:[%s7037_s5 + $0x20] ss:$8 sps:$4 sm:$0xff]  }
0x1fb9   :  { %v3541_v10 = vadd.f32 1e-05, %v3539_v9  ;;  %v5467_v9 = vld [vmem:[%s7038_s22 + $0x20] ss:$8 sps:$4 sm:$0xff]  }
0x1fba   :  { %v3538_v11 = vpop.xlane.xlu0 %3537 }
0x1fbb   :  { %5583 = vrsqrt.f32 %v3541_v10  ;;  %v3540_v56 = vmul.f32 0.015625, %v3538_v11  ;;  %v5472_v10 = vld [vmem:[%s7037_s5 + $0x34] ss:$8 sps:$4 sm:$0xff]  }
0x1fbc   :  { %v5475_v11 = vld [vmem:[%s7038_s22 + $0x34] ss:$8 sps:$4 sm:$0xff]  }
0x1fbd   :  { %v3542_v49 = vadd.f32 1e-05, %v3540_v56  ;;  %v5470_v56 = vld [vmem:[%s7037_s5 + $0x30] ss:$8 sps:$4 sm:$0xff]  }
0x1fbf   :  { %5585 = vrsqrt.f32 %v3542_v49  ;;  %v5473_v49 = vld [vmem:[%s7038_s22 + $0x30] ss:$8 sps:$4 sm:$0xff]  }
0x1fc5   :  { %v5584_v14 = vpop.eup %5583 }
0x1fc6   :  { %v3545_v15 = vmul.f32 %v5584_v14, %v3529_v36  ;;  %v5476_v14 = vld [vmem:[%s7039_s27 + $0x40] sm:$0xff]  }
0x1fc8   :  { %v3553_v45 = vmul.f32 %v4724_v16, %v3545_v15 }
0x1fc9   :  { %v5586_v39 = vpop.eup %5585 }
0x1fca   :  { %v3546_v17 = vmul.f32 %v5586_v39, %v3530_v3  ;;  %v3561_v19 = vadd.f32 %v4725_v22, %v3553_v45 }
0x1fcc   :  { %v3554_v18 = vmul.f32 %v4724_v16, %v3546_v17 }
0x1fce   :  { %v3562_v21 = vadd.f32 %v4725_v22, %v3554_v18 }
0x1fd0   :  { %v3572_v23 = vpack.c.bf16 %v3562_v21, %v3561_v19 }
0x1fd2   :  { %5234 = vmatmul.mubr.msk.bf16.vlgmr.msra.gmra.mrb[84].mxu0 %vm1059_vm14, %v3572_v23 }
0x1fd3   :  { %3935 = vmatprep.mubr.bf16.mxu0 %v5983_v1  ;;  %3904 = vmatpush1.bf16.msra.mxu0 %v5452_v5  ;;  %v5482_v5 = vld [vmem:[%s7039_s27 + $0x58] sm:$0xff]  }
0x1fd4   :  { %3905 = vmatprep.subr.bf16.mxu0 %v5460_v52  ;;  %v5486_v52 = vld [vmem:[%s7039_s27 + $0x68] sm:$0xff]  }
0x1fd7   :  { %3906 = vmatpush1.bf16.msra.mxu0 %v5458_v27  ;;  %v5488_v27 = vld [vmem:[%s7039_s27 + $0x70] sm:$0xff]  }
0x1fd8   :  { %3907 = vmatprep.subr.bf16.mxu0 %v5466_v7  ;;  %v5490_v7 = vld [vmem:[%s7039_s27 + $0x78] sm:$0xff]  }
0x1fdb   :  { %3908 = vmatpush1.bf16.msra.mxu0 %v5464_v59  ;;  %v3841_v59 = vld [vmem:[#allocation16] sm:$0x3] }
0x1fdc   :  { %3909 = vmatprep.subr.bf16.mxu0 %v5472_v10  ;;  %v3850_v10 = vrot.slane %v3841_v59, %v6430_v34 }
0x1fdf   :  { %3910 = vmatpush1.bf16.msra.mxu0 %v5470_v56 }
0x1fe0   :  { %4926 = vmatprep.subr.bf16.mxu0 %v5476_v14 }
0x20a5   :  { %v3642_v42 = vpop.f32.mrb[84].mxu0 }
0x20a6   :  { %v3643_v31 = vadd.f32 %v4734_v37, %v3642_v42  ;;  %v5235_v47 = vpop.f32.mrb[85].mxu0 }
0x20a7   :  { %v3645_v51 = vpop.f32.mrb[86].mxu0 }
0x20a8   :  { %v3646_v54 = vadd.f32 %v4734_v37, %v3645_v51  ;;  %v5236_v40 = vpop.f32.mrb[87].mxu0  ;;  %v3649_v57 = vmax.f32 %v3643_v31, 0.0 }
0x20aa   :  { %v3650_v33 = vmax.f32 %v3646_v54, 0.0 }
0x20ac   :  { %v3668_v28 = vpack.c.bf16 %v3650_v33, %v3649_v57 }
0x20ae   :  { %5254 = vmatmul.mubr.bf16.vlgmr.msra.gmra.mrb[80].mxu1 %v3668_v28 }
0x20af   :  { %4233 = vmatprep.mubr.bf16.mxu1 %v5983_v1  ;;  %4202 = vmatpush1.bf16.msra.mxu1 %v5455_v58  ;;  %v5484_v58 = vld [vmem:[%s7039_s27 + $0x60] sm:$0xff]  }
0x20b0   :  { %4203 = vmatprep.subr.bf16.mxu1 %v5463_v20  ;;  %v5487_v20 = vld [vmem:[%s7039_s27 + $0x28] sm:$0xff]  }
0x20b3   :  { %4204 = vmatpush1.bf16.msra.mxu1 %v5461_v35  ;;  %v5489_v35 = vld [vmem:[%s7039_s27 + $0x30] sm:$0xff]  }
0x20b4   :  { %4205 = vmatprep.subr.bf16.mxu1 %v5469_v8  ;;  %v5491_v8 = vld [vmem:[%s7039_s27 + $0x38] sm:$0xff]  }
0x20b7   :  { %4206 = vmatpush1.bf16.msra.mxu1 %v5467_v9  ;;  %v3846_v9 = vrot.slane %v3841_v59, %v6411_v13 }
0x20b8   :  { %4207 = vmatprep.subr.bf16.mxu1 %v5475_v11 }
0x20bb   :  { %4208 = vmatpush1.bf16.msra.mxu1 %v5473_v49 }
0x20bc   :  { %5257 = vmatprep.subr.bf16.mxu1 %v5984_v2 }
0x2181   :  { %v3759_v48 = vpop.f32.mrb[80].mxu1 }
0x2182   :  { %v3760_v43 = vadd.f32 %v4756_v41, %v3759_v48  ;;  %v5255_v44 = vpop.f32.mrb[81].mxu1 }
0x2183   :  { %v3762_v60 = vpop.f32.mrb[82].mxu1 }
0x2184   :  { %v3763_v61 = vadd.f32 %v4756_v41, %v3762_v60  ;;  %v5256_v53 = vpop.f32.mrb[83].mxu1  ;;  %v3766_v62 = vadd.f32 %v3760_v43, %v3561_v19  ;;  %v4766_v19 = vld [vmem:[%s7036_s1 + $0x1] ss:$0 sm:$0xff] }
0x2186   :  { %v3767_v63 = vadd.f32 %v3763_v61, %v3562_v21  ;;  %v3772_v0 = vsel %vm1059_vm14, %v3766_v62, 0.0 }
0x2187   :  { %3773 = vadd.xlane.f32.xlu1 %v3772_v0 }
0x2188   :  { %v3775_v50 = vsel %vm1059_vm14, %v3767_v63, 0.0 }
0x2189   :  { %3776 = vadd.xlane.f32.xlu0 %v3775_v50 }
0x2214   :  { %v3774_v1 = vpop.xlane.xlu1 %3773 }
0x2215   :  { %v3778_v46 = vmul.f32 0.015625, %v3774_v1 }
0x2216   :  { %v3777_v12 = vpop.xlane.xlu0 %3776 }
0x2217   :  { %v3780_v36 = vsub.f32 %v3766_v62, %v3778_v46  ;;  %v3779_v29 = vmul.f32 0.015625, %v3777_v12 }
0x2219   :  { %v3781_v3 = vsub.f32 %v3767_v63, %v3779_v29  ;;  %v3782_v25 = vmul.f32 %v3780_v36, %v3780_v36  ;;  %v5477_v29 = vld [vmem:[%s7039_s27] sm:$0xff]  }
0x221b   :  { %v3784_v32 = vsel %vm1059_vm14, %v3782_v25, 0.0  ;;  %v3783_v38 = vmul.f32 %v3781_v3, %v3781_v3  ;;  %v5478_v25 = vld [vmem:[%s7039_s27 + $0x48] sm:$0xff]  }
0x221c   :  { %3785 = vadd.xlane.f32.xlu1 %v3784_v32  ;;  %v5479_v32 = vld [vmem:[%s7039_s27 + $0x8] sm:$0xff]  }
0x221d   :  { %v3787_v26 = vsel %vm1059_vm14, %v3783_v38, 0.0  ;;  %v5480_v38 = vld [vmem:[%s7039_s27 + $0x50] sm:$0xff]  }
0x221e   :  { %3788 = vadd.xlane.f32.xlu0 %v3787_v26  ;;  %v5481_v26 = vld [vmem:[%s7039_s27 + $0x10] sm:$0xff]  }
0x22a9   :  { %v3786_v15 = vpop.xlane.xlu1 %3785 }
0x22aa   :  { %v3790_v16 = vmul.f32 0.015625, %v3786_v15 }
0x22ab   :  { %v3789_v39 = vpop.xlane.xlu0 %3788 }
0x22ac   :  { %v3792_v45 = vadd.f32 1e-05, %v3790_v16  ;;  %v3791_v17 = vmul.f32 0.015625, %v3789_v39 }
0x22ae   :  { %5587 = vrsqrt.f32 %v3792_v45  ;;  %v3793_v22 = vadd.f32 1e-05, %v3791_v17 }
0x22b0   :  { %5589 = vrsqrt.f32 %v3793_v22 }
0x22b8   :  { %v5588_v18 = vpop.eup %5587 }
0x22b9   :  { %v3796_v21 = vmul.f32 %v5588_v18, %v3780_v36 }
0x22ba   :  { %v5590_v23 = vpop.eup %5589 }
0x22bb   :  { %v3804_v30 = vmul.f32 %v4766_v19, %v3796_v21  ;;  %v3797_v37 = vmul.f32 %v5590_v23, %v3781_v3 }
0x22bd   :  { %v3812_v42 = vadd.f32 %v4767_v24, %v3804_v30  ;;  %v3805_v31 = vmul.f32 %v4766_v19, %v3797_v37 }
0x22bf   :  { %v3814_v47 = vsel %vm1059_vm14, %v3812_v42, 0.0  ;;  %v3813_v51 = vadd.f32 %v4767_v24, %v3805_v31 }
0x22c0   :  { %v3815_v54 = vrot.slane %v3814_v47, 4 }
0x22c1   :  { %v3821_v40 = vsel %vm1059_vm14, %v3813_v51, 0.0 }
0x22c2   :  { %v3816_v57 = vadd.f32 %v3815_v54, %v3814_v47  ;;  %v3822_v33 = vrot.slane %v3821_v40, 4 }
0x22c4   :  { %v3817_v28 = vrot.slane %v3816_v57, 2  ;;  %v3823_v41 = vadd.f32 %v3822_v33, %v3821_v40  ;;  %v4316_v40 = vld [vmem:[%s7030_s14] sm:$0x3]  ;;  %v4777_v33 = vld [vmem:[#allocation17] ss:$0 sm:$0xff] }
0x22c5   :  { %4318 = vrot.lane.b32.xlu0 %v4316_v40, %s5998_s2 }
0x22c6   :  { %v3824_v48 = vrot.slane %v3823_v41, 2  ;;  %v3818_v43 = vadd.f32 %v3817_v28, %v3816_v57 }
0x22c8   :  { %v3819_v44 = vrot.slane %v3818_v43, 1  ;;  %v3825_v60 = vadd.f32 %v3824_v48, %v3823_v41 }
0x22ca   :  { %v3820_v61 = vadd.f32 %v3819_v44, %v3818_v43  ;;  %v3826_v53 = vrot.slane %v3825_v60, 1 }
0x22cc   :  { %v3827_v62 = vadd.f32 %v3826_v53, %v3825_v60  ;;  %v3829_v63 = vmul.f32 0.125, %v3820_v61  ;;  %v5492_v53 = vld [vmem:[%s7040_s19] sm:$0x1f]  }
0x22ce   :  { %v3830_v0 = vmul.f32 0.125, %v3827_v62  ;;  %v3839_v50 = vpack.c.bf16 %v3829_v63, %v3829_v63  ;;  %v4344_v62 = vsel %vm4342_vm3, %v5492_v53, 0 }
0x22d0   :  { %v3840_v1 = vpack.c.bf16 %v3830_v0, %v3830_v0  ;;  %v3855_v46 = vunpack.c.l.b16 %v3839_v50  ;;  %v6941_v0 = vld [vmem:[#allocation20] sm:$0xf] }
0x22d1   :  { %v4265_v50 = vrot.slane %v6941_v0, %v6430_v34 }
0x22d2   :  { %v3856_v12 = vunpack.c.l.b16 %v3840_v1  ;;  %v4288_v1 = vsub.s32 3, %v6406_v4 }
0x22d4   :  { %v3858_v36 = vsel %vm3857_vm1, %v3856_v12, %v3855_v46  ;;  %v4289_v46 = vrot.slane %v6941_v0, %v4288_v1  ;;  %v4149_v12 = vld [vmem:[#allocation19] sm:$0x3] }
0x22d5   :  { %v3859_v3 = vpack.c.b16 %v3858_v36, %v3858_v36  ;;  %v4154_v36 = vrot.slane %v4149_v12, %v6411_v13 }
0x22d7   :  { %4776 = vmatmul.mubr.msk.bf16.vlgmr.msra.gmra.mrb[88].mxu0 %vm1059_vm14, %v3859_v3  ;;  %4802 = vmatmul.mubr.msk.bf16.vlgmr.msra.gmra.mrb[84].mxu1 %vm1059_vm14, %v3859_v3  ;;  %v4158_v3 = vrot.slane %v4149_v12, %v6430_v34 }
0x22d8   :  { %4927 = vmatpush3.bf16.msra.mxu0 %v5477_v29  ;;  %5259 = vmatprep.mubr.msk.bf16.mxu1 %vm5985_vm0, %v5984_v2 }
0x22d9   :  { %4928 = vmatprep.subr.bf16.mxu0 %v5478_v25  ;;  %5258 = vmatpush3.bf16.msra.mxu1 %v4344_v62 }
0x22dc   :  { %4929 = vmatpush3.bf16.msra.mxu0 %v5479_v32 }
0x22dd   :  { %4930 = vmatprep.subr.bf16.mxu0 %v5480_v38 }
0x22e0   :  { %4931 = vmatpush3.bf16.msra.mxu0 %v5481_v26 }
0x22e1   :  { %4932 = vmatprep.subr.bf16.mxu0 %v5482_v5  ;;  %v4131_v5 = vld [vmem:[%s7041_s3] sm:$0x3] }
0x22e4   :  { %4933 = vmatpush3.bf16.msra.mxu0 %v5483_v55 }
0x22e5   :  { %4934 = vmatprep.subr.bf16.mxu0 %v5484_v58 }
0x22e8   :  { %4935 = vmatpush3.bf16.msra.mxu0 %v5485_v6 }
0x22e9   :  { %4936 = vmatprep.subr.bf16.mxu0 %v5486_v52 }
0x22ec   :  { %4937 = vmatpush3.bf16.msra.mxu0 %v5487_v20 }
0x22ed   :  { %4938 = vmatprep.subr.bf16.mxu0 %v5488_v27 }
0x22f0   :  { %4939 = vmatpush3.bf16.msra.mxu0 %v5489_v35 }
0x22f1   :  { %4940 = vmatprep.subr.bf16.mxu0 %v5490_v7 }
0x22f4   :  { %4941 = vmatpush3.bf16.msra.mxu0 %v5491_v8 }
0x22f5   :  { %5263 = vmatprep.subr.bf16.mxu0 %v5984_v2 }
0x2337   :  { %v4319_v27 = vpop.permute.xlu0 %4318 }
0x23aa   :  { %v3937_v11 = vpop.f32.mrb[88].mxu0  ;;  %v4235_v56 = vpop.f32.mrb[84].mxu1 }
0x23ab   :  { %v3938_v49 = vadd.f32 %v3937_v11, %v3846_v9  ;;  %v3939_v14 = vpop.f32.mrb[89].mxu0  ;;  %v4237_v15 = vpop.f32.mrb[85].mxu1  ;;  %v4236_v29 = vadd.f32 %v4235_v56, %v4154_v36 }
0x23ac   :  { %v3940_v16 = vadd.f32 %v3939_v14, %v3850_v10  ;;  %v3941_v39 = vpop.f32.mrb[90].mxu0  ;;  %v4239_v45 = vpop.f32.mrb[86].mxu1  ;;  %v4238_v32 = vadd.f32 %v4237_v15, %v4158_v3  ;;  %v4256_v15 = vrot.slane %v6941_v0, %v6411_v13  ;;  %v5496_v13 = vld [vmem:[%s7042_s7 + $0x18] sm:$0xff]  }
0x23ad   :  { %v3946_v17 = vmul.f32 0.70710677, %v3938_v49  ;;  %v3942_v18 = vpop.f32.mrb[91].mxu0  ;;  %v4240_v19 = vpop.f32.mrb[87].mxu1  ;;  %v3944_v30 = vmul.f32 0.5, %v3938_v49  ;;  %v4242_v52 = vmul.f32 0.5, %v4236_v29 }
0x23ae   :  { %v3947_v22 = vmul.f32 0.70710677, %v3940_v16  ;;  %v3945_v37 = vmul.f32 0.5, %v3940_v16  ;;  %v4244_v25 = vmul.f32 0.70710677, %v4236_v29  ;;  %v4243_v34 = vmul.f32 0.5, %v4238_v32 }
0x23af   :  { %5591 = verf.f32 %v3946_v17  ;;  %v4245_v38 = vmul.f32 0.70710677, %v4238_v32  ;;  %v5493_v45 = vld [vmem:[%s7042_s7] sm:$0xff]   ;;  %v5494_v17 = vld [vmem:[%s7042_s7 + $0x8] sm:$0xff]   ;;  %v4803_v29 = vld [vmem:[#allocation22] ss:$0 sm:$0xff] }
0x23b0   :  { %5593 = verf.f32 %v3947_v22  ;;  %v5495_v22 = vld [vmem:[%s7042_s7 + $0x10] sm:$0xff]   ;;  %v5497_v18 = vld [vmem:[%s7042_s7 + $0x20] sm:$0xff]   ;;  %v5498_v19 = vld [vmem:[%s7042_s7 + $0x28] sm:$0xff]  }
0x23b9   :  { %v5592_v21 = vpop.eup %5591 }
0x23ba   :  { %v3950_v23 = vadd.f32 1.0, %v5592_v21  ;;  %v5594_v24 = vpop.eup %5593  ;;  %v5499_v21 = vld [vmem:[%s7042_s7 + $0x30] sm:$0xff]  }
0x23bb   :  { %v3951_v42 = vadd.f32 1.0, %v5594_v24 }
0x23bc   :  { %v3952_v31 = vmul.f32 %v3950_v23, %v3944_v30  ;;  %v5500_v23 = vld [vmem:[%s7042_s7 + $0x38] sm:$0xff]  }
0x23bd   :  { %v3953_v47 = vmul.f32 %v3951_v42, %v3945_v37  ;;  %v4804_v37 = vld [vmem:[%s7043_s10] ss:$0 sm:$0xff] }
0x23be   :  { %v3986_v54 = vpack.c.bf16 %v3952_v31, %v3952_v31 }
0x23bf   :  { %v3987_v51 = vpack.c.bf16 %v3953_v47, %v3953_v47 }
0x23c1   :  { %4123 = vmatprep.mubr.bf16.mxu0 %v3987_v51 }
0x23c2   :  { %4124 = vmatmul.mubr.bf16.vlgmr.msra.gmra.mrb[92].mxu0 %v3986_v54 }
0x23c3   :  { %5279 = vmatprep.mubr.msk.bf16.mxu0 %vm5985_vm0, %v5984_v2  ;;  %vm4321_vm0 = vcmask 48128   ;;  %5264 = vmatpush3.bf16.msra.mxu0 %v5493_v45 }
0x23c4   :  { %5265 = vmatprep.subr.bf16.mxu0 %v5984_v2 }
0x23c7   :  { %5266 = vmatpush3.bf16.msra.mxu0 %v5494_v17 }
0x23c8   :  { %5267 = vmatprep.subr.bf16.mxu0 %v5984_v2 }
0x23cb   :  { %5268 = vmatpush3.bf16.msra.mxu0 %v5495_v22 }
0x23cc   :  { %5269 = vmatprep.subr.bf16.mxu0 %v5984_v2 }
0x23cf   :  { %5270 = vmatpush3.bf16.msra.mxu0 %v5496_v13 }
0x23d0   :  { %5271 = vmatprep.subr.bf16.mxu0 %v5984_v2 }
0x23d3   :  { %5272 = vmatpush3.bf16.msra.mxu0 %v5497_v18 }
0x23d4   :  { %5273 = vmatprep.subr.bf16.mxu0 %v5984_v2 }
0x23d7   :  { %5274 = vmatpush3.bf16.msra.mxu0 %v5498_v19 }
0x23d8   :  { %5275 = vmatprep.subr.bf16.mxu0 %v5984_v2 }
0x23db   :  { %5276 = vmatpush3.bf16.msra.mxu0 %v5499_v21 }
0x23dc   :  { %5277 = vmatprep.subr.bf16.mxu0 %v5984_v2 }
0x23df   :  { %5278 = vmatpush3.bf16.msra.mxu0 %v5500_v23 }
0x2495   :  { %v4942_v57 = vpop.f32.mrb[92].mxu0 }
0x2496   :  { %v4943_v28 = vpop.f32.mrb[93].mxu0 }
0x2497   :  { %v4944_v41 = vadd.f32 %v4943_v28, %v4942_v57  ;;  %v4945_v48 = vpop.f32.mrb[94].mxu0  ;;  %v4280_v28 = vsub.s32 2, %v6406_v4 }
0x2498   :  { %v4946_v43 = vpop.f32.mrb[95].mxu0 }
0x2499   :  { %v4126_v44 = vadd.f32 %v4944_v41, %v4777_v33  ;;  %v4807_v33 = vld [vmem:[%s6175_s13] ss:$0 sm:$0xff]  ;;  %s6000_s13 = smov 7  }
0x249b   :  { %v4132_v60 = vmul.f32 0.5, %v4126_v44 }
0x249d   :  { %v4133_v61 = vmul.f32 1.442695, %v4132_v60 }
0x249f   :  { %5595 = vpow2.f32 %v4133_v61  ;;  %v4281_v61 = vrot.slane %v6941_v0, %v4280_v28 }
0x24a0   :  { %5597 = verf.f32 %v4244_v25 }
0x24a1   :  { %5599 = verf.f32 %v4245_v38 }
0x24a9   :  { %v5596_v63 = vpop.eup %5595 }
0x24aa   :  { %4136 = vrot.lane.b32.xlu1 %v5596_v63, %s5999_s0  ;;  %v5598_v26 = vpop.eup %5597 }
0x24ab   :  { %v4248_v55 = vadd.f32 1.0, %v5598_v26  ;;  %v5600_v58 = vpop.eup %5599 }
0x24ac   :  { %v4249_v8 = vadd.f32 1.0, %v5600_v58 }
0x24ad   :  { %v4250_v7 = vmul.f32 %v4248_v55, %v4242_v52 }
0x24ae   :  { %4267 = vrot.lane.b32.xlu1 %v4265_v50, %s5993_s18  ;;  %v4251_v56 = vmul.f32 %v4249_v8, %v4243_v34 }
0x24af   :  { %v4257_v16 = vmul.f32 %v4256_v15, %v4250_v7 }
0x24b0   :  { %v4282_v63 = vmul.f32 %v4281_v61, %v4251_v56 }
0x24b1   :  { %v4259_v39 = vsel %vm4258_vm5, %v4257_v16, 0.0 }
0x24b2   :  { %4291 = vrot.lane.b32.xlu1 %v4289_v46, %s5993_s18  ;;  %v4283_v50 = vsel %vm4258_vm5, %v4282_v63, 0.0 }
0x251c   :  { %v4137_v6 = vpop.permute.xlu1 %4136 }
0x251d   :  { %v4139_v20 = vmul.f32 %v4137_v6, %v4131_v5 }
0x251f   :  { %v6952_v35 = vadd.f32 %v4139_v20, %v4126_v44 }
0x2520   :  { %v4268_v59 = vpop.permute.xlu1 %4267 }
0x2521   :  { %v4322_v9 = vsel %vm4321_vm0, %v6952_v35, %v4319_v27  ;;  %v4270_v10 = vmul.f32 %v4268_v59, %v4250_v7  ;;  %v4816_v27 = vld [vmem:[#allocation23] ss:$0 sm:$0xff] }
0x2522   :  { %v4325_v11 = vpack.c.bf16 %v4322_v9, %v4322_v9 }
0x2523   :  { %4272 = vrot.lane.b32.xlu0 %v4270_v10, %s5993_s18  ;;  %v4817_v10 = vld [vmem:[#allocation2] ss:$0 sm:$0xff] }
0x2524   :  { %5260 = vmatmul.mubr.msk.bf16.vlgmr.msra.gmra.mrb[88].mxu1 %vm4338_vm4, %v4325_v11  ;;  %v4292_v49 = vpop.permute.xlu1 %4291 }
0x2525   :  { %v4294_v14 = vmul.f32 %v4292_v49, %v4251_v56 }
0x2527   :  { %4296 = vrot.lane.b32.xlu1 %v4294_v14, %s5993_s18 }
0x254b   :  { %4260 = vadd.xlane.f32.xlu1 %v4259_v39 }
0x2595   :  { %v4273_v53 = vpop.permute.xlu0 %4272 }
0x2596   :  { %v4275_v62 = vsel %vm4258_vm5, %v4273_v53, 0.0 }
0x2599   :  { %v4297_v24 = vpop.permute.xlu1 %4296 }
0x259a   :  { %v4299_v30 = vsel %vm4258_vm5, %v4297_v24, 0.0 }
0x259b   :  { %4300 = vadd.xlane.f32.xlu1 %v4299_v30 }
0x25d8   :  { %v4261_v36 = vpop.xlane.xlu1 %4260 }
0x25f7   :  { %v4380_v42 = vpop.f32.mrb[88].mxu1 }
0x25f8   :  { %v4381_v31 = vadd.f32 %v4804_v37, %v4380_v42  ;;  %v5261_v47 = vpop.f32.mrb[89].mxu1 }
0x25f9   :  { %v4383_v51 = vpop.f32.mrb[90].mxu1 }
0x25fa   :  { %v4386_v54 = vmax.f32 %v4381_v31, 0.0  ;;  %v5262_v40 = vpop.f32.mrb[91].mxu1 }
0x25fc   :  { %v4403_v57 = vpack.c.bf16 %v4386_v54, %v4386_v54 }
0x25fe   :  { %5280 = vmatmul.mubr.bf16.vlgmr.msra.gmra.mrb[96].mxu0 %v4403_v57 }
0x2628   :  { %v4301_v25 = vpop.xlane.xlu1 %4300 }
0x26d1   :  { %v4493_v41 = vpop.f32.mrb[96].mxu0 }
0x26d2   :  { %v4494_v2 = vadd.f32 %v4807_v33, %v4493_v41  ;;  %v5281_v48 = vpop.f32.mrb[97].mxu0 }
0x26d3   :  { %v4496_v43 = vpop.f32.mrb[98].mxu0 }
0x26d4   :  { %v5282_v44 = vpop.f32.mrb[99].mxu0  ;;  %v4500_v60 = vsel %vm4499_vm6, %v4494_v2, -inf }
0x26d5   :  { %4501 = vmax.xlane.f32.xlu0 %v4500_v60 }
0x26d9   :  { %4276 = vadd.xlane.f32.xlu0 %v4275_v62 }
0x26dd   :  { %4284 = vadd.xlane.f32.xlu0 %v4283_v50 }
0x2762   :  { %v4502_v4 = vpop.xlane.xlu0 %4501 }
0x2763   :  { %v4503_v1 = vsub.f32 %v4494_v2, %v4502_v4 }
0x2765   :  { %v4504_v46 = vmul.f32 1.442695, %v4503_v1 }
0x2766   :  { %v4277_v12 = vpop.xlane.xlu0 %4276 }
0x2767   :  { %5601 = vpow2.f32 %v4504_v46  ;;  %v4303_v0 = vsel %vm4302_vm7, %v4261_v36, %v4277_v12 }
0x276a   :  { %v4285_v3 = vpop.xlane.xlu0 %4284 }
0x276b   :  { %v4305_v32 = vsel %vm4304_vm8, %v4303_v0, %v4285_v3 }
0x276c   :  { %v4307_v38 = vsel %vm4306_vm9, %v4305_v32, %v4301_v25 }
0x276d   :  { %v4315_v26 = vadd.f32 %v4803_v29, %v4307_v38 }
0x276f   :  { %4513 = vrot.lane.b32.xlu1 %v4315_v26, %s5998_s2 }
0x2771   :  { %v5602_v5 = vpop.eup %5601 }
0x2772   :  { %v4506_v55 = vsel %vm4499_vm6, %v5602_v5, 0.0 }
0x2773   :  { %4507 = vadd.xlane.f32.xlu0 %v4506_v55  ;;  %4541 = vrot.lane.b32.xlu1 %v4315_v26, %s6000_s13 }
0x2777   :  { %4545 = vrot.lane.b32.xlu1 %v6952_v35, %s6001_s4 }
0x27e1   :  { %v4514_v7 = vpop.permute.xlu1 %4513 }
0x27e5   :  { %v4542_v9 = vpop.permute.xlu1 %4541 }
0x27e9   :  { %v4546_v14 = vpop.permute.xlu1 %4545 }
0x2800   :  { %v4508_v58 = vpop.xlane.xlu0 %4507 }
0x2801   :  { %5603 = vrcp.f32 %v4508_v58 }
0x280b   :  { %v5604_v6 = vpop.eup %5603 }
0x280c   :  { %v4510_v52 = vmul.f32 %v5604_v6, %v5602_v5 }
0x280e   :  { %v4511_v20 = vmul.f32 %v4510_v52, %v6952_v35 }
0x2810   :  { %v4516_v8 = vsel %vm4321_vm0, %v4511_v20, %v4514_v7 }
0x2811   :  { %v4524_v59 = vmul.f32 %v4816_v27, %v4516_v8 }
0x2813   :  { %v4526_v34 = vsel %vm4525_vm10, %v4524_v59, 0.0 }
0x2814   :  { %4527 = vadd.xlane.f32.xlu0 %v4526_v34 }
0x282a   :  { %4538 = vrot.lane.b32.xlu0 %v4510_v52, %s5971_s24 }
0x28a1   :  { %v4528_v11 = vpop.xlane.xlu0 %4527 }
0x28a2   :  { %v4536_v56 = vadd.f32 %v4817_v10, %v4528_v11 }
0x28a5   :  { %v4539_v49 = vpop.permute.xlu0 %4538 }
0x28a6   :  { %v4548_v35 = vsel %vm4302_vm7, %v4536_v56, %v4539_v49 }
0x28a7   :  { %v4550_v15 = vsel %vm4549_vm11, %v4548_v35, %v4542_v9 }
0x28a8   :  { %v4552_v16 = vsel %vm4551_vm12, %v4550_v15, %v4546_v14 }
0x28a9   :  { %v4554_v39 = vsel %vm4553_vm13, %v4552_v16, 0.0 }
0x28aa   :  { %4555 = vst [vmem:[%s6188_s25] sm:$0x3] %v4554_v39 }
0x28ab   :  { %4560 = vsyncpa [#allocation4], 1 }
0x28ac   :  { %4561 = vsyncpa [#allocation6], 1 }
0x28ad   :  { %4562 = vsyncpa [#allocation9], 1 }
0x28ae   :  { %4563 = vsyncpa [#allocation12], 1 }
0x28af   :  { %4564 = vsyncpa [#allocation15], 1 }
0x28b0   :  { %4565 = vsyncpa [#allocation18], 1 }
0x28b1   :  { %4566 = vsyncpa [#allocation21], 1 }
0x28b2   :  { %4567 = vsyncpa [#allocation24], 1 }

</bundles_post_ra>
